<compile_context>
chip_gen: v5e
topology: v5e:2x2
jax: 0.10.0
libtpu: 0.0.40
codegen_flags: <defaults>
</compile_context>

<pallas_src>
import math

import jax
import jax.numpy as jnp
import numpy as np
from jax.experimental import pallas as pl
from jax.experimental.pallas import tpu as pltpu

I = 16            # input_size
H = 32            # hidden_size
NUM_HEADS = 4
HEAD_DIM = H // NUM_HEADS
TILE_R = 128      # independent (cell, batch) rows per grid step


def _mm(a, b):
    """bf16 MXU matmul with f32 accumulation."""
    return jnp.dot(a.astype(jnp.bfloat16), b, preferred_element_type=jnp.float32)


# --------------------------------------------------------------------------------------
# Kernel: one grid step = TILE_R independent cell rows.
# --------------------------------------------------------------------------------------
def lattice_cells_kernel(x_ref,      # (TILE_R, I)   f32
                         hl_ref,     # (TILE_R, H)   f32  hidden_left
                         hu_ref,     # (TILE_R, H)   f32  hidden_up
                         hp_ref,     # (TILE_R, H)   f32  hidden_prev
                         wx_ref,     # (I, 4H)  bf16  [W_in^T@G3 | Wih_r^T | Wih_z^T | Wih_n^T]
                         wh_ref,     # (H, 4H)  bf16  [Wq^T | Wk^T | Wv^T | G1]
                         mhead_ref,  # (H, H)   bf16  per-head block matrix * softmax scale
                         wout_ref,   # (H, 2H)  bf16  [Wout^T | Wout^T@G2]
                         whh_ref,    # (H, 3H)  bf16  [Whh_r^T | Whh_z^T | Whh_n^T]
                         bias_ref,   # (4, 4H)  f32   rows: bias_x | bias_h | bias_out | bias_hn
                         out_ref):   # (TILE_R, H)   f32
    bias = bias_ref[...]
    bias_x = bias[0:1, :]            # [0 | b_ir+b_hr | b_iz+b_hz | b_in]
    bias_h = bias[1:2, :]            # [b_q | 0 | b_v | 0]
    b_aout = bias[2:3, 0:H]
    b_gate = bias[2:3, H:2 * H]      # folded: b_gate + b_aout@G2 + b_inproj@G3
    b_hn = bias[3:4, 0:H]

    hp = hp_ref[...]

    # ---- M1: all x projections in one matmul -----------------------------------------
    xg = _mm(x_ref[...], wx_ref[...]) + bias_x        # (R, 4H)
    gate_x = xg[:, 0:H]
    gi_r = xg[:, H:2 * H]
    gi_z = xg[:, 2 * H:3 * H]
    gi_n = xg[:, 3 * H:4 * H]

    # ---- M2: QKV for the two attention tokens + h_prev gate term (shared weight) -----
    wh = wh_ref[...]
    hl_p = _mm(hl_ref[...], wh) + bias_h              # [q_l | k_l | v_l | .]
    hu_p = _mm(hu_ref[...], wh) + bias_h              # [q_u | k_u | v_u | .]
    hp_p = _mm(hp, wh)                                # only gate_prev lanes used
    gate_prev = hp_p[:, 3 * H:4 * H]

    q_l = hl_p[:, 0:H]
    q_u = hu_p[:, 0:H]
    dk = hl_p[:, H:2 * H] - hu_p[:, H:2 * H]          # k bias cancels
    v_u = hu_p[:, 2 * H:3 * H]                        # includes b_v
    dv = 0.5 * (hl_p[:, 2 * H:3 * H] - hu_p[:, 2 * H:3 * H])

    # ---- M3: 2-key softmax == sigmoid(per-head score diff). mhead does the per-head
    #          reduce AND broadcast in one block-matrix matmul (scale folded in). --------
    mhead = mhead_ref[...]
    p_l = jax.nn.sigmoid(_mm(q_l * dk, mhead))        # P(key=left | query=left), per head
    p_u = jax.nn.sigmoid(_mm(q_u * dk, mhead))        # P(key=left | query=up),   per head
    psum = p_l + p_u

    # mean over the two tokens of (v_up + p*(v_left - v_up)), before the affine out-proj
    o_mean = v_u + psum * dv

    # ---- M4: attention out-proj and its spatial-gate contribution in one matmul -------
    om = _mm(o_mean, wout_ref[...])                   # (R, 2H)
    spatial_combined = om[:, 0:H] + b_aout
    gate_sp = om[:, H:2 * H]

    gate = jax.nn.sigmoid(gate_prev + gate_sp + gate_x + b_gate)
    enhanced_prev = hp + gate * spatial_combined

    # ---- M5: GRUCell(x, enhanced_prev) hidden projections ------------------------------
    gh = _mm(enhanced_prev, whh_ref[...])             # (R, 3H)
    r = jax.nn.sigmoid(gi_r + gh[:, 0:H])
    z = jax.nn.sigmoid(gi_z + gh[:, H:2 * H])
    n = jnp.tanh(gi_n + r * (gh[:, 2 * H:3 * H] + b_hn))

    # eval mode: final nn.Dropout is identity
    out_ref[...] = (1.0 - z) * n + z * enhanced_prev


# --------------------------------------------------------------------------------------
# Wrapper: rows = any number of independent (cell, batch) instances.
# --------------------------------------------------------------------------------------
@jax.jit
def lattice_cells_pallas(x, h_left, h_up, h_prev, fp):
    r = x.shape[0]
    rp = ((r + TILE_R - 1) // TILE_R) * TILE_R

    def pad(a):
        return a if a.shape[0] == rp else jnp.pad(a, ((0, rp - a.shape[0]), (0, 0)))

    xs, hl, hu, hp = pad(x), pad(h_left), pad(h_up), pad(h_prev)

    def row_spec(d):
        return pl.BlockSpec((TILE_R, d), lambda i: (i, 0))

    def resident_spec(a):                      # full array, constant block -> stays in VMEM
        return pl.BlockSpec(a.shape, lambda i: (0, 0))

    out = pl.pallas_call(
        lattice_cells_kernel,
        out_shape=jax.ShapeDtypeStruct((rp, H), jnp.float32),
        grid=(rp // TILE_R,),
        in_specs=[row_spec(I), row_spec(H), row_spec(H), row_spec(H),
                  resident_spec(fp["wx"]), resident_spec(fp["wh"]),
                  resident_spec(fp["mhead"]), resident_spec(fp["wout"]),
                  resident_spec(fp["whh"]), resident_spec(fp["bias"])],
        out_specs=row_spec(H),
        compiler_params=pltpu.CompilerParams(dimension_semantics=("parallel",)),
    )(xs, hl, hu, hp, fp["wx"], fp["wh"], fp["mhead"], fp["wout"], fp["whh"], fp["bias"])
    return out[:r]


# Single module-forward-sized step (x: (B, I), hiddens: (B, H)).
def lattice_cell_pallas(x, h_left, h_up, h_prev, fp):
    return lattice_cells_pallas(x, h_left, h_up, h_prev, fp)


# --------------------------------------------------------------------------------------
# Parameters (PyTorch layouts) and one-time fusion into kernel layouts.
# --------------------------------------------------------------------------------------
def make_params(key):
    """Deterministic synthetic parameters, PyTorch layouts.

    The module zero-inits biases; small random biases are used here so the bias folds in
    prepare_params are actually exercised by the numerics check."""
    ks = jax.random.split(key, 12)

    def xavier(k, shape):
        fan_out, fan_in = shape
        bound = math.sqrt(6.0 / (fan_in + fan_out))
        return jax.random.uniform(k, shape, jnp.float32, -bound, bound)

    def small(k, shape):
        return 0.1 * jax.random.normal(k, shape, jnp.float32)

    p = {}
    p["w_inproj"] = xavier(ks[0], (H, I))            # input_proj.weight
    p["b_inproj"] = small(ks[1], (H,))
    p["in_proj_weight"] = xavier(ks[2], (3 * H, H))  # attn in_proj
    p["in_proj_bias"] = small(ks[3], (3 * H,))
    p["w_attn_out"] = xavier(ks[4], (H, H))          # attn out_proj.weight
    p["b_attn_out"] = small(ks[5], (H,))
    p["w_gate"] = xavier(ks[6], (H, 3 * H))          # spatial_gate Linear
    p["b_gate"] = small(ks[7], (H,))
    p["w_ih"] = 0.1 * jax.random.normal(ks[8], (3 * H, I), jnp.float32)
    p["w_hh"] = 0.1 * jax.random.normal(ks[9], (3 * H, H), jnp.float32)
    p["b_ih"] = small(ks[10], (3 * H,))
    p["b_hh"] = small(ks[11], (3 * H,))
    # NOTE: self.neighbor_processor is defined in __init__ but never used in forward().
    return p


def prepare_params(p):
    """One-time weight fusion / transposition (PyTorch layout -> kernel layout, bf16)."""
    hi = jax.lax.Precision.HIGHEST

    w_in_t = p["w_inproj"].T                      # (I, H)
    wq_t = p["in_proj_weight"][0:H].T             # (H, H)
    wk_t = p["in_proj_weight"][H:2 * H].T
    wv_t = p["in_proj_weight"][2 * H:3 * H].T
    w_out_t = p["w_attn_out"].T                   # (H, H)
    g1 = p["w_gate"][:, 0:H].T                    # gate weight for h_prev
    g2 = p["w_gate"][:, H:2 * H].T                # gate weight for spatial_combined
    g3 = p["w_gate"][:, 2 * H:3 * H].T            # gate weight for x_proj
    wih_t = p["w_ih"].T                           # (I, 3H)
    whh_t = p["w_hh"].T                           # (H, 3H)

    gate_x_w = jnp.dot(w_in_t, g3, precision=hi)      # x contribution to gate
    gate_sp_w = jnp.dot(w_out_t, g2, precision=hi)    # o_mean contribution to gate
    b_gate_eff = (p["b_gate"]
                  + jnp.dot(p["b_attn_out"], g2, precision=hi)
                  + jnp.dot(p["b_inproj"], g3, precision=hi))

    def fuse(*blocks):
        return jnp.concatenate(blocks, axis=1).astype(jnp.bfloat16)

    wx = fuse(gate_x_w, wih_t[:, 0:H], wih_t[:, H:2 * H], wih_t[:, 2 * H:3 * H])  # (I, 4H)
    wh = fuse(wq_t, wk_t, wv_t, g1)                                               # (H, 4H)
    wout = fuse(w_out_t, gate_sp_w)                                               # (H, 2H)
    whh = fuse(whh_t[:, 0:H], whh_t[:, H:2 * H], whh_t[:, 2 * H:3 * H])           # (H, 3H)

    # Per-head reduce+broadcast block matrix with the softmax scale folded in.
    head = jnp.arange(H) // HEAD_DIM
    mhead = jnp.where(head[:, None] == head[None, :],
                      1.0 / math.sqrt(HEAD_DIM), 0.0).astype(jnp.bfloat16)        # (H, H)

    z = jnp.zeros((H,), jnp.float32)
    bias_x = jnp.concatenate([z,
                              p["b_ih"][0:H] + p["b_hh"][0:H],
                              p["b_ih"][H:2 * H] + p["b_hh"][H:2 * H],
                              p["b_ih"][2 * H:3 * H]])
    bias_h = jnp.concatenate([p["in_proj_bias"][0:H], z,
                              p["in_proj_bias"][2 * H:3 * H], z])
    bias_o = jnp.concatenate([p["b_attn_out"], b_gate_eff, z, z])
    bias_n = jnp.concatenate([p["b_hh"][2 * H:3 * H], z, z, z])
    bias = jnp.stack([bias_x, bias_h, bias_o, bias_n], axis=0).astype(jnp.float32)  # (4, 4H)

    return {"wx": wx, "wh": wh, "mhead": mhead, "wout": wout, "whh": whh, "bias": bias}


# --------------------------------------------------------------------------------------
# Pure-JAX reference mirroring the PyTorch forward (eval mode), row-wise independent.
# --------------------------------------------------------------------------------------
def lattice_cell_reference(x, h_left, h_up, h_prev, p):
    rows = x.shape[0]
    x_proj = x @ p["w_inproj"].T + p["b_inproj"]

    sp_in = jnp.stack([h_left, h_up], axis=1)  # (R, 2, H)
    qkv_w = p["in_proj_weight"]
    qkv_b = p["in_proj_bias"]
    q = sp_in @ qkv_w[0:H].T + qkv_b[0:H]
    k = sp_in @ qkv_w[H:2 * H].T + qkv_b[H:2 * H]
    v = sp_in @ qkv_w[2 * H:3 * H].T + qkv_b[2 * H:3 * H]
    q4 = q.reshape(rows, 2, NUM_HEADS, HEAD_DIM).transpose(0, 2, 1, 3)
    k4 = k.reshape(rows, 2, NUM_HEADS, HEAD_DIM).transpose(0, 2, 1, 3)
    v4 = v.reshape(rows, 2, NUM_HEADS, HEAD_DIM).transpose(0, 2, 1, 3)
    scores = jnp.einsum("bhqd,bhkd->bhqk", q4, k4) / math.sqrt(HEAD_DIM)
    probs = jax.nn.softmax(scores, axis=-1)
    o = jnp.einsum("bhqk,bhkd->bhqd", probs, v4).transpose(0, 2, 1, 3).reshape(rows, 2, H)
    attn_out = o @ p["w_attn_out"].T + p["b_attn_out"]
    spatial_combined = attn_out.mean(axis=1)

    gate_in = jnp.concatenate([h_prev, spatial_combined, x_proj], axis=1)
    gate = jax.nn.sigmoid(gate_in @ p["w_gate"].T + p["b_gate"])
    enhanced = h_prev + gate * spatial_combined

    gi = x @ p["w_ih"].T + p["b_ih"]
    gh = enhanced @ p["w_hh"].T + p["b_hh"]
    i_r, i_z, i_n = jnp.split(gi, 3, axis=1)
    h_r, h_z, h_n = jnp.split(gh, 3, axis=1)
    r = jax.nn.sigmoid(i_r + h_r)
    z = jax.nn.sigmoid(i_z + h_z)
    n = jnp.tanh(i_n + r * h_n)
    return (1.0 - z) * n + z * enhanced


if __name__ == "__main__":
    key = jax.random.PRNGKey(0)
    k_params, kx, kl, ku, kp = jax.random.split(key, 5)
    params = make_params(k_params)
    fused = prepare_params(params)

    # 32 independent cell instances x batch 8 = 256 rows -> fills the MXU M dimension,
    # grid of 2 row-tiles ("parallel" -> both v7x TensorCores).
    N_CELLS, B = 32, 8
    R = N_CELLS * B
    x = jax.random.normal(kx, (R, I), jnp.float32)
    h_left = jax.random.normal(kl, (R, H), jnp.float32)
    h_up = jax.random.normal(ku, (R, H), jnp.float32)
    h_prev = jax.random.normal(kp, (R, H), jnp.float32)

    out = jax.block_until_ready(lattice_cells_pallas(x, h_left, h_up, h_prev, fused))
    ref = jax.block_until_ready(lattice_cell_reference(x, h_left, h_up, h_prev, params))
    np.testing.assert_allclose(np.asarray(out), np.asarray(ref), rtol=2.5e-2, atol=2.5e-2)

    # Single module-forward-sized step (batch = 8) through the same kernel.
    out1 = jax.block_until_ready(
        lattice_cell_pallas(x[:B], h_left[:B], h_up[:B], h_prev[:B], fused))
    np.testing.assert_allclose(np.asarray(out1), np.asarray(ref[:B]),
                               rtol=2.5e-2, atol=2.5e-2)

    print("KERNEL_OK")
</pallas_src>

<mosaic_0001>
module attributes {stable_mosaic.version = 11 : i64} {
  func.func @lattice_cells_kernel(%arg0: i32, %arg1: memref<128x16xf32, #tpu.memory_space<vmem>>, %arg2: memref<128x32xf32, #tpu.memory_space<vmem>>, %arg3: memref<128x32xf32, #tpu.memory_space<vmem>>, %arg4: memref<128x32xf32, #tpu.memory_space<vmem>>, %arg5: memref<16x128xbf16, #tpu.memory_space<vmem>>, %arg6: memref<32x128xbf16, #tpu.memory_space<vmem>>, %arg7: memref<32x32xbf16, #tpu.memory_space<vmem>>, %arg8: memref<32x64xbf16, #tpu.memory_space<vmem>>, %arg9: memref<32x96xbf16, #tpu.memory_space<vmem>>, %arg10: memref<4x128xf32, #tpu.memory_space<vmem>>, %arg11: memref<128x32xf32, #tpu.memory_space<vmem>>) attributes {dimension_semantics = [#tpu.dimension_semantics<parallel>], iteration_bounds = array<i64: 2>, scalar_prefetch = 0 : i64, scratch_operands = 0 : i64, tpu.core_type = #tpu.core_type<tc>, window_params = [{transform_indices = @transform_0, window_bounds = array<i64: 128, 16>}, {transform_indices = @transform_1, window_bounds = array<i64: 128, 32>}, {transform_indices = @transform_2, window_bounds = array<i64: 128, 32>}, {transform_indices = @transform_3, window_bounds = array<i64: 128, 32>}, {pipeline_mode = #tpu.pipeline_mode<synchronous>, transform_indices = @transform_4, window_bounds = array<i64: 16, 128>}, {pipeline_mode = #tpu.pipeline_mode<synchronous>, transform_indices = @transform_5, window_bounds = array<i64: 32, 128>}, {pipeline_mode = #tpu.pipeline_mode<synchronous>, transform_indices = @transform_6, window_bounds = array<i64: 32, 32>}, {pipeline_mode = #tpu.pipeline_mode<synchronous>, transform_indices = @transform_7, window_bounds = array<i64: 32, 64>}, {pipeline_mode = #tpu.pipeline_mode<synchronous>, transform_indices = @transform_8, window_bounds = array<i64: 32, 96>}, {pipeline_mode = #tpu.pipeline_mode<synchronous>, transform_indices = @transform_9, window_bounds = array<i64: 4, 128>}, {transform_indices = @transform_10, window_bounds = array<i64: 128, 32>}]} {
    %c0 = arith.constant 0 : index
    %c0_0 = arith.constant 0 : index
    %0 = vector.load %arg10[%c0, %c0_0] : memref<4x128xf32, #tpu.memory_space<vmem>>, vector<4x128xf32>
    %1 = vector.extract_strided_slice %0 {offsets = [0, 0], sizes = [1, 128], strides = [1, 1]} : vector<4x128xf32> to vector<1x128xf32>
    %2 = vector.extract_strided_slice %0 {offsets = [1, 0], sizes = [1, 128], strides = [1, 1]} : vector<4x128xf32> to vector<1x128xf32>
    %3 = vector.extract_strided_slice %0 {offsets = [2, 0], sizes = [1, 32], strides = [1, 1]} : vector<4x128xf32> to vector<1x32xf32>
    %4 = vector.extract_strided_slice %0 {offsets = [2, 32], sizes = [1, 32], strides = [1, 1]} : vector<4x128xf32> to vector<1x32xf32>
    %5 = vector.extract_strided_slice %0 {offsets = [3, 0], sizes = [1, 32], strides = [1, 1]} : vector<4x128xf32> to vector<1x32xf32>
    %c0_1 = arith.constant 0 : index
    %c0_2 = arith.constant 0 : index
    %6 = vector.load %arg4[%c0_1, %c0_2] : memref<128x32xf32, #tpu.memory_space<vmem>>, vector<128x32xf32>
    %c0_3 = arith.constant 0 : index
    %c0_4 = arith.constant 0 : index
    %7 = vector.load %arg1[%c0_3, %c0_4] : memref<128x16xf32, #tpu.memory_space<vmem>>, vector<128x16xf32>
    %c0_5 = arith.constant 0 : index
    %c0_6 = arith.constant 0 : index
    %8 = vector.load %arg5[%c0_5, %c0_6] : memref<16x128xbf16, #tpu.memory_space<vmem>>, vector<16x128xbf16>
    %9 = arith.truncf %7 : vector<128x16xf32> to vector<128x16xbf16>
    %cst = arith.constant dense<0.000000e+00> : vector<128x128xf32>
    %10 = tpu.matmul %9, %8, %cst {dimension_numbers = #tpu.dot_dimension_numbers<[1], [0], [0], [1], [0, 0, 1, 1], [], []>} : vector<128x16xbf16>, vector<16x128xbf16>, vector<128x128xf32> -> vector<128x128xf32>
    %11 = vector.broadcast %1 : vector<1x128xf32> to vector<128x128xf32>
    %12 = arith.addf %10, %11 : vector<128x128xf32>
    %13 = vector.extract_strided_slice %12 {offsets = [0, 0], sizes = [128, 32], strides = [1, 1]} : vector<128x128xf32> to vector<128x32xf32>
    %14 = vector.extract_strided_slice %12 {offsets = [0, 32], sizes = [128, 32], strides = [1, 1]} : vector<128x128xf32> to vector<128x32xf32>
    %15 = vector.extract_strided_slice %12 {offsets = [0, 64], sizes = [128, 32], strides = [1, 1]} : vector<128x128xf32> to vector<128x32xf32>
    %16 = vector.extract_strided_slice %12 {offsets = [0, 96], sizes = [128, 32], strides = [1, 1]} : vector<128x128xf32> to vector<128x32xf32>
    %c0_7 = arith.constant 0 : index
    %c0_8 = arith.constant 0 : index
    %17 = vector.load %arg6[%c0_7, %c0_8] : memref<32x128xbf16, #tpu.memory_space<vmem>>, vector<32x128xbf16>
    %c0_9 = arith.constant 0 : index
    %c0_10 = arith.constant 0 : index
    %18 = vector.load %arg2[%c0_9, %c0_10] : memref<128x32xf32, #tpu.memory_space<vmem>>, vector<128x32xf32>
    %19 = arith.truncf %18 : vector<128x32xf32> to vector<128x32xbf16>
    %cst_11 = arith.constant dense<0.000000e+00> : vector<128x128xf32>
    %20 = tpu.matmul %19, %17, %cst_11 {dimension_numbers = #tpu.dot_dimension_numbers<[1], [0], [0], [1], [0, 0, 1, 1], [], []>} : vector<128x32xbf16>, vector<32x128xbf16>, vector<128x128xf32> -> vector<128x128xf32>
    %21 = vector.broadcast %2 : vector<1x128xf32> to vector<128x128xf32>
    %22 = arith.addf %20, %21 : vector<128x128xf32>
    %c0_12 = arith.constant 0 : index
    %c0_13 = arith.constant 0 : index
    %23 = vector.load %arg3[%c0_12, %c0_13] : memref<128x32xf32, #tpu.memory_space<vmem>>, vector<128x32xf32>
    %24 = arith.truncf %23 : vector<128x32xf32> to vector<128x32xbf16>
    %cst_14 = arith.constant dense<0.000000e+00> : vector<128x128xf32>
    %25 = tpu.matmul %24, %17, %cst_14 {dimension_numbers = #tpu.dot_dimension_numbers<[1], [0], [0], [1], [0, 0, 1, 1], [], []>} : vector<128x32xbf16>, vector<32x128xbf16>, vector<128x128xf32> -> vector<128x128xf32>
    %26 = vector.broadcast %2 : vector<1x128xf32> to vector<128x128xf32>
    %27 = arith.addf %25, %26 : vector<128x128xf32>
    %28 = arith.truncf %6 : vector<128x32xf32> to vector<128x32xbf16>
    %cst_15 = arith.constant dense<0.000000e+00> : vector<128x128xf32>
    %29 = tpu.matmul %28, %17, %cst_15 {dimension_numbers = #tpu.dot_dimension_numbers<[1], [0], [0], [1], [0, 0, 1, 1], [], []>} : vector<128x32xbf16>, vector<32x128xbf16>, vector<128x128xf32> -> vector<128x128xf32>
    %30 = vector.extract_strided_slice %29 {offsets = [0, 96], sizes = [128, 32], strides = [1, 1]} : vector<128x128xf32> to vector<128x32xf32>
    %31 = vector.extract_strided_slice %22 {offsets = [0, 0], sizes = [128, 32], strides = [1, 1]} : vector<128x128xf32> to vector<128x32xf32>
    %32 = vector.extract_strided_slice %27 {offsets = [0, 0], sizes = [128, 32], strides = [1, 1]} : vector<128x128xf32> to vector<128x32xf32>
    %33 = vector.extract_strided_slice %22 {offsets = [0, 32], sizes = [128, 32], strides = [1, 1]} : vector<128x128xf32> to vector<128x32xf32>
    %34 = vector.extract_strided_slice %27 {offsets = [0, 32], sizes = [128, 32], strides = [1, 1]} : vector<128x128xf32> to vector<128x32xf32>
    %35 = arith.subf %33, %34 : vector<128x32xf32>
    %36 = vector.extract_strided_slice %27 {offsets = [0, 64], sizes = [128, 32], strides = [1, 1]} : vector<128x128xf32> to vector<128x32xf32>
    %37 = vector.extract_strided_slice %22 {offsets = [0, 64], sizes = [128, 32], strides = [1, 1]} : vector<128x128xf32> to vector<128x32xf32>
    %38 = vector.extract_strided_slice %27 {offsets = [0, 64], sizes = [128, 32], strides = [1, 1]} : vector<128x128xf32> to vector<128x32xf32>
    %39 = arith.subf %37, %38 : vector<128x32xf32>
    %cst_16 = arith.constant 5.000000e-01 : f32
    %40 = vector.broadcast %cst_16 : f32 to vector<128x32xf32>
    %41 = arith.mulf %40, %39 : vector<128x32xf32>
    %c0_17 = arith.constant 0 : index
    %c0_18 = arith.constant 0 : index
    %42 = vector.load %arg7[%c0_17, %c0_18] : memref<32x32xbf16, #tpu.memory_space<vmem>>, vector<32x32xbf16>
    %43 = arith.mulf %31, %35 : vector<128x32xf32>
    %44 = arith.truncf %43 : vector<128x32xf32> to vector<128x32xbf16>
    %cst_19 = arith.constant dense<0.000000e+00> : vector<128x32xf32>
    %45 = tpu.matmul %44, %42, %cst_19 {dimension_numbers = #tpu.dot_dimension_numbers<[1], [0], [0], [1], [0, 0, 1, 1], [], []>} : vector<128x32xbf16>, vector<32x32xbf16>, vector<128x32xf32> -> vector<128x32xf32>
    %46 = arith.negf %45 : vector<128x32xf32>
    %47 = math.exp %46 : vector<128x32xf32>
    %cst_20 = arith.constant 1.000000e+00 : f32
    %48 = vector.broadcast %cst_20 : f32 to vector<128x32xf32>
    %49 = arith.addf %48, %47 : vector<128x32xf32>
    %50 = arith.divf %48, %49 : vector<128x32xf32>
    %51 = arith.mulf %32, %35 : vector<128x32xf32>
    %52 = arith.truncf %51 : vector<128x32xf32> to vector<128x32xbf16>
    %cst_21 = arith.constant dense<0.000000e+00> : vector<128x32xf32>
    %53 = tpu.matmul %52, %42, %cst_21 {dimension_numbers = #tpu.dot_dimension_numbers<[1], [0], [0], [1], [0, 0, 1, 1], [], []>} : vector<128x32xbf16>, vector<32x32xbf16>, vector<128x32xf32> -> vector<128x32xf32>
    %54 = arith.negf %53 : vector<128x32xf32>
    %55 = math.exp %54 : vector<128x32xf32>
    %cst_22 = arith.constant 1.000000e+00 : f32
    %56 = vector.broadcast %cst_22 : f32 to vector<128x32xf32>
    %57 = arith.addf %56, %55 : vector<128x32xf32>
    %58 = arith.divf %56, %57 : vector<128x32xf32>
    %59 = arith.addf %50, %58 : vector<128x32xf32>
    %60 = arith.mulf %59, %41 : vector<128x32xf32>
    %61 = arith.addf %36, %60 : vector<128x32xf32>
    %c0_23 = arith.constant 0 : index
    %c0_24 = arith.constant 0 : index
    %62 = vector.load %arg8[%c0_23, %c0_24] : memref<32x64xbf16, #tpu.memory_space<vmem>>, vector<32x64xbf16>
    %63 = arith.truncf %61 : vector<128x32xf32> to vector<128x32xbf16>
    %cst_25 = arith.constant dense<0.000000e+00> : vector<128x64xf32>
    %64 = tpu.matmul %63, %62, %cst_25 {dimension_numbers = #tpu.dot_dimension_numbers<[1], [0], [0], [1], [0, 0, 1, 1], [], []>} : vector<128x32xbf16>, vector<32x64xbf16>, vector<128x64xf32> -> vector<128x64xf32>
    %65 = vector.extract_strided_slice %64 {offsets = [0, 0], sizes = [128, 32], strides = [1, 1]} : vector<128x64xf32> to vector<128x32xf32>
    %66 = vector.broadcast %3 : vector<1x32xf32> to vector<128x32xf32>
    %67 = arith.addf %65, %66 : vector<128x32xf32>
    %68 = vector.extract_strided_slice %64 {offsets = [0, 32], sizes = [128, 32], strides = [1, 1]} : vector<128x64xf32> to vector<128x32xf32>
    %69 = arith.addf %30, %68 : vector<128x32xf32>
    %70 = arith.addf %69, %13 : vector<128x32xf32>
    %71 = vector.broadcast %4 : vector<1x32xf32> to vector<128x32xf32>
    %72 = arith.addf %70, %71 : vector<128x32xf32>
    %73 = arith.negf %72 : vector<128x32xf32>
    %74 = math.exp %73 : vector<128x32xf32>
    %cst_26 = arith.constant 1.000000e+00 : f32
    %75 = vector.broadcast %cst_26 : f32 to vector<128x32xf32>
    %76 = arith.addf %75, %74 : vector<128x32xf32>
    %77 = arith.divf %75, %76 : vector<128x32xf32>
    %78 = arith.mulf %77, %67 : vector<128x32xf32>
    %79 = arith.addf %6, %78 : vector<128x32xf32>
    %c0_27 = arith.constant 0 : index
    %c0_28 = arith.constant 0 : index
    %80 = vector.load %arg9[%c0_27, %c0_28] : memref<32x96xbf16, #tpu.memory_space<vmem>>, vector<32x96xbf16>
    %81 = arith.truncf %79 : vector<128x32xf32> to vector<128x32xbf16>
    %cst_29 = arith.constant dense<0.000000e+00> : vector<128x96xf32>
    %82 = tpu.matmul %81, %80, %cst_29 {dimension_numbers = #tpu.dot_dimension_numbers<[1], [0], [0], [1], [0, 0, 1, 1], [], []>} : vector<128x32xbf16>, vector<32x96xbf16>, vector<128x96xf32> -> vector<128x96xf32>
    %83 = vector.extract_strided_slice %82 {offsets = [0, 0], sizes = [128, 32], strides = [1, 1]} : vector<128x96xf32> to vector<128x32xf32>
    %84 = arith.addf %14, %83 : vector<128x32xf32>
    %85 = arith.negf %84 : vector<128x32xf32>
    %86 = math.exp %85 : vector<128x32xf32>
    %cst_30 = arith.constant 1.000000e+00 : f32
    %87 = vector.broadcast %cst_30 : f32 to vector<128x32xf32>
    %88 = arith.addf %87, %86 : vector<128x32xf32>
    %89 = arith.divf %87, %88 : vector<128x32xf32>
    %90 = vector.extract_strided_slice %82 {offsets = [0, 32], sizes = [128, 32], strides = [1, 1]} : vector<128x96xf32> to vector<128x32xf32>
    %91 = arith.addf %15, %90 : vector<128x32xf32>
    %92 = arith.negf %91 : vector<128x32xf32>
    %93 = math.exp %92 : vector<128x32xf32>
    %cst_31 = arith.constant 1.000000e+00 : f32
    %94 = vector.broadcast %cst_31 : f32 to vector<128x32xf32>
    %95 = arith.addf %94, %93 : vector<128x32xf32>
    %96 = arith.divf %94, %95 : vector<128x32xf32>
    %97 = vector.extract_strided_slice %82 {offsets = [0, 64], sizes = [128, 32], strides = [1, 1]} : vector<128x96xf32> to vector<128x32xf32>
    %98 = vector.broadcast %5 : vector<1x32xf32> to vector<128x32xf32>
    %99 = arith.addf %97, %98 : vector<128x32xf32>
    %100 = arith.mulf %89, %99 : vector<128x32xf32>
    %101 = arith.addf %16, %100 : vector<128x32xf32>
    %102 = math.tanh %101 : vector<128x32xf32>
    %cst_32 = arith.constant 1.000000e+00 : f32
    %103 = vector.broadcast %cst_32 : f32 to vector<128x32xf32>
    %104 = arith.subf %103, %96 : vector<128x32xf32>
    %105 = arith.mulf %104, %102 : vector<128x32xf32>
    %106 = arith.mulf %96, %79 : vector<128x32xf32>
    %107 = arith.addf %105, %106 : vector<128x32xf32>
    %c0_33 = arith.constant 0 : index
    %c0_34 = arith.constant 0 : index
    %108 = vector.load %arg11[%c0_33, %c0_34] : memref<128x32xf32, #tpu.memory_space<vmem>>, vector<128x32xf32>
    tpu.vector_store %arg11[%c0_33, %c0_34], %107 {strides = array<i32>} : memref<128x32xf32, #tpu.memory_space<vmem>>, vector<128x32xf32>,
    return
  }
  func.func @transform_0(%arg0: i32) -> (i32, i32) {
    %c0_i32 = arith.constant 0 : i32
    %c0_i32_0 = arith.constant 0 : i32
    return %arg0, %c0_i32 : i32, i32
  }
  func.func @transform_1(%arg0: i32) -> (i32, i32) {
    %c0_i32 = arith.constant 0 : i32
    %c0_i32_0 = arith.constant 0 : i32
    return %arg0, %c0_i32 : i32, i32
  }
  func.func @transform_2(%arg0: i32) -> (i32, i32) {
    %c0_i32 = arith.constant 0 : i32
    %c0_i32_0 = arith.constant 0 : i32
    return %arg0, %c0_i32 : i32, i32
  }
  func.func @transform_3(%arg0: i32) -> (i32, i32) {
    %c0_i32 = arith.constant 0 : i32
    %c0_i32_0 = arith.constant 0 : i32
    return %arg0, %c0_i32 : i32, i32
  }
  func.func @transform_4(%arg0: i32) -> (i32, i32) {
    %c0_i32 = arith.constant 0 : i32
    %c0_i32_0 = arith.constant 0 : i32
    %c0_i32_1 = arith.constant 0 : i32
    return %c0_i32, %c0_i32_0 : i32, i32
  }
  func.func @transform_5(%arg0: i32) -> (i32, i32) {
    %c0_i32 = arith.constant 0 : i32
    %c0_i32_0 = arith.constant 0 : i32
    %c0_i32_1 = arith.constant 0 : i32
    return %c0_i32, %c0_i32_0 : i32, i32
  }
  func.func @transform_6(%arg0: i32) -> (i32, i32) {
    %c0_i32 = arith.constant 0 : i32
    %c0_i32_0 = arith.constant 0 : i32
    %c0_i32_1 = arith.constant 0 : i32
    return %c0_i32, %c0_i32_0 : i32, i32
  }
  func.func @transform_7(%arg0: i32) -> (i32, i32) {
    %c0_i32 = arith.constant 0 : i32
    %c0_i32_0 = arith.constant 0 : i32
    %c0_i32_1 = arith.constant 0 : i32
    return %c0_i32, %c0_i32_0 : i32, i32
  }
  func.func @transform_8(%arg0: i32) -> (i32, i32) {
    %c0_i32 = arith.constant 0 : i32
    %c0_i32_0 = arith.constant 0 : i32
    %c0_i32_1 = arith.constant 0 : i32
    return %c0_i32, %c0_i32_0 : i32, i32
  }
  func.func @transform_9(%arg0: i32) -> (i32, i32) {
    %c0_i32 = arith.constant 0 : i32
    %c0_i32_0 = arith.constant 0 : i32
    %c0_i32_1 = arith.constant 0 : i32
    return %c0_i32, %c0_i32_0 : i32, i32
  }
  func.func @transform_10(%arg0: i32) -> (i32, i32) {
    %c0_i32 = arith.constant 0 : i32
    %c0_i32_0 = arith.constant 0 : i32
    return %arg0, %c0_i32 : i32, i32
  }
}

</mosaic_0001>

<bundles_post_ra>
// kernel: lattice_cells_pallas.1
= control target key start
LH: loop header
LB: loop body
LE: loop exit
PB: predicated region body
PF: predicated region fallthrough
CT: control target
= control target key end

     0   :  { %s4325_s13 = smov 0   ;;  %s6522_s0 = inlined_call_operand.vmem [shape: f32[256,16], index: 0, kind: input, shape index: {}]   ;;  %s6523_s1 = inlined_call_operand.vmem [shape: f32[256,32], index: 1, kind: input, shape index: {}]   ;;  %s6524_s2 = inlined_call_operand.vmem [shape: f32[256,32], index: 2, kind: input, shape index: {}]   ;;  %s6525_s3 = inlined_call_operand.vmem [shape: f32[256,32], index: 3, kind: input, shape index: {}]   ;;  %s6526_s4 = inlined_call_operand.vmem [shape: bf16[16,128], index: 4, kind: input, shape index: {}]   ;;  %s6527_s5 = inlined_call_operand.vmem [shape: bf16[32,128], index: 5, kind: input, shape index: {}]   ;;  %s6528_s6 = inlined_call_operand.vmem [shape: bf16[32,32], index: 6, kind: input, shape index: {}]   ;;  %s6529_s7 = inlined_call_operand.vmem [shape: bf16[32,64], index: 7, kind: input, shape index: {}]   ;;  %s6530_s8 = inlined_call_operand.vmem [shape: bf16[32,96], index: 8, kind: input, shape index: {}]   ;;  %s6531_s9 = inlined_call_operand.vmem [shape: f32[4,128], index: 9, kind: input, shape index: {}]   ;;  %s6532_s10 = inlined_call_operand.vmem [shape: f32[256,32], index: 10, kind: output, shape index: {}]  }
   0x1 LB: > { %s3761_s14 = sadd.s32 4294967295, %s4265_s13   ;;  %p3765_p0 = scmp.ge.s32.totalorder %s4265_s13, 1  ;;  %s4265_s13 = sphi %s4325_s13, %s20_s13  }
   0x2   : > { %p346_p1 = scmp.lt.s32.totalorder %s4265_s13, 3 }
   0x4   : > { %p347_p2 = pnand %p3765_p0, %p346_p1 }
   0x6   : > { %350 = sbr.rel (%p347_p2) target bundleno = 2068 (0x814), region = 60 }
   0xb   : > { %v3944_v0 = vld [vmem:[%s6527_s5 + $0x8] sm:$0xff]  ;;  %s3766_s17 = sshll.u32 %s3761_s14, 4  ;;  %v3943_v1 = vld [vmem:[%s6527_s5] sm:$0xff]  ;;  %vm595_vm0 = vcmask 261120   ;;  %vm480_vm1 = vcmask 130048   ;;  %s4268_s21 = smov 64  }
   0xc   : > { %p400_p3 = scmp.lt.s32.totalorder %s3766_s17, 31  ;;  %626 = vmatpush.bf16.msra.mxu1 %v3944_v0  ;;  %723 = vmatpush.bf16.msra.mxu2 %v3944_v0  ;;  %v3942_v38 = vld [vmem:[%s6526_s4] sm:$0xff]  ;;  %v3946_v48 = vld [vmem:[%s6528_s6 + $0x8] sm:$0xff] }
   0xd   : > { %804 = vmatpush.bf16.msra.mxu3 %v3944_v0  ;;  %512 = vmatpush.bf16.msra.mxu0 %v3942_v38  ;;  %v430_v58 = vld [vmem:[%s6531_s9] sm:$0xf] }
   0xe   : > { %s6665_s17 = smov (!%p400_p3, %s3766_s17), 31  ;;  %v4424_v63 = vperm.slane %v430_v58, 1 }
   0xf   : > { %s4339_s20 = sshll.u32 %s6665_s17, 3  ;;  %s4267_s17 = smov 96  }
  0x10   : > { %627 = vmatpush.bf16.msra.mxu1 %v3943_v1  ;;  %724 = vmatpush.bf16.msra.mxu2 %v3943_v1  ;;  %s4345_s23 = scalar_lea.vmem %s6523_s1, %s4339_s20  ;;  %s4351_s26 = scalar_lea.vmem %s6524_s2, %s4339_s20 }
  0x11   : > { %v558_v2 = vld [vmem:[%s4345_s23] sm:$0xff]  ;;  %v559_v3 = vld [vmem:[%s4345_s23 + $0x8] sm:$0xff]  ;;  %805 = vmatpush.bf16.msra.mxu3 %v3943_v1  ;;  %v560_v8 = vld [vmem:[%s4345_s23 + $0x10] sm:$0xff]  ;;  %s4400_s11 = scalar_lea.vmem %s6522_s0, %s4339_s20  ;;  %1013 = vmatpush.bf16.msrb.mxu0 %v3946_v48  ;;  %s5326_s28 = scalar_lea.vmem %s6525_s3, %s4339_s20 }
  0x12   : > { %v669_v4 = vld [vmem:[%s4351_s26] sm:$0xff]  ;;  %v574_v5 = vpack.c.bf16 %v559_v3, %v558_v2  ;;  %v670_v6 = vld [vmem:[%s4351_s26 + $0x8] sm:$0xff]  ;;  %v561_v9 = vld [vmem:[%s4345_s23 + $0x18] sm:$0xff] }
  0x13   : > { %v685_v7 = vpack.c.bf16 %v670_v6, %v669_v4  ;;  %v671_v10 = vld [vmem:[%s4351_s26 + $0x10] sm:$0xff]  ;;  %v672_v11 = vld [vmem:[%s4351_s26 + $0x18] sm:$0xff]  ;;  %v575_v12 = vpack.c.bf16 %v561_v9, %v560_v8  ;;  %v562_v14 = vld [vmem:[%s4345_s23 + $0x20] sm:$0xff] }
  0x14   : > { %3796 = vmatmul.msk.bf16.vlgmr.msra.gmra.mxu1 %vm595_vm0, %v574_v5  ;;  %v686_v13 = vpack.c.bf16 %v672_v11, %v671_v10  ;;  %v563_v15 = vld [vmem:[%s4345_s23 + $0x28] sm:$0xff]  ;;  %v673_v16 = vld [vmem:[%s4351_s26 + $0x20] sm:$0xff]  ;;  %v564_v20 = vld [vmem:[%s4345_s23 + $0x30] sm:$0xff] }
  0x15   : > { %3804 = vmatmul.msk.bf16.vlgmr.msra.gmra.mxu2 %vm595_vm0, %v685_v7  ;;  %v674_v17 = vld [vmem:[%s4351_s26 + $0x28] sm:$0xff]  ;;  %v576_v18 = vpack.c.bf16 %v563_v15, %v562_v14  ;;  %v565_v21 = vld [vmem:[%s4345_s23 + $0x38] sm:$0xff]  ;;  %v675_v22 = vld [vmem:[%s4351_s26 + $0x30] sm:$0xff]  ;;  %1414 = vmatpush.bf16.msrb.mxu1 %v3946_v48 }
  0x16   : > { %v687_v19 = vpack.c.bf16 %v674_v17, %v673_v16  ;;  %v676_v23 = vld [vmem:[%s4351_s26 + $0x38] sm:$0xff]  ;;  %v577_v24 = vpack.c.bf16 %v565_v21, %v564_v20  ;;  %v566_v26 = vld [vmem:[%s4345_s23 + $0x40] sm:$0xff]  ;;  %v567_v27 = vld [vmem:[%s4345_s23 + $0x48] sm:$0xff] }
  0x17   : > { %v688_v25 = vpack.c.bf16 %v676_v23, %v675_v22  ;;  %v677_v28 = vld [vmem:[%s4351_s26 + $0x40] sm:$0xff]  ;;  %v678_v29 = vld [vmem:[%s4351_s26 + $0x48] sm:$0xff]  ;;  %v578_v30 = vpack.c.bf16 %v567_v27, %v566_v26  ;;  %v568_v32 = vld [vmem:[%s4345_s23 + $0x50] sm:$0xff] }
  0x18   : > { %v689_v31 = vpack.c.bf16 %v678_v29, %v677_v28  ;;  %v569_v33 = vld [vmem:[%s4345_s23 + $0x58] sm:$0xff]  ;;  %v679_v34 = vld [vmem:[%s4351_s26 + $0x50] sm:$0xff]  ;;  %v570_v39 = vld [vmem:[%s4345_s23 + $0x60] sm:$0xff] }
  0x19   : > { %v680_v35 = vld [vmem:[%s4351_s26 + $0x58] sm:$0xff]  ;;  %v579_v36 = vpack.c.bf16 %v569_v33, %v568_v32  ;;  %v571_v40 = vld [vmem:[%s4345_s23 + $0x68] sm:$0xff]  ;;  %v681_v41 = vld [vmem:[%s4351_s26 + $0x60] sm:$0xff] }
  0x1a   : > { %v690_v37 = vpack.c.bf16 %v680_v35, %v679_v34  ;;  %v682_v42 = vld [vmem:[%s4351_s26 + $0x68] sm:$0xff]  ;;  %v580_v43 = vpack.c.bf16 %v571_v40, %v570_v39  ;;  %v447_v45 = vld [vmem:[%s4400_s11] sm:$0xff]  ;;  %v572_v49 = vld [vmem:[%s4345_s23 + $0x70] sm:$0xff] }
  0x1b   : > { %v691_v44 = vpack.c.bf16 %v682_v42, %v681_v41  ;;  %v448_v46 = vld [vmem:[%s4400_s11 + $0x8] sm:$0xff]  ;;  %v573_v50 = vld [vmem:[%s4345_s23 + $0x78] sm:$0xff]  ;;  %v683_v51 = vld [vmem:[%s4351_s26 + $0x70] sm:$0xff]  ;;  %s6482_s23 = scalar_lea.vmem %s6532_s10, %s4339_s20 }
  0x1c   : > { %v465_v47 = vpack.c.bf16 %v448_v46, %v447_v45  ;;  %v684_v52 = vld [vmem:[%s4351_s26 + $0x78] sm:$0xff]  ;;  %v581_v53 = vpack.c.bf16 %v573_v50, %v572_v49  ;;  %v449_v55 = vld [vmem:[%s4400_s11 + $0x10] sm:$0xff]  ;;  %v451_v60 = vld [vmem:[%s4400_s11 + $0x20] sm:$0xff] }
  0x1d   : > { %v692_v54 = vpack.c.bf16 %v684_v52, %v683_v51  ;;  %v450_v56 = vld [vmem:[%s4400_s11 + $0x18] sm:$0xff]  ;;  %v452_v61 = vld [vmem:[%s4400_s11 + $0x28] sm:$0xff]  ;;  %v453_v9 = vld [vmem:[%s4400_s11 + $0x30] sm:$0xff] }
  0x1e   : > { %3780 = vmatmul.msk.bf16.vlgmr.msra.gmra.mxu0 %vm480_vm1, %v465_v47  ;;  %v466_v57 = vpack.c.bf16 %v450_v56, %v449_v55  ;;  %v467_v62 = vpack.c.bf16 %v452_v61, %v451_v60  ;;  %v454_v10 = vld [vmem:[%s4400_s11 + $0x38] sm:$0xff]  ;;  %v455_v22 = vld [vmem:[%s4400_s11 + $0x40] sm:$0xff]  ;;  %v456_v23 = vld [vmem:[%s4400_s11 + $0x48] sm:$0xff] }
  0x1f   : > { %v468_v11 = vpack.c.bf16 %v454_v10, %v453_v9  ;;  %v459_v49 = vld [vmem:[%s4400_s11 + $0x60] sm:$0xff]  ;;  %v460_v50 = vld [vmem:[%s4400_s11 + $0x68] sm:$0xff] }
  0x20   : > { %v471_v51 = vpack.c.bf16 %v460_v50, %v459_v49 }
  0x24   : > { %3797 = vmatmul.msk.bf16.gmra.mxu1 %vm595_vm0, %v575_v12 }
  0x25   : > { %3805 = vmatmul.msk.bf16.gmra.mxu2 %vm595_vm0, %v686_v13 }
  0x2e   : > { %3781 = vmatmul.msk.bf16.gmra.mxu0 %vm480_vm1, %v466_v57 }
  0x34   : > { %3798 = vmatmul.msk.bf16.gmra.mxu1 %vm595_vm0, %v576_v18 }
  0x35   : > { %3806 = vmatmul.msk.bf16.gmra.mxu2 %vm595_vm0, %v687_v19 }
  0x3e   : > { %3782 = vmatmul.msk.bf16.gmra.mxu0 %vm480_vm1, %v467_v62  ;;  %v461_v62 = vld [vmem:[%s4400_s11 + $0x70] sm:$0xff] }
  0x44   : > { %3799 = vmatmul.msk.bf16.gmra.mxu1 %vm595_vm0, %v577_v24  ;;  %v469_v24 = vpack.c.bf16 %v456_v23, %v455_v22 }
  0x45   : > { %3807 = vmatmul.msk.bf16.gmra.mxu2 %vm595_vm0, %v688_v25 }
  0x4e   : > { %3783 = vmatmul.msk.bf16.gmra.mxu0 %vm480_vm1, %v468_v11 }
  0x54   : > { %3800 = vmatmul.msk.bf16.gmra.mxu1 %vm595_vm0, %v578_v30  ;;  %v3945_v30 = vld [vmem:[%s6528_s6] sm:$0xff] }
  0x55   : > { %3808 = vmatmul.msk.bf16.gmra.mxu2 %vm595_vm0, %v689_v31  ;;  %1014 = vmatpush.bf16.msrb.mxu0 %v3945_v30 }
  0x56   : > { %1415 = vmatpush.bf16.msrb.mxu1 %v3945_v30 }
  0x5e   : > { %3784 = vmatmul.msk.bf16.gmra.mxu0 %vm480_vm1, %v469_v24 }
  0x64   : > { %3801 = vmatmul.msk.bf16.gmra.mxu1 %vm595_vm0, %v579_v36  ;;  %v457_v36 = vld [vmem:[%s4400_s11 + $0x50] sm:$0xff] }
  0x65   : > { %3809 = vmatmul.msk.bf16.gmra.mxu2 %vm595_vm0, %v690_v37  ;;  %v458_v37 = vld [vmem:[%s4400_s11 + $0x58] sm:$0xff] }
  0x66   : > { %v470_v38 = vpack.c.bf16 %v458_v37, %v457_v36 }
  0x6e   : > { %3785 = vmatmul.msk.bf16.gmra.mxu0 %vm480_vm1, %v470_v38 }
  0x74   : > { %3802 = vmatmul.msk.bf16.gmra.mxu1 %vm595_vm0, %v580_v43 }
  0x75   : > { %3810 = vmatmul.msk.bf16.gmra.mxu2 %vm595_vm0, %v691_v44 }
  0x7e   : > { %3786 = vmatmul.msk.bf16.gmra.mxu0 %vm480_vm1, %v471_v51 }
  0x84   : > { %3803 = vmatmul.msk.bf16.gmra.mxu1 %vm595_vm0, %v581_v53 }
  0x85   : > { %3811 = vmatmul.msk.bf16.gmra.mxu2 %vm595_vm0, %v692_v54 }
  0x91   : > { %v629_v59 = vpop.f32.mrf.mxu1 }
  0x92   : > { %v4428_v0 = vadd.f32 %v629_v59, %v4424_v63 }
  0x98   : > { %v726_v1 = vpop.f32.mrf.mxu2 }
  0x99   : > { %v4431_v2 = vadd.f32 %v726_v1, %v4424_v63  ;;  %v631_v3 = vpop.f32.mrf.mxu1  ;;  %v462_v1 = vld [vmem:[%s4400_s11 + $0x78] sm:$0xff]  ;;  %s4269_s11 = smov 32  }
  0x9a   : > { %v4440_v6 = vadd.f32 %v631_v3, %v4424_v63  ;;  %v472_v3 = vpack.c.bf16 %v462_v1, %v461_v62 }
  0x9b   : > { %v4435_v4 = vsub.f32 %v4428_v0, %v4431_v2 }
  0x9c   : > { %3787 = vmatmul.msk.bf16.gmra.mxu0 %vm480_vm1, %v472_v3 }
  0x9d   : > { %899 = vrot.lane.b32.xlu0 %v4435_v4, %s4267_s17  ;;  %v863_v51 = vmul.f32 0.5, %v4435_v4 }
  0xa0   : > { %v728_v5 = vpop.f32.mrf.mxu2 }
  0xa1   : > { %v4443_v7 = vadd.f32 %v728_v5, %v4424_v63  ;;  %v634_v8 = vpop.f32.mrf.mxu1 }
  0xa2   : > { %v4455_v13 = vadd.f32 %v634_v8, %v4424_v63 }
  0xa3   : > { %v4449_v12 = vsub.f32 %v4440_v6, %v4443_v7 }
  0xa5   : > { %901 = vrot.lane.b32.xlu0 %v4449_v12, %s4267_s17  ;;  %v864_v3 = vmul.f32 0.5, %v4449_v12 }
  0xa8   : > { %v731_v14 = vpop.f32.mrf.mxu2 }
  0xa9   : > { %v4458_v15 = vadd.f32 %v731_v14, %v4424_v63  ;;  %v636_v16 = vpop.f32.mrf.mxu1 }
  0xaa   : > { %v4467_v18 = vadd.f32 %v636_v16, %v4424_v63 }
  0xab   : > { %v4462_v17 = vsub.f32 %v4455_v13, %v4458_v15 }
  0xad   : > { %903 = vrot.lane.b32.xlu1 %v4462_v17, %s4267_s17 }
  0xb0   : > { %v733_v19 = vpop.f32.mrf.mxu2 }
  0xb1   : > { %v4470_v20 = vadd.f32 %v733_v19, %v4424_v63  ;;  %v639_v21 = vpop.f32.mrf.mxu1 }
  0xb2   : > { %v4482_v26 = vadd.f32 %v639_v21, %v4424_v63 }
  0xb3   : > { %v4476_v25 = vsub.f32 %v4467_v18, %v4470_v20 }
  0xb5   : > { %905 = vrot.lane.b32.xlu1 %v4476_v25, %s4267_s17 }
  0xb8   : > { %v736_v27 = vpop.f32.mrf.mxu2 }
  0xb9   : > { %v4485_v28 = vadd.f32 %v736_v27, %v4424_v63  ;;  %v641_v29 = vpop.f32.mrf.mxu1 }
  0xba   : > { %v4497_v32 = vadd.f32 %v641_v29, %v4424_v63 }
  0xbb   : > { %v4492_v31 = vsub.f32 %v4482_v26, %v4485_v28 }
  0xbd   : > { %907 = vrot.lane.b32.xlu2 %v4492_v31, %s4267_s17 }
  0xc0   : > { %v738_v33 = vpop.f32.mrf.mxu2 }
  0xc1   : > { %v4500_v34 = vadd.f32 %v738_v33, %v4424_v63  ;;  %v644_v35 = vpop.f32.mrf.mxu1  ;;  %v4595_v33 = vpop.f32.mrf.mxu0 }
  0xc2   : > { %v4512_v40 = vadd.f32 %v644_v35, %v4424_v63 }
  0xc3   : > { %v4506_v39 = vsub.f32 %v4497_v32, %v4500_v34 }
  0xc5   : > { %909 = vrot.lane.b32.xlu2 %v4506_v39, %s4267_s17 }
  0xc8   : > { %v741_v41 = vpop.f32.mrf.mxu2 }
  0xc9   : > { %v4515_v42 = vadd.f32 %v741_v41, %v4424_v63  ;;  %v646_v43 = vpop.f32.mrf.mxu1 }
  0xca   : > { %v4524_v45 = vadd.f32 %v646_v43, %v4424_v63 }
  0xcb   : > { %v4519_v44 = vsub.f32 %v4512_v40, %v4515_v42 }
  0xcd   : > { %911 = vrot.lane.b32.xlu0 %v4519_v44, %s4267_s17 }
  0xd0   : > { %v743_v46 = vpop.f32.mrf.mxu2 }
  0xd1   : > { %v4527_v47 = vadd.f32 %v743_v46, %v4424_v63  ;;  %v649_v48 = vpop.f32.mrf.mxu1  ;;  %v4613_v46 = vpop.f32.mrf.mxu0 }
  0xd2   : > { %v4539_v53 = vadd.f32 %v649_v48, %v4424_v63 }
  0xd3   : > { %v4533_v52 = vsub.f32 %v4524_v45, %v4527_v47 }
  0xd5   : > { %913 = vrot.lane.b32.xlu1 %v4533_v52, %s4267_s17 }
  0xd8   : > { %v746_v54 = vpop.f32.mrf.mxu2 }
  0xd9   : > { %v4542_v55 = vadd.f32 %v746_v54, %v4424_v63  ;;  %v651_v56 = vpop.f32.mrf.mxu1 }
  0xda   : > { %v4551_v58 = vadd.f32 %v651_v56, %v4424_v63 }
  0xdb   : > { %v4546_v57 = vsub.f32 %v4539_v53, %v4542_v55 }
  0xdd   : > { %915 = vrot.lane.b32.xlu2 %v4546_v57, %s4267_s17 }
  0xe0   : > { %v748_v59 = vpop.f32.mrf.mxu2 }
  0xe1   : > { %v4554_v60 = vadd.f32 %v748_v59, %v4424_v63  ;;  %v654_v61 = vpop.f32.mrf.mxu1  ;;  %v4631_v59 = vpop.f32.mrf.mxu0 }
  0xe2   : > { %v4566_v8 = vadd.f32 %v654_v61, %v4424_v63 }
  0xe3   : > { %v4560_v5 = vsub.f32 %v4551_v58, %v4554_v60 }
  0xe5   : > { %917 = vrot.lane.b32.xlu0 %v4560_v5, %s4267_s17 }
  0xe8   : > { %v751_v9 = vpop.f32.mrf.mxu2 }
  0xe9   : > { %v4569_v10 = vadd.f32 %v751_v9, %v4424_v63  ;;  %v656_v11 = vpop.f32.mrf.mxu1 }
  0xea   : > { %v4578_v16 = vadd.f32 %v656_v11, %v4424_v63  ;;  %v866_v11 = vmul.f32 0.5, %v4476_v25 }
  0xeb   : > { %v4573_v14 = vsub.f32 %v4566_v8, %v4569_v10 }
  0xed   : > { %919 = vrot.lane.b32.xlu1 %v4573_v14, %s4267_s17 }
  0xf0   : > { %v753_v19 = vpop.f32.mrf.mxu2 }
  0xf1   : > { %v4581_v21 = vadd.f32 %v753_v19, %v4424_v63  ;;  %v659_v22 = vpop.f32.mrf.mxu1 }
  0xf2   : > { %v4590_v24 = vadd.f32 %v659_v22, %v4424_v63 }
  0xf3   : > { %v4585_v23 = vsub.f32 %v4578_v16, %v4581_v21 }
  0xf5   : > { %921 = vrot.lane.b32.xlu2 %v4585_v23, %s4267_s17 }
  0xf8   : > { %v756_v27 = vpop.f32.mrf.mxu2 }
  0xf9   : > { %v4593_v29 = vadd.f32 %v756_v27, %v4424_v63  ;;  %v661_v30 = vpop.f32.mrf.mxu1 }
  0xfa   : > { %v4604_v36 = vadd.f32 %v661_v30, %v4424_v63  ;;  %v4653_v30 = vpop.f32.mrf.mxu0 }
  0xfb   : > { %v4599_v35 = vsub.f32 %v4590_v24, %v4593_v29 }
  0xfd   : > { %923 = vrot.lane.b32.xlu0 %v4599_v35, %s4267_s17 }
 0x100   : > { %v758_v37 = vpop.f32.mrf.mxu2 }
 0x101   : > { %v4607_v38 = vadd.f32 %v758_v37, %v4424_v63  ;;  %v664_v41 = vpop.f32.mrf.mxu1 }
 0x102   : > { %v4618_v48 = vadd.f32 %v664_v41, %v4424_v63  ;;  %v865_v41 = vmul.f32 0.5, %v4462_v17 }
 0x103   : > { %v4611_v43 = vsub.f32 %v4604_v36, %v4607_v38 }
 0x105   : > { %925 = vrot.lane.b32.xlu1 %v4611_v43, %s4267_s17 }
 0x108   : > { %v761_v49 = vpop.f32.mrf.mxu2 }
 0x109   : > { %v4621_v50 = vadd.f32 %v761_v49, %v4424_v63  ;;  %v666_v56 = vpop.f32.mrf.mxu1  ;;  %v867_v49 = vmul.f32 0.5, %v4492_v31 }
 0x10a   : > { %v4634_v62 = vadd.f32 %v666_v56, %v4424_v63 }
 0x10b   : > { %v4626_v54 = vsub.f32 %v4618_v48, %v4621_v50 }
 0x10d   : > { %927 = vrot.lane.b32.xlu2 %v4626_v54, %s4267_s17  ;;  %1793 = vrot.lane.b32.xlu1 %v863_v51, %s4268_s21  ;;  %v868_v51 = vmul.f32 0.5, %v4506_v39 }
 0x10f   : > { %v900_v61 = vpop.permute.xlu0 %899 }
 0x110   : > { %v763_v1 = vpop.f32.mrf.mxu2  ;;  %v947_v22 = vmul.f32 %v900_v61, %v4428_v0 }
 0x111   : > { %v4637_v4 = vadd.f32 %v763_v1, %v4424_v63  ;;  %v1360_v63 = vmul.f32 %v900_v61, %v4431_v2 }
 0x113   : > { %v4642_v9 = vsub.f32 %v4634_v62, %v4637_v4 }
 0x115   : > { %1795 = vrot.lane.b32.xlu2 %v864_v3, %s4268_s21  ;;  %929 = vrot.lane.b32.xlu0 %v4642_v9, %s4267_s17 }
 0x116   : > { %1799 = vrot.lane.b32.xlu1 %v866_v11, %s4268_s21 }
 0x117   : > { %v902_v19 = vpop.permute.xlu0 %901  ;;  %v908_v3 = vpop.permute.xlu2 %907 }
 0x118   : > { %v948_v12 = vmul.f32 %v902_v19, %v4440_v6  ;;  %v1361_v27 = vmul.f32 %v902_v19, %v4443_v7  ;;  %v4661_v6 = vpop.f32.mrf.mxu0 }
 0x11a   : > { %v963_v37 = vpack.c.bf16 %v948_v12, %v947_v22  ;;  %v1376_v25 = vpack.c.bf16 %v1361_v27, %v1360_v63  ;;  %v869_v22 = vmul.f32 0.5, %v4519_v44  ;;  %v951_v27 = vmul.f32 %v908_v3, %v4482_v26 }
 0x11c   : > { %3828 = vmatmul.msk.bf16.vlgmr.msrb.gmra.mxu0 %vm595_vm0, %v963_v37  ;;  %3852 = vmatmul.msk.bf16.vlgmr.msrb.gmra.mxu1 %vm595_vm0, %v1376_v25  ;;  %v1364_v37 = vmul.f32 %v908_v3, %v4485_v28 }
 0x11d   : > { %1801 = vrot.lane.b32.xlu2 %v867_v49, %s4268_s21  ;;  %1797 = vrot.lane.b32.xlu0 %v865_v41, %s4268_s21 }
 0x11f   : > { %v904_v0 = vpop.permute.xlu1 %903 }
 0x120   : > { %v949_v17 = vmul.f32 %v904_v0, %v4455_v13  ;;  %v1362_v31 = vmul.f32 %v904_v0, %v4458_v15  ;;  %v4672_v39 = vpop.f32.mrf.mxu0  ;;  %v910_v13 = vpop.permute.xlu2 %909 }
 0x121   : > { %v952_v63 = vmul.f32 %v910_v13, %v4497_v32 }
 0x123   : > { %v965_v44 = vpack.c.bf16 %v952_v63, %v951_v27 }
 0x125   : > { %1803 = vrot.lane.b32.xlu0 %v868_v51, %s4268_s21 }
 0x127   : > { %v906_v56 = vpop.permute.xlu1 %905 }
 0x128   : > { %v950_v61 = vmul.f32 %v906_v56, %v4467_v18  ;;  %v1363_v1 = vmul.f32 %v906_v56, %v4470_v20  ;;  %v1365_v18 = vmul.f32 %v910_v13, %v4500_v34  ;;  %v4677_v12 = vpop.f32.mrf.mxu0 }
 0x129   : > { %6540 = vst [vmem:[#allocation2_spill] sm:$0xff] %v4677_v12 }
 0x12a   : > { %v964_v11 = vpack.c.bf16 %v950_v61, %v949_v17  ;;  %v1377_v19 = vpack.c.bf16 %v1363_v1, %v1362_v31  ;;  %v1378_v25 = vpack.c.bf16 %v1365_v18, %v1364_v37 }
 0x12c   : > { %3829 = vmatmul.msk.bf16.gmra.mxu0 %vm595_vm0, %v964_v11  ;;  %3853 = vmatmul.msk.bf16.gmra.mxu1 %vm595_vm0, %v1377_v19 }
 0x12d   : > { %1805 = vrot.lane.b32.xlu0 %v869_v22, %s4268_s21 }
 0x130   : > { %v4683_v41 = vpop.f32.mrf.mxu0 }
 0x137   : > { %v916_v3 = vpop.permute.xlu2 %915 }
 0x138   : > { %v4689_v61 = vpop.f32.mrf.mxu0  ;;  %v1368_v19 = vmul.f32 %v916_v3, %v4542_v55 }
 0x139   : > { %6541 = vst [vmem:[#allocation3_spill] sm:$0xff] %v4689_v61 }
 0x13c   : > { %3830 = vmatmul.msk.bf16.gmra.mxu0 %vm595_vm0, %v965_v44  ;;  %3854 = vmatmul.msk.bf16.gmra.mxu1 %vm595_vm0, %v1378_v25 }
 0x13f   : > { %v912_v49 = vpop.permute.xlu0 %911 }
 0x140   : > { %v953_v32 = vmul.f32 %v912_v49, %v4512_v40  ;;  %v1366_v51 = vmul.f32 %v912_v49, %v4515_v42  ;;  %v4693_v1 = vpop.f32.mrf.mxu0  ;;  %v955_v40 = vmul.f32 %v916_v3, %v4539_v53 }
 0x141   : > { %6542 = vst [vmem:[#allocation4_spill] sm:$0xff] %v4693_v1 }
 0x147   : > { %v914_v0 = vpop.permute.xlu1 %913 }
 0x148   : > { %v954_v56 = vmul.f32 %v914_v0, %v4524_v45  ;;  %v1367_v26 = vmul.f32 %v914_v0, %v4527_v47  ;;  %v4701_v18 = vpop.f32.mrf.mxu0 }
 0x149   : > { %6543 = vst [vmem:[#allocation5_spill] sm:$0xff] %v4701_v18 }
 0x14a   : > { %v966_v17 = vpack.c.bf16 %v954_v56, %v953_v32  ;;  %v1379_v31 = vpack.c.bf16 %v1367_v26, %v1366_v51 }
 0x14c   : > { %3831 = vmatmul.msk.bf16.gmra.mxu0 %vm595_vm0, %v966_v17  ;;  %3855 = vmatmul.msk.bf16.gmra.mxu1 %vm595_vm0, %v1379_v31 }
 0x14f   : > { %v922_v37 = vpop.permute.xlu2 %921 }
 0x150   : > { %v958_v25 = vmul.f32 %v922_v37, %v4578_v16  ;;  %v4707_v49 = vpop.f32.mrf.mxu0 }
 0x151   : > { %6544 = vst [vmem:[#allocation6_spill] sm:$0xff] %v4707_v49 }
 0x157   : > { %v918_v11 = vpop.permute.xlu0 %917 }
 0x158   : > { %v956_v45 = vmul.f32 %v918_v11, %v4551_v58  ;;  %v1369_v22 = vmul.f32 %v918_v11, %v4554_v60  ;;  %v1371_v58 = vmul.f32 %v922_v37, %v4581_v21  ;;  %v4711_v51 = vpop.f32.mrf.mxu0 }
 0x159   : > { %6545 = vst [vmem:[#allocation7_spill] sm:$0xff] %v4711_v51 }
 0x15a   : > { %v967_v13 = vpack.c.bf16 %v956_v45, %v955_v40  ;;  %v1380_v63 = vpack.c.bf16 %v1369_v22, %v1368_v19 }
 0x15c   : > { %3832 = vmatmul.msk.bf16.gmra.mxu0 %vm595_vm0, %v967_v13  ;;  %3856 = vmatmul.msk.bf16.gmra.mxu1 %vm595_vm0, %v1380_v63 }
 0x15f   : > { %v920_v27 = vpop.permute.xlu1 %919 }
 0x160   : > { %v957_v44 = vmul.f32 %v920_v27, %v4566_v8  ;;  %v1370_v53 = vmul.f32 %v920_v27, %v4569_v10  ;;  %v4717_v40 = vpop.f32.mrf.mxu0 }
 0x161   : > { %6546 = vst [vmem:[#allocation8_spill] sm:$0xff] %v4717_v40 }
 0x162   : > { %v968_v0 = vpack.c.bf16 %v958_v25, %v957_v44  ;;  %v1381_v32 = vpack.c.bf16 %v1371_v58, %v1370_v53 }
 0x167   : > { %v928_v45 = vpop.permute.xlu2 %927 }
 0x168   : > { %v4721_v19 = vpop.f32.mrf.mxu0  ;;  %v1374_v13 = vmul.f32 %v928_v45, %v4621_v50 }
 0x169   : > { %6547 = vst [vmem:[#allocation9_spill] sm:$0xff] %v4721_v19 }
 0x16c   : > { %3833 = vmatmul.msk.bf16.gmra.mxu0 %vm595_vm0, %v968_v0  ;;  %3857 = vmatmul.msk.bf16.gmra.mxu1 %vm595_vm0, %v1381_v32 }
 0x16f   : > { %v924_v56 = vpop.permute.xlu0 %923 }
 0x170   : > { %v959_v8 = vmul.f32 %v924_v56, %v4590_v24  ;;  %v1372_v17 = vmul.f32 %v924_v56, %v4593_v29  ;;  %v961_v24 = vmul.f32 %v928_v45, %v4618_v48  ;;  %v4729_v44 = vpop.f32.mrf.mxu0 }
 0x171   : > { %6548 = vst [vmem:[#allocation10_spill] sm:$0xff] %v4729_v44 }
 0x177   : > { %v926_v26 = vpop.permute.xlu1 %925 }
 0x178   : > { %v960_v16 = vmul.f32 %v926_v26, %v4604_v36  ;;  %v1373_v31 = vmul.f32 %v926_v26, %v4607_v38 }
 0x17a   : > { %v969_v3 = vpack.c.bf16 %v960_v16, %v959_v8  ;;  %v1382_v11 = vpack.c.bf16 %v1373_v31, %v1372_v17 }
 0x17c   : > { %3834 = vmatmul.msk.bf16.gmra.mxu0 %vm595_vm0, %v969_v3  ;;  %3858 = vmatmul.msk.bf16.gmra.mxu1 %vm595_vm0, %v1382_v11 }
 0x187   : > { %v930_v22 = vpop.permute.xlu0 %929 }
 0x188   : > { %v962_v36 = vmul.f32 %v930_v22, %v4634_v62  ;;  %v1375_v63 = vmul.f32 %v930_v22, %v4637_v4 }
 0x18a   : > { %v970_v27 = vpack.c.bf16 %v962_v36, %v961_v24  ;;  %v1383_v37 = vpack.c.bf16 %v1375_v63, %v1374_v13 }
 0x18c   : > { %3835 = vmatmul.msk.bf16.gmra.mxu0 %vm595_vm0, %v970_v27  ;;  %3859 = vmatmul.msk.bf16.gmra.mxu1 %vm595_vm0, %v1383_v37 }
 0x199   : > { %v1016_v53 = vpop.f32.mrf.mxu0  ;;  %v1417_v25 = vpop.f32.mrf.mxu1 }
 0x19a   : > { %v3836_v58 = vmul.f32 -1.442695, %v1016_v53  ;;  %v3860_v0 = vmul.f32 -1.442695, %v1417_v25  ;;  %v4734_v53 = vmul.f32 0.5, %v4533_v52 }
 0x19c   : > { %3962 = vpow2.f32 %v3836_v58 }
 0x19d   : > { %3964 = vpow2.f32 %v3860_v0 }
 0x1a1   : > { %v1018_v48 = vpop.f32.mrf.mxu0  ;;  %v1419_v32 = vpop.f32.mrf.mxu1 }
 0x1a2   : > { %v3963_v56 = vpop.eup %3962  ;;  %v3837_v62 = vmul.f32 -1.442695, %v1018_v48  ;;  %v3861_v17 = vmul.f32 -1.442695, %v1419_v32 }
 0x1a3   : > { %v3965_v26 = vpop.eup %3964  ;;  %v1104_v8 = vadd.f32 1.0, %v3963_v56 }
 0x1a4   : > { %v1505_v16 = vadd.f32 1.0, %v3965_v26  ;;  %3966 = vpow2.f32 %v3837_v62  ;;  %v4740_v62 = vmul.f32 0.5, %v4546_v57 }
 0x1a5   : > { %3968 = vrcp.f32 %v1104_v8  ;;  %v1129_v36 = vand.u32 2147483647, %v1104_v8  ;;  %v1131_v37 = vand.u32 2147483648, %v1104_v8  ;;  %vm1125_vm2 = vweird.f32 %v1104_v8 }
 0x1a6   : > { %3970 = vrcp.f32 %v1505_v16  ;;  %v1530_v0 = vand.u32 2147483647, %v1505_v16  ;;  %v1532_v48 = vand.u32 2147483648, %v1505_v16  ;;  %vm1526_vm4 = vweird.f32 %v1505_v16 }
 0x1a7   : > { %3972 = vpow2.f32 %v3861_v17  ;;  %vm4742_vm3 = vcmp.eq.f32.partialorder %v1129_v36, 8.507059e+37  ;;  %v1794_v17 = vpop.permute.xlu1 %1793 }
 0x1a8   : > { %vm4747_vm7 = vcmp.eq.f32.partialorder %v1530_v0, 8.507059e+37  ;;  %v1533_v57 = vor.u32 1.1754944e-38, %v1532_v48 }
 0x1a9   : > { %v1021_v31 = vpop.f32.mrf.mxu0  ;;  %v1422_v3 = vpop.f32.mrf.mxu1 }
 0x1aa   : > { %v3967_v11 = vpop.eup %3966  ;;  %v3838_v45 = vmul.f32 -1.442695, %v1021_v31  ;;  %v3862_v22 = vmul.f32 -1.442695, %v1422_v3  ;;  %v1132_v31 = vor.u32 1.1754944e-38, %v1131_v37 }
 0x1ab   : > { %v3969_v24 = vpop.eup %3968  ;;  %v4731_v13 = vadd.f32 1.0, %v3967_v11 }
 0x1ac   : > { %v3971_v63 = vpop.eup %3970  ;;  %v1121_v27 = vmul.f32 %v3969_v24, %v1104_v8  ;;  %3974 = vpow2.f32 %v3838_v45  ;;  %vm1126_vm5 = vweird.f32 %v3969_v24 }
 0x1ad   : > { %v3973_v25 = vpop.eup %3972  ;;  %v1522_v58 = vmul.f32 %v3971_v63, %v1505_v16  ;;  %3976 = vrcp.f32 %v4731_v13  ;;  %vm1527_vm6 = vweird.f32 %v3971_v63  ;;  %v1144_v44 = vand.u32 2147483647, %v4731_v13  ;;  %vm1127_vm8 = vmor %vm1125_vm2, %vm1126_vm5 }
 0x1ae   : > { %v1122_v32 = vsub.f32 1.0, %v1121_v27  ;;  %v4737_v56 = vadd.f32 1.0, %v3973_v25  ;;  %3978 = vpow2.f32 %v3862_v22  ;;  %v1146_v0 = vand.u32 2147483648, %v4731_v13  ;;  %vm1528_vm9 = vmor %vm1526_vm4, %vm1527_vm6 }
 0x1af   : > { %v1523_v26 = vsub.f32 1.0, %v1522_v58  ;;  %vm1140_vm10 = vweird.f32 %v4731_v13  ;;  %vm4775_vm11 = vcmp.eq.f32.partialorder %v1144_v44, 8.507059e+37 }
 0x1b0   : > { %3980 = vrcp.f32 %v4737_v56  ;;  %v1123_v52 = vmul.f32 %v3969_v24, %v1122_v32  ;;  %vm1541_vm13 = vweird.f32 %v4737_v56 }
 0x1b1   : > { %v1023_v3 = vpop.f32.mrf.mxu0  ;;  %v1424_v11 = vpop.f32.mrf.mxu1  ;;  %v1524_v45 = vmul.f32 %v3971_v63, %v1523_v26  ;;  %v1545_v26 = vand.u32 2147483647, %v4737_v56 }
 0x1b2   : > { %v3975_v27 = vpop.eup %3974  ;;  %v3839_v36 = vmul.f32 -1.442695, %v1023_v3  ;;  %v3863_v25 = vmul.f32 -1.442695, %v1424_v11  ;;  %v1124_v58 = vadd.f32 %v3969_v24, %v1123_v52  ;;  %v1547_v3 = vand.u32 2147483648, %v4737_v56 }
 0x1b3   : > { %v4752_v19 = vpop.eup %3976  ;;  %v4754_v32 = vadd.f32 1.0, %v3975_v27  ;;  %v1525_v37 = vadd.f32 %v3971_v63, %v1524_v45  ;;  %vm4782_vm14 = vcmp.eq.f32.partialorder %v1545_v26, 8.507059e+37 }
 0x1b4   : > { %v3979_v40 = vpop.eup %3978  ;;  %v1136_v48 = vmul.f32 %v4752_v19, %v4731_v13  ;;  %3982 = vpow2.f32 %v3839_v36  ;;  %v1128_v52 = vsel %vm1127_vm8, %v3969_v24, %v1124_v58  ;;  %vm1141_vm12 = vweird.f32 %v4752_v19 }
 0x1b5   : > { %3984 = vrcp.f32 %v4754_v32  ;;  %v4766_v8 = vadd.f32 1.0, %v3979_v40  ;;  %v1133_v11 = vsel %vm4742_vm3, %v1132_v31, %v1128_v52  ;;  %v1529_v45 = vsel %vm1528_vm9, %v3971_v63, %v1525_v37  ;;  %vm4795_vm1 = vmor %vm1140_vm10, %vm1141_vm12 }
 0x1b6   : > { %v3981_v27 = vpop.eup %3980  ;;  %v1137_v51 = vsub.f32 1.0, %v1136_v48  ;;  %3986 = vpow2.f32 %v3863_v25  ;;  %v1534_v36 = vsel %vm4747_vm7, %v1533_v57, %v1529_v45  ;;  %v1147_v31 = vor.u32 1.1754944e-38, %v1146_v0 }
 0x1b7   : > { %v1537_v16 = vmul.f32 %v3981_v27, %v4737_v56  ;;  %3988 = vrcp.f32 %v4766_v8  ;;  %v1761_v24 = vadd.f32 %v1534_v36, %v1133_v11  ;;  %v1548_v44 = vor.u32 1.1754944e-38, %v1547_v3 }
 0x1b8   : > { %v1138_v63 = vmul.f32 %v4752_v19, %v1137_v51  ;;  %vm1155_vm15 = vweird.f32 %v4754_v32  ;;  %vm1542_vm2 = vweird.f32 %v3981_v27  ;;  %v1159_v36 = vand.u32 2147483647, %v4754_v32 }
 0x1b9   : > { %v1538_v22 = vsub.f32 1.0, %v1537_v16  ;;  %v1026_v57 = vpop.f32.mrf.mxu0  ;;  %v1427_v25 = vpop.f32.mrf.mxu1  ;;  %v1841_v58 = vmul.f32 %v1794_v17, %v1761_v24  ;;  %vm1556_vm3 = vweird.f32 %v4766_v8  ;;  %vm1543_vm4 = vmor %vm1541_vm13, %vm1542_vm2 }
 0x1ba   : > { %v3983_v48 = vpop.eup %3982  ;;  %v3840_v52 = vmul.f32 -1.442695, %v1026_v57  ;;  %v3864_v11 = vmul.f32 -1.442695, %v1427_v25  ;;  %v1139_v45 = vadd.f32 %v4752_v19, %v1138_v63  ;;  %v1161_v63 = vand.u32 2147483648, %v4754_v32 }
 0x1bb   : > { %v3985_v51 = vpop.eup %3984  ;;  %v4788_v0 = vadd.f32 1.0, %v3983_v48  ;;  %1873 = vrot.lane.b32.xlu1 %v1841_v58, %s4268_s21  ;;  %v1539_v3 = vmul.f32 %v3981_v27, %v1538_v22  ;;  %vm4820_vm6 = vcmp.eq.f32.partialorder %v1159_v36, 8.507059e+37 }
 0x1bc   : > { %v3987_v16 = vpop.eup %3986  ;;  %v1151_v24 = vmul.f32 %v3985_v51, %v4754_v32  ;;  %3990 = vpow2.f32 %v3840_v52  ;;  %v1143_v17 = vsel %vm4795_vm1, %v4752_v19, %v1139_v45  ;;  %v1560_v52 = vand.u32 2147483647, %v4766_v8 }
 0x1bd   : > { %v3989_v57 = vpop.eup %3988  ;;  %3992 = vrcp.f32 %v4788_v0  ;;  %v4806_v13 = vadd.f32 1.0, %v3987_v16  ;;  %v1540_v25 = vadd.f32 %v3981_v27, %v1539_v3  ;;  %v1148_v48 = vsel %vm4775_vm11, %v1147_v31, %v1143_v17  ;;  %v1796_v17 = vpop.permute.xlu2 %1795 }
 0x1be   : > { %v1152_v22 = vsub.f32 1.0, %v1151_v24  ;;  %v1552_v58 = vmul.f32 %v3989_v57, %v4766_v8  ;;  %3994 = vpow2.f32 %v3864_v11  ;;  %v1562_v45 = vand.u32 2147483648, %v4766_v8 }
 0x1bf   : > { %3996 = vrcp.f32 %v4806_v13  ;;  %v1544_v19 = vsel %vm1543_vm4, %v3981_v27, %v1540_v25  ;;  %vm1156_vm5 = vweird.f32 %v3985_v51  ;;  %v1162_v56 = vor.u32 1.1754944e-38, %v1161_v63 }
 0x1c0   : > { %v1553_v26 = vsub.f32 1.0, %v1552_v58  ;;  %v1549_v3 = vsel %vm4782_vm14, %v1548_v44, %v1544_v19  ;;  %v1153_v16 = vmul.f32 %v3985_v51, %v1152_v22  ;;  %vm1557_vm7 = vweird.f32 %v3989_v57  ;;  %vm1157_vm8 = vmor %vm1155_vm15, %vm1156_vm5 }
 0x1c1   : > { %v1028_v11 = vpop.f32.mrf.mxu0  ;;  %v1429_v40 = vpop.f32.mrf.mxu1  ;;  %v1762_v31 = vadd.f32 %v1549_v3, %v1148_v48  ;;  %vm4833_vm9 = vcmp.eq.f32.partialorder %v1560_v52, 8.507059e+37  ;;  %v1563_v63 = vor.u32 1.1754944e-38, %v1562_v45  ;;  %vm1558_vm10 = vmor %vm1556_vm3, %vm1557_vm7  ;;  %v1174_v52 = vand.u32 2147483647, %v4788_v0 }
 0x1c2   : > { %v3991_v27 = vpop.eup %3990  ;;  %v3841_v25 = vmul.f32 -1.442695, %v1028_v11  ;;  %v3865_v18 = vmul.f32 -1.442695, %v1429_v40  ;;  %v1154_v49 = vadd.f32 %v3985_v51, %v1153_v16  ;;  %v1554_v58 = vmul.f32 %v3989_v57, %v1553_v26 }
 0x1c3   : > { %v4824_v61 = vpop.eup %3992  ;;  %v4826_v37 = vadd.f32 1.0, %v3991_v27  ;;  %1807 = vrot.lane.b32.xlu1 %v4734_v53, %s4268_s21  ;;  %v1842_v44 = vmul.f32 %v1796_v17, %v1762_v31  ;;  %v1176_v11 = vand.u32 2147483648, %v4788_v0  ;;  %v1575_v40 = vand.u32 2147483647, %v4806_v13  ;;  %v1798_v31 = vpop.permute.xlu0 %1797 }
 0x1c4   : > { %v3995_v22 = vpop.eup %3994  ;;  %v1166_v48 = vmul.f32 %v4824_v61, %v4788_v0  ;;  %3998 = vpow2.f32 %v3841_v25  ;;  %v1158_v19 = vsel %vm1157_vm8, %v3985_v51, %v1154_v49  ;;  %v1555_v26 = vadd.f32 %v3989_v57, %v1554_v58 }
 0x1c5   : > { %v3997_v3 = vpop.eup %3996  ;;  %4000 = vrcp.f32 %v4826_v37  ;;  %v4840_v53 = vadd.f32 1.0, %v3995_v22  ;;  %1875 = vrot.lane.b32.xlu2 %v1842_v44, %s4268_s21  ;;  %v1163_v32 = vsel %vm4820_vm6, %v1162_v56, %v1158_v19  ;;  %vm1171_vm11 = vweird.f32 %v4824_v61 }
 0x1c6   : > { %v1167_v45 = vsub.f32 1.0, %v1166_v48  ;;  %v1567_v49 = vmul.f32 %v3997_v3, %v4806_v13  ;;  %4002 = vpow2.f32 %v3865_v18  ;;  %v1559_v51 = vsel %vm1558_vm10, %v3989_v57, %v1555_v26 }
 0x1c7   : > { %4004 = vrcp.f32 %v4840_v53  ;;  %v1564_v16 = vsel %vm4833_vm9, %v1563_v63, %v1559_v51  ;;  %vm1170_vm12 = vweird.f32 %v4788_v0  ;;  %vm4858_vm13 = vcmp.eq.f32.partialorder %v1174_v52, 8.507059e+37 }
 0x1c8   : > { %v1568_v24 = vsub.f32 1.0, %v1567_v49  ;;  %v1763_v8 = vadd.f32 %v1564_v16, %v1163_v32  ;;  %v1168_v56 = vmul.f32 %v4824_v61, %v1167_v45  ;;  %vm1571_vm14 = vweird.f32 %v4806_v13  ;;  %vm4871_vm15 = vmor %vm1170_vm12, %vm1171_vm11 }
 0x1c9   : > { %v1031_v27 = vpop.f32.mrf.mxu0  ;;  %v1432_v17 = vpop.f32.mrf.mxu1  ;;  %v1577_v57 = vand.u32 2147483648, %v4806_v13  ;;  %v1177_v19 = vor.u32 1.1754944e-38, %v1176_v11  ;;  %vm1572_vm1 = vweird.f32 %v3997_v3  ;;  %vm4879_vm2 = vcmp.eq.f32.partialorder %v1575_v40, 8.507059e+37 }
 0x1ca   : > { %v3999_v25 = vpop.eup %3998  ;;  %v3842_v58 = vmul.f32 -1.442695, %v1031_v27  ;;  %v3866_v44 = vmul.f32 -1.442695, %v1432_v17  ;;  %v1843_v36 = vmul.f32 %v1798_v31, %v1763_v8  ;;  %v1169_v63 = vadd.f32 %v4824_v61, %v1168_v56  ;;  %vm1573_vm3 = vmor %vm1571_vm14, %vm1572_vm1 }
 0x1cb   : > { %v4001_v22 = vpop.eup %4000  ;;  %v4865_v48 = vadd.f32 1.0, %v3999_v25  ;;  %1809 = vrot.lane.b32.xlu1 %v4740_v62, %s4268_s21  ;;  %v1569_v26 = vmul.f32 %v3997_v3, %v1568_v24  ;;  %v1578_v11 = vor.u32 1.1754944e-38, %v1577_v57  ;;  %v1189_v8 = vand.u32 2147483647, %v4826_v37 }
 0x1cc   : > { %v4003_v32 = vpop.eup %4002  ;;  %v1181_v52 = vmul.f32 %v4001_v22, %v4826_v37  ;;  %4006 = vpow2.f32 %v3842_v58  ;;  %v1173_v45 = vsel %vm4871_vm15, %v4824_v61, %v1169_v63  ;;  %v1191_v56 = vand.u32 2147483648, %v4826_v37 }
 0x1cd   : > { %v4005_v62 = vpop.eup %4004  ;;  %4008 = vrcp.f32 %v4865_v48  ;;  %v4884_v51 = vadd.f32 1.0, %v4003_v32  ;;  %1877 = vrot.lane.b32.xlu2 %v1843_v36, %s4268_s21  ;;  %v1570_v16 = vadd.f32 %v3997_v3, %v1569_v26  ;;  %v1178_v61 = vsel %vm4858_vm13, %v1177_v19, %v1173_v45  ;;  %v1800_v36 = vpop.permute.xlu1 %1799 }
 0x1ce   : > { %v1182_v31 = vsub.f32 1.0, %v1181_v52  ;;  %v1582_v24 = vmul.f32 %v4005_v62, %v4840_v53  ;;  %4010 = vpow2.f32 %v3866_v44  ;;  %vm1186_vm4 = vweird.f32 %v4001_v22 }
 0x1cf   : > { %4012 = vrcp.f32 %v4884_v51  ;;  %v1574_v40 = vsel %vm1573_vm3, %v3997_v3, %v1570_v16  ;;  %v872_v13 = vmul.f32 0.5, %v4560_v5  ;;  %vm1185_vm5 = vweird.f32 %v4826_v37 }
 0x1d0   : > { %v1583_v27 = vsub.f32 1.0, %v1582_v24  ;;  %v1579_v17 = vsel %vm4879_vm2, %v1578_v11, %v1574_v40  ;;  %v1183_v57 = vmul.f32 %v4001_v22, %v1182_v31  ;;  %v1592_v3 = vand.u32 2147483648, %v4840_v53  ;;  %vm1187_vm7 = vmor %vm1185_vm5, %vm1186_vm4 }
 0x1d1   : > { %v4898_v25 = vpop.f32.mrf.mxu0  ;;  %v4900_v18 = vpop.f32.mrf.mxu1  ;;  %v1764_v58 = vadd.f32 %v1579_v17, %v1178_v61  ;;  %vm1587_vm6 = vweird.f32 %v4005_v62  ;;  %v1590_v19 = vand.u32 2147483647, %v4840_v53  ;;  %v1192_v45 = vor.u32 1.1754944e-38, %v1191_v56 }
 0x1d2   : > { %v4007_v44 = vpop.eup %4006  ;;  %v1184_v63 = vadd.f32 %v4001_v22, %v1183_v57  ;;  %v1584_v0 = vmul.f32 %v4005_v62, %v1583_v27  ;;  %vm1586_vm8 = vweird.f32 %v4840_v53  ;;  %vm1190_vm9 = vcmp.eq.f32.partialorder %v1189_v8, 8.507059e+37  ;;  %v1802_v8 = vpop.permute.xlu2 %1801 }
 0x1d3   : > { %v4009_v26 = vpop.eup %4008  ;;  %v4906_v32 = vadd.f32 1.0, %v4007_v44  ;;  %v1844_v52 = vmul.f32 %v1800_v36, %v1764_v58  ;;  %vm1588_vm10 = vmor %vm1586_vm8, %vm1587_vm6  ;;  %v1593_v61 = vor.u32 1.1754944e-38, %v1592_v3  ;;  %vm1591_vm11 = vcmp.eq.f32.partialorder %v1590_v19, 8.507059e+37 }
 0x1d4   : > { %v4011_v5 = vpop.eup %4010  ;;  %v1196_v37 = vmul.f32 %v4009_v26, %v4865_v48  ;;  %v1188_v49 = vsel %vm1187_vm7, %v4001_v22, %v1184_v63  ;;  %v1585_v16 = vadd.f32 %v4005_v62, %v1584_v0  ;;  %vm1201_vm12 = vweird.f32 %v4009_v26 }
 0x1d5   : > { %v4013_v11 = vpop.eup %4012  ;;  %4014 = vrcp.f32 %v4906_v32  ;;  %v4912_v31 = vadd.f32 1.0, %v4011_v5  ;;  %1811 = vrot.lane.b32.xlu2 %v872_v13, %s4268_s21  ;;  %1879 = vrot.lane.b32.xlu0 %v1844_v52, %s4268_s21  ;;  %v1193_v24 = vsel %vm1190_vm9, %v1192_v45, %v1188_v49  ;;  %v1206_v13 = vand.u32 2147483648, %v4865_v48 }
 0x1d6   : > { %v1197_v53 = vsub.f32 1.0, %v1196_v37  ;;  %v1597_v40 = vmul.f32 %v4013_v11, %v4884_v51  ;;  %v1589_v56 = vsel %vm1588_vm10, %v4005_v62, %v1585_v16  ;;  %v1204_v3 = vand.u32 2147483647, %v4865_v48 }
 0x1d7   : > { %4016 = vrcp.f32 %v4912_v31  ;;  %v1594_v22 = vsel %vm1591_vm11, %v1593_v61, %v1589_v56  ;;  %vm1200_vm13 = vweird.f32 %v4865_v48  ;;  %v1607_v62 = vand.u32 2147483648, %v4884_v51 }
 0x1d8   : > { %v1598_v27 = vsub.f32 1.0, %v1597_v40  ;;  %v1765_v17 = vadd.f32 %v1594_v22, %v1193_v24  ;;  %v1198_v57 = vmul.f32 %v4009_v26, %v1197_v53  ;;  %v873_v19 = vmul.f32 0.5, %v4573_v14  ;;  %vm4929_vm14 = vmor %vm1200_vm13, %vm1201_vm12  ;;  %v1804_v24 = vpop.permute.xlu0 %1803 }
 0x1d9   : > { %v4920_v58 = vpop.f32.mrf.mxu0  ;;  %v4922_v44 = vpop.f32.mrf.mxu1  ;;  %vm1602_vm15 = vweird.f32 %v4013_v11  ;;  %v1605_v5 = vand.u32 2147483647, %v4884_v51  ;;  %v1207_v48 = vor.u32 1.1754944e-38, %v1206_v13  ;;  %vm1205_vm1 = vcmp.eq.f32.partialorder %v1204_v3, 8.507059e+37 }
 0x1da   : > { %v1845_v36 = vmul.f32 %v1802_v8, %v1765_v17  ;;  %v1199_v63 = vadd.f32 %v4009_v26, %v1198_v57  ;;  %v1599_v45 = vmul.f32 %v4013_v11, %v1598_v27  ;;  %vm1601_vm2 = vweird.f32 %v4884_v51 }
 0x1db   : > { %v4015_v0 = vpop.eup %4014  ;;  %vm1603_vm3 = vmor %vm1601_vm2, %vm1602_vm15  ;;  %v1608_v56 = vor.u32 1.1754944e-38, %v1607_v62  ;;  %vm1606_vm4 = vcmp.eq.f32.partialorder %v1605_v5, 8.507059e+37  ;;  %v1219_v57 = vand.u32 2147483647, %v4906_v32  ;;  %vm1215_vm6 = vweird.f32 %v4906_v32 }
 0x1dc   : > { %v1211_v37 = vmul.f32 %v4015_v0, %v4906_v32  ;;  %v1203_v49 = vsel %vm4929_vm14, %v4009_v26, %v1199_v63  ;;  %v1600_v14 = vadd.f32 %v4013_v11, %v1599_v45  ;;  %vm1216_vm5 = vweird.f32 %v4015_v0 }
 0x1dd   : > { %v4017_v16 = vpop.eup %4016  ;;  %1813 = vrot.lane.b32.xlu2 %v873_v19, %s4268_s21  ;;  %1881 = vrot.lane.b32.xlu0 %v1845_v36, %s4268_s21  ;;  %v1208_v40 = vsel %vm1205_vm1, %v1207_v48, %v1203_v49  ;;  %v1221_v26 = vand.u32 2147483648, %v4906_v32  ;;  %v1620_v62 = vand.u32 2147483647, %v4912_v31  ;;  %vm1217_vm8 = vmor %vm1215_vm6, %vm1216_vm5  ;;  %v1622_v45 = vand.u32 2147483648, %v4912_v31 }
 0x1de   : > { %v1212_v61 = vsub.f32 1.0, %v1211_v37  ;;  %v1612_v53 = vmul.f32 %v4017_v16, %v4912_v31  ;;  %v1604_v22 = vsel %vm1603_vm3, %v4013_v11, %v1600_v14  ;;  %vm1617_vm7 = vweird.f32 %v4017_v16 }
 0x1df   : > { %v1609_v27 = vsel %vm1606_vm4, %v1608_v56, %v1604_v22  ;;  %v874_v11 = vmul.f32 0.5, %v4585_v23  ;;  %v1222_v52 = vor.u32 1.1754944e-38, %v1221_v26  ;;  %vm1220_vm9 = vcmp.eq.f32.partialorder %v1219_v57, 8.507059e+37 }
 0x1e0   : > { %v1613_v8 = vsub.f32 1.0, %v1612_v53  ;;  %v1213_v17 = vmul.f32 %v4015_v0, %v1212_v61  ;;  %v1766_v3 = vadd.f32 %v1609_v27, %v1208_v40  ;;  %vm1616_vm10 = vweird.f32 %v4912_v31  ;;  %v1806_v14 = vpop.permute.xlu0 %1805 }
 0x1e1   : > { %v1038_v13 = vpop.f32.mrf.mxu0  ;;  %v1439_v51 = vpop.f32.mrf.mxu1  ;;  %vm1618_vm11 = vmor %vm1616_vm10, %vm1617_vm7  ;;  %v1623_v49 = vor.u32 1.1754944e-38, %v1622_v45  ;;  %vm1621_vm12 = vcmp.eq.f32.partialorder %v1620_v62, 8.507059e+37  ;;  %v876_v56 = vmul.f32 0.5, %v4611_v43  ;;  %v3867_v57 = vmul.f32 -1.442695, %v4900_v18 }
 0x1e2   : > { %v1214_v36 = vadd.f32 %v4015_v0, %v1213_v17  ;;  %v1614_v63 = vmul.f32 %v4017_v16, %v1613_v8  ;;  %v1846_v19 = vmul.f32 %v1804_v24, %v1766_v3  ;;  %v3845_v27 = vmul.f32 -1.442695, %v1038_v13 }
 0x1e3   : > { %v3869_v17 = vmul.f32 -1.442695, %v1439_v51  ;;  %v3843_v3 = vmul.f32 -1.442695, %v4898_v25  ;;  %v3844_v13 = vmul.f32 -1.442695, %v4920_v58 }
 0x1e4   : > { %v1218_v5 = vsel %vm1217_vm8, %v4015_v0, %v1214_v36  ;;  %v1615_v37 = vadd.f32 %v4017_v16, %v1614_v63  ;;  %1883 = vrot.lane.b32.xlu1 %v1846_v19, %s4268_s21  ;;  %v3868_v25 = vmul.f32 -1.442695, %v4922_v44 }
 0x1e5   : > { %1815 = vrot.lane.b32.xlu0 %v874_v11, %s4268_s21  ;;  %v1223_v32 = vsel %vm1220_vm9, %v1222_v52, %v1218_v5 }
 0x1e6   : > { %v1619_v48 = vsel %vm1618_vm11, %v4017_v16, %v1615_v37 }
 0x1e7   : > { %v1624_v23 = vsel %vm1621_vm12, %v1623_v49, %v1619_v48 }
 0x1e8   : > { %v1767_v24 = vadd.f32 %v1624_v23, %v1223_v32 }
 0x1e9   : > { %v4952_v61 = vpop.f32.mrf.mxu0  ;;  %v4954_v53 = vpop.f32.mrf.mxu1 }
 0x1ea   : > { %v1847_v0 = vmul.f32 %v1806_v14, %v1767_v24 }
 0x1ec   : > { %1885 = vrot.lane.b32.xlu2 %v1847_v0, %s4268_s21 }
 0x1f1   : > { %v4957_v31 = vpop.f32.mrf.mxu0  ;;  %v4959_v40 = vpop.f32.mrf.mxu1 }
 0x1f4   : > { %1819 = vrot.lane.b32.xlu2 %v876_v56, %s4268_s21 }
 0x1f9   : > { %v1046_v16 = vpop.f32.mrf.mxu0  ;;  %v1447_v22 = vpop.f32.mrf.mxu1 }
 0x1fa   : > { %v3872_v26 = vmul.f32 -1.442695, %v1447_v22  ;;  %v3848_v8 = vmul.f32 -1.442695, %v1046_v16 }
 0x1fc   : > { %4018 = vpow2.f32 %v3872_v26 }
 0x1fd   : > { %4020 = vpow2.f32 %v3848_v8 }
 0x1fe   : > { %4022 = vpow2.f32 %v3845_v27 }
 0x1ff   : > { %4024 = vpow2.f32 %v3869_v17 }
 0x200   : > { %4026 = vpow2.f32 %v3867_v57 }
 0x201   : > { %4028 = vpow2.f32 %v3843_v3 }
 0x202   : > { %v4019_v36 = vpop.eup %4018 }
 0x203   : > { %v4021_v63 = vpop.eup %4020  ;;  %v1517_v43 = vadd.f32 1.0, %v4019_v36 }
 0x204   : > { %v4023_v62 = vpop.eup %4022  ;;  %v1116_v19 = vadd.f32 1.0, %v4021_v63 }
 0x205   : > { %4030 = vrcp.f32 %v1517_v43  ;;  %v4025_v11 = vpop.eup %4024  ;;  %v4966_v52 = vadd.f32 1.0, %v4023_v62  ;;  %vm1706_vm14 = vweird.f32 %v1517_v43  ;;  %v1712_v27 = vand.u32 2147483648, %v1517_v43 }
 0x206   : > { %v4027_v51 = vpop.eup %4026  ;;  %v4968_v45 = vadd.f32 1.0, %v4025_v11  ;;  %4032 = vrcp.f32 %v1116_v19  ;;  %v1710_v3 = vand.u32 2147483647, %v1517_v43  ;;  %vm1305_vm3 = vweird.f32 %v1116_v19 }
 0x207   : > { %v4029_v18 = vpop.eup %4028  ;;  %v4971_v37 = vadd.f32 1.0, %v4027_v51  ;;  %4034 = vpow2.f32 %v3844_v13  ;;  %vm1260_vm11 = vweird.f32 %v4966_v52 }
 0x208   : > { %4036 = vrcp.f32 %v4966_v52  ;;  %v4974_v49 = vadd.f32 1.0, %v4029_v18  ;;  %v1309_v18 = vand.u32 2147483647, %v1116_v19  ;;  %vm1711_vm2 = vcmp.eq.f32.partialorder %v1710_v3, 8.507059e+37 }
 0x209   : > { %4038 = vrcp.f32 %v4968_v45  ;;  %vm1631_vm6 = vweird.f32 %v4971_v37  ;;  %v1635_v3 = vand.u32 2147483647, %v4971_v37  ;;  %vm1661_vm12 = vweird.f32 %v4968_v45 }
 0x20a   : > { %4040 = vpow2.f32 %v3868_v25  ;;  %v1311_v25 = vand.u32 2147483648, %v1116_v19  ;;  %vm1310_vm5 = vcmp.eq.f32.partialorder %v1309_v18, 8.507059e+37  ;;  %v1236_v1 = vand.u32 2147483648, %v4974_v49 }
 0x20b   : > { %v4031_v5 = vpop.eup %4030  ;;  %4042 = vrcp.f32 %v4971_v37 }
 0x20c   : > { %v1702_v32 = vmul.f32 %v4031_v5, %v1517_v43  ;;  %v4033_v58 = vpop.eup %4032  ;;  %4044 = vrcp.f32 %v4974_v49  ;;  %vm1707_vm13 = vweird.f32 %v4031_v5 }
 0x20d   : > { %v4035_v23 = vpop.eup %4034  ;;  %v1301_v24 = vmul.f32 %v4033_v58, %v1116_v19  ;;  %vm4991_vm15 = vmor %vm1706_vm14, %vm1707_vm13  ;;  %vm1306_vm1 = vweird.f32 %v4033_v58 }
 0x20e   : > { %v1703_v48 = vsub.f32 1.0, %v1702_v32  ;;  %v4979_v44 = vpop.eup %4036  ;;  %v4997_v62 = vadd.f32 1.0, %v4035_v23  ;;  %vm1307_vm4 = vmor %vm1305_vm3, %vm1306_vm1  ;;  %vm1230_vm3 = vweird.f32 %v4974_v49 }
 0x20f   : > { %v4981_v14 = vpop.eup %4038  ;;  %v1256_v26 = vmul.f32 %v4979_v44, %v4966_v52  ;;  %v1302_v36 = vsub.f32 1.0, %v1301_v24  ;;  %v1713_v24 = vor.u32 1.1754944e-38, %v1712_v27  ;;  %vm1261_vm9 = vweird.f32 %v4979_v44 }
 0x210   : > { %v1704_v0 = vmul.f32 %v4031_v5, %v1703_v48  ;;  %v4041_v56 = vpop.eup %4040  ;;  %v1657_v8 = vmul.f32 %v4981_v14, %v4968_v45  ;;  %4046 = vrcp.f32 %v4997_v62  ;;  %vm1662_vm10 = vweird.f32 %v4981_v14  ;;  %vm5039_vm13 = vmor %vm1260_vm11, %vm1261_vm9 }
 0x211   : > { %v4983_v16 = vpop.eup %4042  ;;  %v4999_v11 = vadd.f32 1.0, %v4041_v56  ;;  %v1303_v51 = vmul.f32 %v4033_v58, %v1302_v36  ;;  %v1257_v43 = vsub.f32 1.0, %v1256_v26  ;;  %v1312_v56 = vor.u32 1.1754944e-38, %v1311_v25  ;;  %vm5051_vm14 = vmor %vm1661_vm12, %vm1662_vm10 }
 0x212   : > { %v1705_v22 = vadd.f32 %v4031_v5, %v1704_v0  ;;  %v4989_v17 = vpop.eup %4044  ;;  %v1627_v63 = vmul.f32 %v4983_v16, %v4971_v37  ;;  %v1658_v48 = vsub.f32 1.0, %v1657_v8  ;;  %vm1632_vm7 = vweird.f32 %v4983_v16 }
 0x213   : > { %v1226_v32 = vmul.f32 %v4989_v17, %v4974_v49  ;;  %v1304_v0 = vadd.f32 %v4033_v58, %v1303_v51  ;;  %4048 = vrcp.f32 %v4999_v11  ;;  %v1258_v26 = vmul.f32 %v4979_v44, %v1257_v43 }
 0x214   : > { %v1709_v13 = vsel %vm4991_vm15, %v4031_v5, %v1705_v22  ;;  %v1628_v22 = vsub.f32 1.0, %v1627_v63  ;;  %v1659_v36 = vmul.f32 %v4981_v14, %v1658_v48  ;;  %vm1231_vm8 = vweird.f32 %v4989_v17 }
 0x215   : > { %v1714_v23 = vsel %vm1711_vm2, %v1713_v24, %v1709_v13  ;;  %v1308_v57 = vsel %vm1307_vm4, %v4033_v58, %v1304_v0  ;;  %v1227_v8 = vsub.f32 1.0, %v1226_v32  ;;  %v1637_v13 = vand.u32 2147483648, %v4971_v37  ;;  %vm5070_vm2 = vmor %vm1631_vm6, %vm1632_vm7 }
 0x216   : > { %v1313_v27 = vsel %vm1310_vm5, %v1312_v56, %v1308_v57  ;;  %v3846_v58 = vmul.f32 -1.442695, %v4952_v61  ;;  %v1629_v63 = vmul.f32 %v4983_v16, %v1628_v22  ;;  %v1234_v51 = vand.u32 2147483647, %v4974_v49  ;;  %v5022_v18 = vpop.eup %4046  ;;  %vm5081_vm5 = vmor %vm1230_vm3, %vm1231_vm8 }
 0x217   : > { %v5012_v19 = vadd.f32 %v1714_v23, %v1313_v27  ;;  %v1660_v25 = vadd.f32 %v4981_v14, %v1659_v36  ;;  %v1259_v32 = vadd.f32 %v4979_v44, %v1258_v26  ;;  %v1228_v48 = vmul.f32 %v4989_v17, %v1227_v8 }
 0x218   : > { %v3871_v61 = vmul.f32 -1.442695, %v4959_v40  ;;  %v1667_v24 = vand.u32 2147483648, %v4968_v45  ;;  %v1266_v0 = vand.u32 2147483648, %v4966_v52  ;;  %v3847_v23 = vmul.f32 -1.442695, %v4957_v31 }
 0x219   : > { %v5028_v43 = vpop.eup %4048  ;;  %v1665_v56 = vand.u32 2147483647, %v4968_v45  ;;  %v1264_v40 = vand.u32 2147483647, %v4966_v52  ;;  %v1241_v57 = vmul.f32 %v5022_v18, %v4997_v62  ;;  %4050 = vpow2.f32 %v3846_v58 }
 0x21a   : > { %v3870_v36 = vmul.f32 -1.442695, %v4954_v53  ;;  %v1630_v45 = vadd.f32 %v4983_v16, %v1629_v63  ;;  %v1642_v8 = vmul.f32 %v5028_v43, %v4999_v11  ;;  %v1664_v52 = vsel %vm5051_vm14, %v4981_v14, %v1660_v25  ;;  %v1048_v63 = vpop.f32.mrf.mxu0 }
 0x21b   : > { %v1263_v53 = vsel %vm5039_vm13, %v4979_v44, %v1259_v32  ;;  %v1229_v27 = vadd.f32 %v4989_v17, %v1228_v48  ;;  %4052 = vpow2.f32 %v3871_v61  ;;  %v1668_v58 = vor.u32 1.1754944e-38, %v1667_v24  ;;  %v1449_v44 = vpop.f32.mrf.mxu1 }
 0x21c   : > { %v1267_v12 = vor.u32 1.1754944e-38, %v1266_v0  ;;  %4054 = vpow2.f32 %v3847_v23  ;;  %vm1666_vm15 = vcmp.eq.f32.partialorder %v1665_v56, 8.507059e+37  ;;  %vm1265_vm1 = vcmp.eq.f32.partialorder %v1264_v40, 8.507059e+37 }
 0x21d   : > { %4056 = vpow2.f32 %v3870_v36  ;;  %v1669_v25 = vsel %vm1666_vm15, %v1668_v58, %v1664_v52  ;;  %vm5075_vm4 = vcmp.eq.f32.partialorder %v1635_v3, 8.507059e+37  ;;  %v1634_v37 = vsel %vm5070_vm2, %v4983_v16, %v1630_v45 }
 0x21e   : > { %v1268_v32 = vsel %vm1265_vm1, %v1267_v12, %v1263_v53  ;;  %v1233_v49 = vsel %vm5081_vm5, %v4989_v17, %v1229_v27  ;;  %v1643_v24 = vsub.f32 1.0, %v1642_v8  ;;  %v1242_v12 = vsub.f32 1.0, %v1241_v57 }
 0x21f   : > { %v5007_v5 = vpop.permute.xlu2 %1875  ;;  %v4051_v3 = vpop.eup %4050  ;;  %v3849_v0 = vmul.f32 -1.442695, %v1048_v63  ;;  %v1638_v56 = vor.u32 1.1754944e-38, %v1637_v13  ;;  %vm1235_vm6 = vcmp.eq.f32.partialorder %v1234_v51, 8.507059e+37  ;;  %v1237_v22 = vor.u32 1.1754944e-38, %v1236_v1 }
 0x220   : > { %v3873_v40 = vmul.f32 -1.442695, %v1449_v44  ;;  %v1922_v36 = vadd.f32 %v5007_v5, %v4443_v7  ;;  %v1770_v52 = vadd.f32 %v1669_v25, %v1268_v32  ;;  %v1644_v13 = vmul.f32 %v5028_v43, %v1643_v24 }
 0x221   : > { %v4053_v16 = vpop.eup %4052  ;;  %v1639_v17 = vsel %vm5075_vm4, %v1638_v56, %v1634_v37  ;;  %v1238_v8 = vsel %vm1235_vm6, %v1237_v22, %v1233_v49  ;;  %v1243_v1 = vmul.f32 %v5022_v18, %v1242_v12  ;;  %v5098_v58 = vadd.f32 1.0, %v4051_v3 }
 0x222   : > { %v4055_v57 = vpop.eup %4054  ;;  %4058 = vpow2.f32 %v3849_v0  ;;  %v5100_v7 = vadd.f32 1.0, %v4053_v16  ;;  %v1768_v5 = vadd.f32 %v1639_v17, %v1238_v8  ;;  %vm1646_vm7 = vweird.f32 %v4999_v11 }
 0x223   : > { %v4057_v51 = vpop.eup %4056  ;;  %4060 = vpow2.f32 %v3873_v40  ;;  %vm1647_vm8 = vweird.f32 %v5028_v43  ;;  %v1645_v14 = vadd.f32 %v5028_v43, %v1644_v13  ;;  %v1244_v44 = vadd.f32 %v5022_v18, %v1243_v1 }
 0x224   : > { %v5108_v63 = vadd.f32 1.0, %v4057_v51  ;;  %vm1246_vm9 = vweird.f32 %v5022_v18  ;;  %4062 = vrcp.f32 %v5098_v58  ;;  %v1650_v32 = vand.u32 2147483647, %v4999_v11  ;;  %vm5118_vm10 = vmor %vm1646_vm7, %vm1647_vm8 }
 0x225   : > { %v1652_v48 = vand.u32 2147483648, %v4999_v11  ;;  %v1251_v61 = vand.u32 2147483648, %v4997_v62  ;;  %4064 = vrcp.f32 %v5100_v7  ;;  %vm1245_vm11 = vweird.f32 %v4997_v62 }
 0x226   : > { %v1249_v24 = vand.u32 2147483647, %v4997_v62  ;;  %vm5125_vm12 = vmor %vm1245_vm11, %vm1246_vm9  ;;  %v875_v0 = vmul.f32 0.5, %v4599_v35  ;;  %vm1651_vm13 = vcmp.eq.f32.partialorder %v1650_v32, 8.507059e+37  ;;  %vm1275_vm15 = vweird.f32 %v5098_v58 }
 0x227   : > { %v5047_v26 = vpop.permute.xlu2 %1877  ;;  %v1248_v62 = vsel %vm5125_vm12, %v5022_v18, %v1244_v44  ;;  %v1653_v56 = vor.u32 1.1754944e-38, %v1652_v48  ;;  %v1252_v22 = vor.u32 1.1754944e-38, %v1251_v61  ;;  %vm1691_vm6 = vweird.f32 %v5100_v7 }
 0x228   : > { %v4059_v12 = vpop.eup %4058  ;;  %vm1250_vm14 = vcmp.eq.f32.partialorder %v1249_v24, 8.507059e+37  ;;  %vm1676_vm9 = vweird.f32 %v5108_v63 }
 0x229   : > { %v4061_v11 = vpop.eup %4060  ;;  %v5138_v40 = vadd.f32 1.0, %v4059_v12  ;;  %v1923_v12 = vadd.f32 %v5047_v26, %v4458_v15 }
 0x22d   : > { %v1874_v23 = vpop.permute.xlu1 %1873 }
 0x22e   : > { %v1921_v31 = vadd.f32 %v1874_v23, %v4431_v2  ;;  %v5104_v2 = vadd.f32 1.0, %v4055_v57  ;;  %v1649_v23 = vsel %vm5118_vm10, %v5028_v43, %v1645_v14 }
 0x22f   : > { %v1812_v45 = vpop.permute.xlu2 %1811  ;;  %v1654_v35 = vsel %vm1651_vm13, %v1653_v56, %v1649_v23  ;;  %v1279_v23 = vand.u32 2147483647, %v5098_v58 }
 0x230   : > { %v1941_v53 = vpack.c.bf16 %v1922_v36, %v1921_v31  ;;  %v1850_v27 = vmul.f32 %v1812_v45, %v1770_v52  ;;  %4066 = vrcp.f32 %v5104_v2  ;;  %v5141_v36 = vpop.eup %4062  ;;  %v5143_v31 = vadd.f32 1.0, %v4061_v11 }
 0x231   : > { %4068 = vrcp.f32 %v5108_v63  ;;  %v1253_v52 = vsel %vm1250_vm14, %v1252_v22, %v1248_v62  ;;  %v5145_v16 = vpop.eup %4064  ;;  %v1271_v8 = vmul.f32 %v5141_v36, %v5098_v58  ;;  %v1682_v62 = vand.u32 2147483648, %v5108_v63 }
 0x232   : > { %1891 = vrot.lane.b32.xlu2 %v1850_v27, %s4268_s21  ;;  %1957 = vrot.lane.b32.xlu1 %v1941_v53, %s4268_s21  ;;  %4070 = vrcp.f32 %v5138_v40  ;;  %v1769_v17 = vadd.f32 %v1654_v35, %v1253_v52  ;;  %v1687_v57 = vmul.f32 %v5145_v16, %v5100_v7  ;;  %vm1276_vm1 = vweird.f32 %v5141_v36 }
 0x233   : > { %4072 = vrcp.f32 %v5143_v31  ;;  %v1272_v1 = vsub.f32 1.0, %v1271_v8  ;;  %vm1692_vm3 = vweird.f32 %v5145_v16  ;;  %vm5196_vm5 = vmor %vm1275_vm15, %vm1276_vm1  ;;  %v1697_v8 = vand.u32 2147483648, %v5100_v7 }
 0x234   : > { %v1688_v51 = vsub.f32 1.0, %v1687_v57  ;;  %v1296_v57 = vand.u32 2147483648, %v5104_v2  ;;  %vm5204_vm7 = vmor %vm1691_vm6, %vm1692_vm3  ;;  %vm1290_vm8 = vweird.f32 %v5104_v2  ;;  %vm5212_vm10 = vcmp.eq.f32.partialorder %v1279_v23, 8.507059e+37 }
 0x235   : > { %v1808_v25 = vpop.permute.xlu1 %1807  ;;  %v1273_v48 = vmul.f32 %v5141_v36, %v1272_v1  ;;  %v1294_v1 = vand.u32 2147483647, %v5104_v2  ;;  %vm1320_vm3 = vweird.f32 %v5138_v40 }
 0x236   : > { %v1848_v37 = vmul.f32 %v1808_v25, %v1768_v5  ;;  %v5147_v43 = vpop.eup %4066  ;;  %v1689_v49 = vmul.f32 %v5145_v16, %v1688_v51 }
 0x237   : > { %v5149_v18 = vpop.eup %4068  ;;  %v1286_v53 = vmul.f32 %v5147_v43, %v5104_v2  ;;  %v5185_v15 = vpop.permute.xlu2 %1813  ;;  %vm1291_vm4 = vweird.f32 %v5147_v43  ;;  %vm1295_vm15 = vcmp.eq.f32.partialorder %v1294_v1, 8.507059e+37 }
 0x238   : > { %1887 = vrot.lane.b32.xlu0 %v1848_v37, %s4268_s21  ;;  %v1672_v13 = vmul.f32 %v5149_v18, %v5108_v63  ;;  %v5162_v5 = vpop.eup %4070  ;;  %v878_v37 = vmul.f32 0.5, %v4642_v9  ;;  %v1680_v9 = vand.u32 2147483647, %v5108_v63  ;;  %vm1677_vm2 = vweird.f32 %v5149_v18  ;;  %vm5220_vm11 = vmor %vm1290_vm8, %vm1291_vm4 }
 0x239   : > { %v1287_v14 = vsub.f32 1.0, %v1286_v53  ;;  %v5164_v44 = vpop.eup %4072  ;;  %v1316_v32 = vmul.f32 %v5162_v5, %v5138_v40  ;;  %v1690_v35 = vadd.f32 %v5145_v16, %v1689_v49  ;;  %v1281_v53 = vand.u32 2147483648, %v5098_v58  ;;  %vm5226_vm12 = vmor %vm1676_vm9, %vm1677_vm2 }
 0x23a   : > { %1817 = vrot.lane.b32.xlu1 %v875_v0, %s4268_s21  ;;  %v1673_v25 = vsub.f32 1.0, %v1672_v13  ;;  %v1717_v24 = vmul.f32 %v5164_v44, %v5143_v31  ;;  %v1695_v13 = vand.u32 2147483647, %v5100_v7  ;;  %v877_v58 = vmul.f32 0.5, %v4626_v54 }
 0x23b   : > { %v1288_v11 = vmul.f32 %v5147_v43, %v1287_v14  ;;  %v1317_v26 = vsub.f32 1.0, %v1316_v32  ;;  %vm5230_vm13 = vcmp.eq.f32.partialorder %v1680_v9, 8.507059e+37  ;;  %v1694_v54 = vsel %vm5204_vm7, %v5145_v16, %v1690_v35  ;;  %v1452_v32 = vpop.f32.mrf.mxu1 }
 0x23c   : > { %v1674_v0 = vmul.f32 %v5149_v18, %v1673_v25  ;;  %v1718_v22 = vsub.f32 1.0, %v1717_v24  ;;  %v1698_v49 = vor.u32 1.1754944e-38, %v1697_v8  ;;  %v1297_v24 = vor.u32 1.1754944e-38, %v1296_v57 }
 0x23d   : > { %v1810_v45 = vpop.permute.xlu1 %1809  ;;  %v1289_v52 = vadd.f32 %v5147_v43, %v1288_v11  ;;  %v1318_v25 = vmul.f32 %v5162_v5, %v1317_v26  ;;  %vm1696_vm14 = vcmp.eq.f32.partialorder %v1695_v13, 8.507059e+37  ;;  %vm1321_vm1 = vweird.f32 %v5162_v5 }
 0x23e   : > { %v1849_v27 = vmul.f32 %v1810_v45, %v1769_v17  ;;  %v1675_v45 = vadd.f32 %v5149_v18, %v1674_v0  ;;  %v1719_v63 = vmul.f32 %v5164_v44, %v1718_v22  ;;  %vm1722_vm2 = vweird.f32 %v5164_v44 }
 0x23f   : > { %v1319_v16 = vadd.f32 %v5162_v5, %v1318_v25  ;;  %v1727_v9 = vand.u32 2147483648, %v5143_v31  ;;  %vm1721_vm4 = vweird.f32 %v5143_v31  ;;  %v1324_v26 = vand.u32 2147483647, %v5138_v40 }
 0x240   : > { %v1720_v23 = vadd.f32 %v5164_v44, %v1719_v63  ;;  %vm5268_vm6 = vmor %vm1721_vm4, %vm1722_vm2 }
 0x241   : > { %vm1325_vm8 = vcmp.eq.f32.partialorder %v1324_v26, 8.507059e+37 }
 0x242   : > { %1889 = vrot.lane.b32.xlu1 %v1849_v27, %s4268_s21  ;;  %v1724_v57 = vsel %vm5268_vm6, %v5164_v44, %v1720_v23  ;;  %v1728_v27 = vor.u32 1.1754944e-38, %v1727_v9 }
 0x243   : > { %v1454_v2 = vpop.f32.mrf.mxu1 }
 0x246   : > { %v5247_v11 = vpop.permute.xlu2 %1885 }
 0x247   : > { %v1880_v61 = vpop.permute.xlu0 %1879 }
 0x248   : > { %v1924_v3 = vadd.f32 %v1880_v61, %v4470_v20  ;;  %v1274_v20 = vadd.f32 %v5141_v36, %v1273_v48  ;;  %v1293_v48 = vsel %vm5220_vm11, %v5147_v43, %v1289_v52  ;;  %v1679_v61 = vsel %vm5226_vm12, %v5149_v18, %v1675_v45 }
 0x249   : > { %v1699_v43 = vsel %vm1696_vm14, %v1698_v49, %v1694_v54  ;;  %v1298_v0 = vsel %vm1295_vm15, %v1297_v24, %v1293_v48  ;;  %v3875_v54 = vmul.f32 -1.442695, %v1454_v2  ;;  %v3874_v49 = vmul.f32 -1.442695, %v1452_v32 }
 0x24a   : > { %v1942_v56 = vpack.c.bf16 %v1924_v3, %v1923_v12  ;;  %1823 = vrot.lane.b32.xlu1 %v878_v37, %s4268_s21  ;;  %v1278_v37 = vsel %vm5196_vm5, %v5141_v36, %v1274_v20  ;;  %v1683_v12 = vor.u32 1.1754944e-38, %v1682_v62  ;;  %v1282_v3 = vor.u32 1.1754944e-38, %v1281_v53  ;;  %vm5263_vm5 = vmor %vm1320_vm3, %vm1321_vm1 }
 0x24b   : > { %v1326_v62 = vand.u32 2147483648, %v5138_v40  ;;  %v1772_v22 = vadd.f32 %v1699_v43, %v1298_v0  ;;  %v1323_v45 = vsel %vm5263_vm5, %v5162_v5, %v1319_v16 }
 0x24c   : > { %1959 = vrot.lane.b32.xlu0 %v1942_v56, %s4268_s21  ;;  %v1684_v18 = vsel %vm5230_vm13, %v1683_v12, %v1679_v61  ;;  %v1283_v36 = vsel %vm5212_vm10, %v1282_v3, %v1278_v37  ;;  %v1725_v56 = vand.u32 2147483647, %v5143_v31 }
 0x24d   : > { %v1771_v35 = vadd.f32 %v1684_v18, %v1283_v36  ;;  %v1327_v13 = vor.u32 1.1754944e-38, %v1326_v62 }
 0x24e   : > { %vm1726_vm7 = vcmp.eq.f32.partialorder %v1725_v56, 8.507059e+37 }
 0x24f   : > { %v1882_v14 = vpop.permute.xlu0 %1881  ;;  %v1851_v1 = vmul.f32 %v5185_v15, %v1771_v35  ;;  %v1729_v5 = vsel %vm1726_vm7, %v1728_v27, %v1724_v57  ;;  %v1328_v25 = vsel %vm1325_vm8, %v1327_v13, %v1323_v45  ;;  %v3947_v15 = vld [vmem:[%s6529_s7] sm:$0xff]  ;;  %v1927_v35 = vadd.f32 %v5247_v11, %v4515_v42 }
 0x250   : > { %v1925_v31 = vadd.f32 %v1882_v14, %v4485_v28  ;;  %v1820_v28 = vpop.permute.xlu2 %1819  ;;  %v1774_v44 = vadd.f32 %v1729_v5, %v1328_v25 }
 0x252   : > { %v1854_v14 = vmul.f32 %v1820_v28, %v1774_v44 }
 0x254   : > { %1821 = vrot.lane.b32.xlu0 %v877_v58, %s4268_s21  ;;  %v1051_v58 = vpop.f32.mrf.mxu0 }
 0x255   : > { %v3850_v61 = vmul.f32 -1.442695, %v1051_v58 }
 0x256   : > { %v1884_v8 = vpop.permute.xlu1 %1883 }
 0x257   : > { %v1816_v17 = vpop.permute.xlu0 %1815  ;;  %v1926_v40 = vadd.f32 %v1884_v8, %v4500_v34  ;;  %v3948_v34 = vld [vmem:[%s6529_s7 + $0x8] sm:$0xff] }
 0x258   : > { %v1852_v53 = vmul.f32 %v1816_v17, %v1772_v22  ;;  %2015 = vmatpush.bf16.msrb.mxu2 %v3948_v34 }
 0x259   : > { %v1943_v51 = vpack.c.bf16 %v1926_v40, %v1925_v31 }
 0x25a   : > { %1895 = vrot.lane.b32.xlu1 %v1852_v53, %s4268_s21 }
 0x25b   : > { %1961 = vrot.lane.b32.xlu2 %v1943_v51, %s4268_s21  ;;  %v5386_v51 = vld [vmem:[%s5326_s28 + $0x28] sm:$0xff] }
 0x25c   : > { %1893 = vrot.lane.b32.xlu0 %v1851_v1, %s4268_s21  ;;  %2016 = vmatpush.bf16.msrb.mxu2 %v3947_v15  ;;  %v1053_v7 = vpop.f32.mrf.mxu0 }
 0x25d   : > { %v3851_v63 = vmul.f32 -1.442695, %v1053_v7 }
 0x25f   : > { %4074 = vpow2.f32 %v3851_v63 }
 0x260   : > { %4076 = vpow2.f32 %v3875_v54 }
 0x261   : > { %4078 = vpow2.f32 %v3850_v61 }
 0x262   : > { %1899 = vrot.lane.b32.xlu1 %v1854_v14, %s4268_s21  ;;  %4080 = vpow2.f32 %v3874_v49  ;;  %v5334_v49 = vld [vmem:[%s5326_s28] sm:$0xff] }
 0x265   : > { %v4075_v48 = vpop.eup %4074 }
 0x266   : > { %v4077_v37 = vpop.eup %4076  ;;  %v1119_v24 = vadd.f32 1.0, %v4075_v48 }
 0x267   : > { %v1520_v12 = vadd.f32 1.0, %v4077_v37  ;;  %v4079_v3 = vpop.eup %4078 }
 0x268   : > { %4082 = vrcp.f32 %v1119_v24  ;;  %v4081_v16 = vpop.eup %4080  ;;  %v5291_v0 = vadd.f32 1.0, %v4079_v3  ;;  %vm1350_vm11 = vweird.f32 %v1119_v24  ;;  %v1354_v5 = vand.u32 2147483647, %v1119_v24 }
 0x269   : > { %4084 = vrcp.f32 %v1520_v12  ;;  %v5293_v36 = vadd.f32 1.0, %v4081_v16  ;;  %v1755_v13 = vand.u32 2147483647, %v1520_v12  ;;  %v1757_v1 = vand.u32 2147483648, %v1520_v12 }
 0x26a   : > { %4086 = vrcp.f32 %v5291_v0  ;;  %vm1751_vm12 = vweird.f32 %v1520_v12  ;;  %vm1355_vm1 = vcmp.eq.f32.partialorder %v1354_v5, 8.507059e+37  ;;  %v1341_v16 = vand.u32 2147483648, %v5291_v0 }
 0x26b   : > { %4088 = vrcp.f32 %v5293_v36  ;;  %vm1756_vm15 = vcmp.eq.f32.partialorder %v1755_v13, 8.507059e+37  ;;  %v1758_v32 = vor.u32 1.1754944e-38, %v1757_v1  ;;  %vm1736_vm4 = vweird.f32 %v5293_v36 }
 0x26c   : > { %v1742_v3 = vand.u32 2147483648, %v5293_v36  ;;  %vm1335_vm6 = vweird.f32 %v5291_v0 }
 0x26e   : > { %v4083_v43 = vpop.eup %4082 }
 0x26f   : > { %v4085_v18 = vpop.eup %4084  ;;  %v1346_v9 = vmul.f32 %v4083_v43, %v1119_v24  ;;  %vm1351_vm9 = vweird.f32 %v4083_v43 }
 0x270   : > { %v1747_v62 = vmul.f32 %v4085_v18, %v1520_v12  ;;  %v5298_v22 = vpop.eup %4086  ;;  %vm1752_vm10 = vweird.f32 %v4085_v18  ;;  %vm5312_vm13 = vmor %vm1350_vm11, %vm1351_vm9 }
 0x271   : > { %v1347_v56 = vsub.f32 1.0, %v1346_v9  ;;  %v5303_v45 = vpop.eup %4088  ;;  %v1331_v40 = vmul.f32 %v5298_v22, %v5291_v0  ;;  %vm1753_vm14 = vmor %vm1751_vm12, %vm1752_vm10  ;;  %vm1336_vm3 = vweird.f32 %v5298_v22  ;;  %v1740_v9 = vand.u32 2147483647, %v5293_v36 }
 0x272   : > { %v1748_v20 = vsub.f32 1.0, %v1747_v62  ;;  %v1732_v27 = vmul.f32 %v5303_v45, %v5293_v36  ;;  %vm1737_vm2 = vweird.f32 %v5303_v45  ;;  %v1339_v62 = vand.u32 2147483647, %v5291_v0  ;;  %vm1337_vm7 = vmor %vm1335_vm6, %vm1336_vm3 }
 0x273   : > { %v1348_v53 = vmul.f32 %v4083_v43, %v1347_v56  ;;  %v1332_v28 = vsub.f32 1.0, %v1331_v40  ;;  %vm5344_vm5 = vmor %vm1736_vm4, %vm1737_vm2  ;;  %v1342_v36 = vor.u32 1.1754944e-38, %v1341_v16  ;;  %vm1741_vm8 = vcmp.eq.f32.partialorder %v1740_v9, 8.507059e+37  ;;  %v440_v16 = vld [vmem:[%s5326_s28 + $0x48] sm:$0xff] }
 0x274   : > { %v1749_v57 = vmul.f32 %v4085_v18, %v1748_v20  ;;  %v1733_v25 = vsub.f32 1.0, %v1732_v27  ;;  %vm1340_vm9 = vcmp.eq.f32.partialorder %v1339_v62, 8.507059e+37 }
 0x275   : > { %v1333_v54 = vmul.f32 %v5298_v22, %v1332_v28 }
 0x276   : > { %v1750_v42 = vadd.f32 %v4085_v18, %v1749_v57  ;;  %v1734_v63 = vmul.f32 %v5303_v45, %v1733_v25 }
 0x277   : > { %v1334_v37 = vadd.f32 %v5298_v22, %v1333_v54 }
 0x278   : > { %v1754_v15 = vsel %vm1753_vm14, %v4085_v18, %v1750_v42  ;;  %v4250_v42 = vld [vmem:[%s6531_s9] sm:$0xf] }
 0x279   : > { %v1759_v48 = vsel %vm1756_vm15, %v1758_v32, %v1754_v15 }
 0x28c   : > { %v1892_v11 = vpop.permute.xlu2 %1891 }
 0x28d   : > { %v1930_v14 = vadd.f32 %v1892_v11, %v4554_v60  ;;  %v1735_v60 = vadd.f32 %v5303_v45, %v1734_v63 }
 0x28f   : > { %v1739_v20 = vsel %vm5344_vm5, %v5303_v45, %v1735_v60  ;;  %v438_v60 = vld [vmem:[%s5326_s28 + $0x38] sm:$0xff] }
 0x2a4   : > { %v1958_v23 = vpop.permute.xlu1 %1957 }
 0x2a5   : > { %3884 = vmatmul.msk.bf16.vlgmr.msrb.gmra.mxu2 %vm595_vm0, %v1958_v23 }
 0x2aa   : > { %v1888_v26 = vpop.permute.xlu0 %1887 }
 0x2ab   : > { %v1928_v52 = vadd.f32 %v1888_v26, %v4527_v47  ;;  %v1349_v47 = vadd.f32 %v4083_v43, %v1348_v53  ;;  %v1338_v26 = vsel %vm1337_vm7, %v5298_v22, %v1334_v37 }
 0x2ac   : > { %v1818_v17 = vpop.permute.xlu1 %1817  ;;  %v1343_v0 = vsel %vm1340_vm9, %v1342_v36, %v1338_v26  ;;  %v442_v26 = vld [vmem:[%s5326_s28 + $0x58] sm:$0xff]  ;;  %v6608_v36 = vld [vmem:[#allocation2_spill] sm:$0xff] }
 0x2ad   : > { %v1944_v8 = vpack.c.bf16 %v1928_v52, %v1927_v35  ;;  %v1853_v31 = vmul.f32 %v1818_v17, %v5012_v19  ;;  %v1356_v19 = vand.u32 2147483648, %v1119_v24  ;;  %v1353_v58 = vsel %vm5312_vm13, %v4083_v43, %v1349_v47  ;;  %v5337_v24 = vld [vmem:[%s5326_s28 + $0x8] sm:$0xff] }
 0x2ae   : > { %v766_v43 = vpack.c.bf16 %v5337_v24, %v5334_v49  ;;  %v1743_v35 = vor.u32 1.1754944e-38, %v1742_v3  ;;  %v5366_v47 = vperm.slane %v4250_v42, 0 }
 0x2af   : > { %1963 = vrot.lane.b32.xlu2 %v1944_v8, %s4268_s21  ;;  %1897 = vrot.lane.b32.xlu0 %v1853_v31, %s4268_s21  ;;  %v1357_v7 = vor.u32 1.1754944e-38, %v1356_v19  ;;  %v435_v19 = vld [vmem:[%s5326_s28 + $0x20] sm:$0xff] }
 0x2b0   : > { %3812 = vmatmul.msk.bf16.vlgmr.msra.gmra.mxu3 %vm595_vm0, %v766_v43  ;;  %v1744_v52 = vsel %vm1741_vm8, %v1743_v35, %v1739_v20  ;;  %v5370_v11 = vadd.f32 %v4613_v46, %v5366_v47  ;;  %v768_v46 = vpack.c.bf16 %v5386_v51, %v435_v19  ;;  %v5409_v63 = vadd.f32 %v4631_v59, %v5366_v47  ;;  %v441_v20 = vld [vmem:[%s5326_s28 + $0x50] sm:$0xff] }
 0x2b1   : > { %v1358_v61 = vsel %vm1355_vm1, %v1357_v7, %v1353_v58  ;;  %v1775_v17 = vadd.f32 %v1744_v52, %v1343_v0  ;;  %v5395_v58 = vperm.slane %v4250_v42, 2  ;;  %v5421_v59 = vadd.f32 %v4595_v33, %v5366_v47  ;;  %v439_v33 = vld [vmem:[%s5326_s28 + $0x40] sm:$0xff]  ;;  %v6609_v0 = vld [vmem:[#allocation3_spill] sm:$0xff]  ;;  %v6611_v42 = vld [vmem:[#allocation5_spill] sm:$0xff] }
 0x2b2   : > { %v5431_v3 = vadd.f32 %v4653_v30, %v5366_v47  ;;  %v5440_v43 = vadd.f32 %v4683_v41, %v5366_v47  ;;  %v770_v23 = vpack.c.bf16 %v440_v16, %v439_v33  ;;  %v5446_v30 = vadd.f32 %v4661_v6, %v5366_v47  ;;  %v6607_v41 = vld [vmem:[#allocation4_spill] sm:$0xff] }
 0x2b3   : > { %v5456_v62 = vadd.f32 %v6607_v41, %v5366_v47  ;;  %v771_v35 = vpack.c.bf16 %v442_v26, %v441_v20  ;;  %v5469_v52 = vadd.f32 %v6608_v36, %v5366_v47 }
 0x2b4   : > { %v1890_v44 = vpop.permute.xlu1 %1889 }
 0x2b5   : > { %v1929_v34 = vadd.f32 %v1890_v44, %v4542_v55  ;;  %v1776_v55 = vadd.f32 %v1759_v48, %v1358_v61  ;;  %v1962_v53 = vpop.permute.xlu2 %1961 }
 0x2b7   : > { %v1945_v2 = vpack.c.bf16 %v1930_v14, %v1929_v34 }
 0x2b9   : > { %1965 = vrot.lane.b32.xlu2 %v1945_v2, %s4268_s21 }
 0x2bc   : > { %v1824_v12 = vpop.permute.xlu1 %1823 }
 0x2bd   : > { %v1856_v18 = vmul.f32 %v1824_v12, %v1776_v55  ;;  %v437_v55 = vld [vmem:[%s5326_s28 + $0x30] sm:$0xff] }
 0x2be   : > { %v1960_v56 = vpop.permute.xlu0 %1959  ;;  %v769_v12 = vpack.c.bf16 %v438_v60, %v437_v55 }
 0x2bf   : > { %3885 = vmatmul.msk.bf16.gmra.mxu2 %vm595_vm0, %v1960_v56  ;;  %1903 = vrot.lane.b32.xlu1 %v1856_v18, %s4268_s21 }
 0x2c6   : > { %v1822_v8 = vpop.permute.xlu0 %1821 }
 0x2c7   : > { %v1855_v31 = vmul.f32 %v1822_v8, %v1775_v17  ;;  %v5475_v17 = vadd.f32 %v6609_v0, %v5366_v47 }
 0x2c9   : > { %1901 = vrot.lane.b32.xlu0 %v1855_v31, %s4268_s21 }
 0x2cc   : > { %v1896_v57 = vpop.permute.xlu1 %1895 }
 0x2cd   : > { %v1932_v45 = vadd.f32 %v1896_v57, %v4581_v21  ;;  %v5375_v21 = vld [vmem:[%s5326_s28 + $0x10] sm:$0xff] }
 0x2ce   : > { %v1894_v40 = vpop.permute.xlu0 %1893 }
 0x2cf   : > { %v1931_v22 = vadd.f32 %v1894_v40, %v4569_v10  ;;  %3886 = vmatmul.msk.bf16.gmra.mxu2 %vm595_vm0, %v1962_v53  ;;  %v5378_v10 = vld [vmem:[%s5326_s28 + $0x18] sm:$0xff]  ;;  %v6610_v53 = vld [vmem:[#allocation6_spill] sm:$0xff] }
 0x2d0   : > { %v767_v13 = vpack.c.bf16 %v5378_v10, %v5375_v21  ;;  %v5485_v40 = vadd.f32 %v6610_v53, %v5366_v47 }
 0x2d1   : > { %v1946_v27 = vpack.c.bf16 %v1932_v45, %v1931_v22 }
 0x2d2   : > { %3813 = vmatmul.msk.bf16.gmra.mxu3 %vm595_vm0, %v767_v13  ;;  %v5496_v13 = vadd.f32 %v6611_v42, %v5366_v47 }
 0x2d3   : > { %1967 = vrot.lane.b32.xlu2 %v1946_v27, %s4268_s21 }
 0x2d4   : > { %v1900_v25 = vpop.permute.xlu1 %1899 }
 0x2d5   : > { %v1934_v44 = vadd.f32 %v1900_v25, %v4607_v38  ;;  %v5402_v38 = vadd.f32 %v4672_v39, %v5366_v47 }
 0x2db   : > { %2173 = vrot.lane.b32.xlu2 %v5370_v11, %s4267_s17 }
 0x2e2   : > { %3814 = vmatmul.msk.bf16.gmra.mxu3 %vm595_vm0, %v768_v46 }
 0x2f2   : > { %3815 = vmatmul.msk.bf16.gmra.mxu3 %vm595_vm0, %v769_v12 }
 0x302   : > { %3816 = vmatmul.msk.bf16.gmra.mxu3 %vm595_vm0, %v770_v23 }
 0x309   : > { %v1964_v1 = vpop.permute.xlu2 %1963 }
 0x30a   : > { %3887 = vmatmul.msk.bf16.gmra.mxu2 %vm595_vm0, %v1964_v1 }
 0x312   : > { %3817 = vmatmul.msk.bf16.gmra.mxu3 %vm595_vm0, %v771_v35 }
 0x313   : > { %v1966_v5 = vpop.permute.xlu2 %1965 }
 0x31a   : > { %3888 = vmatmul.msk.bf16.gmra.mxu2 %vm595_vm0, %v1966_v5 }
 0x321   : > { %v1898_v28 = vpop.permute.xlu0 %1897 }
 0x322   : > { %v1933_v14 = vadd.f32 %v1898_v28, %v4593_v29 }
 0x324   : > { %v1947_v34 = vpack.c.bf16 %v1934_v44, %v1933_v14 }
 0x326   : > { %1969 = vrot.lane.b32.xlu0 %v1947_v34, %s4268_s21 }
 0x328   : > { %v2018_v15 = vpop.f32.mrf.mxu2 }
 0x329   : > { %2091 = vrot.lane.b32.xlu2 %v2018_v15, %s4268_s21  ;;  %v2059_v37 = vadd.f32 %v5395_v58, %v2018_v15 }
 0x32d   : > { %v1968_v32 = vpop.permute.xlu2 %1967 }
 0x32e   : > { %3889 = vmatmul.msk.bf16.gmra.mxu2 %vm595_vm0, %v1968_v32  ;;  %2236 = vrot.lane.b32.xlu0 %v5395_v58, %s4268_s21 }
 0x330   : > { %v2020_v29 = vpop.f32.mrf.mxu2 }
 0x331   : > { %2181 = vrot.lane.b32.xlu2 %v5402_v38, %s4267_s17  ;;  %v1904_v7 = vpop.permute.xlu1 %1903  ;;  %v2060_v6 = vadd.f32 %v5395_v58, %v2020_v29 }
 0x332   : > { %v1936_v54 = vadd.f32 %v1904_v7, %v4637_v4 }
 0x333   : > { %v807_v19 = vpop.f32.mrf.mxu3 }
 0x335   : > { %v2174_v5 = vpop.permute.xlu2 %2173 }
 0x336   : > { %2093 = vrot.lane.b32.xlu0 %v2020_v29, %s4268_s21 }
 0x33b   : > { %v1902_v2 = vpop.permute.xlu0 %1901  ;;  %v809_v28 = vpop.f32.mrf.mxu3 }
 0x33c   : > { %v1935_v48 = vadd.f32 %v1902_v2, %v4621_v50 }
 0x33e   : > { %v1948_v61 = vpack.c.bf16 %v1936_v54, %v1935_v48  ;;  %2175 = vrot.lane.b32.xlu0 %v5409_v63, %s4267_s17 }
 0x340   : > { %1971 = vrot.lane.b32.xlu1 %v1948_v61, %s4268_s21 }
 0x342   : > { %v2023_v39 = vpop.f32.mrf.mxu2 }
 0x343   : > { %v2061_v4 = vadd.f32 %v5395_v58, %v2023_v39 }
 0x346   : > { %2575 = vrot.lane.b32.xlu0 %v2059_v37, %s4267_s17 }
 0x348   : > { %2171 = vrot.lane.b32.xlu1 %v5421_v59, %s4267_s17 }
 0x34a   : > { %v2025_v50 = vpop.f32.mrf.mxu2 }
 0x34b   : > { %2097 = vrot.lane.b32.xlu2 %v2025_v50, %s4268_s21  ;;  %v2062_v8 = vadd.f32 %v5395_v58, %v2025_v50 }
 0x34e   : > { %2579 = vrot.lane.b32.xlu0 %v2061_v4, %s4267_s17 }
 0x350   : > { %2177 = vrot.lane.b32.xlu1 %v5431_v3, %s4267_s17 }
 0x352   : > { %v2028_v18 = vpop.f32.mrf.mxu2 }
 0x353   : > { %2185 = vrot.lane.b32.xlu2 %v5440_v43, %s4267_s17  ;;  %v2063_v56 = vadd.f32 %v5395_v58, %v2028_v18 }
 0x355   : > { %v5518_v48 = vpop.f32.mrf.mxu3 }
 0x358   : > { %2179 = vrot.lane.b32.xlu1 %v5446_v30, %s4267_s17 }
 0x35a   : > { %v2030_v9 = vpop.f32.mrf.mxu2 }
 0x35b   : > { %2101 = vrot.lane.b32.xlu0 %v2030_v9, %s4268_s21  ;;  %2099 = vrot.lane.b32.xlu2 %v2028_v18, %s4268_s21  ;;  %v2064_v31 = vadd.f32 %v5395_v58, %v2030_v9 }
 0x35d   : > { %v814_v33 = vpop.f32.mrf.mxu3 }
 0x360   : > { %2095 = vrot.lane.b32.xlu1 %v2023_v39, %s4268_s21 }
 0x363   : > { %2583 = vrot.lane.b32.xlu0 %v2063_v56, %s4267_s17  ;;  %2189 = vrot.lane.b32.xlu2 %v5456_v62, %s4267_s17 }
 0x365   : > { %v5534_v42 = vpop.f32.mrf.mxu3 }
 0x368   : > { %2577 = vrot.lane.b32.xlu1 %v2060_v6, %s4267_s17 }
 0x370   : > { %2183 = vrot.lane.b32.xlu1 %v5469_v52, %s4267_s17 }
 0x378   : > { %2187 = vrot.lane.b32.xlu1 %v5475_v17, %s4267_s17 }
 0x380   : > { %2581 = vrot.lane.b32.xlu1 %v2062_v8, %s4267_s17 }
 0x383   : > { %v2092_v15 = vpop.permute.xlu2 %2091 }
 0x384   : > { %v2139_v55 = vadd.f32 %v2092_v15, %v807_v19 }
 0x388   : > { %2585 = vrot.lane.b32.xlu1 %v2064_v31, %s4267_s17 }
 0x38b   : > { %v5520_v61 = vpop.permute.xlu2 %2181 }
 0x38d   : > { %v2033_v57 = vpop.f32.mrf.mxu2 }
 0x38e   : > { %2103 = vrot.lane.b32.xlu2 %v2033_v57, %s4268_s21  ;;  %v2065_v45 = vadd.f32 %v5395_v58, %v2033_v57 }
 0x390   : > { %2193 = vrot.lane.b32.xlu1 %v5485_v40, %s4267_s17 }
 0x395   : > { %v2035_v22 = vpop.f32.mrf.mxu2 }
 0x396   : > { %2105 = vrot.lane.b32.xlu0 %v2035_v22, %s4268_s21  ;;  %2587 = vrot.lane.b32.xlu2 %v2065_v45, %s4267_s17  ;;  %v2066_v32 = vadd.f32 %v5395_v58, %v2035_v22 }
 0x398   : > { %v1970_v27 = vpop.permute.xlu0 %1969 }
 0x399   : > { %3890 = vmatmul.msk.bf16.gmra.mxu2 %vm595_vm0, %v1970_v27 }
 0x39d   : > { %v5498_v1 = vpop.f32.mrf.mxu2 }
 0x39e   : > { %2191 = vrot.lane.b32.xlu0 %v5496_v13, %s4267_s17  ;;  %2107 = vrot.lane.b32.xlu2 %v5498_v1, %s4268_s21 }
 0x3a0   : > { %v5504_v46 = vpop.permute.xlu0 %2236 }
 0x3a5   : > { %v5506_v25 = vpop.f32.mrf.mxu2  ;;  %v2098_v16 = vpop.permute.xlu2 %2097 }
 0x3a6   : > { %2109 = vrot.lane.b32.xlu0 %v5506_v25, %s4268_s21  ;;  %v2142_v23 = vadd.f32 %v2098_v16, %v814_v33 }
 0x3a8   : > { %v2094_v44 = vpop.permute.xlu0 %2093 }
 0x3a9   : > { %v2140_v14 = vadd.f32 %v2094_v44, %v809_v28 }
 0x3ab   : > { %v2220_v34 = vadd.f32 %v2174_v5, %v2140_v14 }
 0x3ad   : > { %v2240_v29 = vadd.f32 %v5504_v46, %v2220_v34  ;;  %v5530_v31 = vpop.permute.xlu2 %2185 }
 0x3ae   : > { %2589 = vrot.lane.b32.xlu0 %v2066_v32, %s4267_s17 }
 0x3af   : > { %v3893_v7 = vmul.f32 -1.442695, %v2240_v29 }
 0x3b0   : > { %v5532_v22 = vpop.permute.xlu0 %2175 }
 0x3b1   : > { %4090 = vpow2.f32 %v3893_v7  ;;  %v5513_v2 = vpop.f32.mrf.mxu2 }
 0x3b2   : > { %v1972_v54 = vpop.permute.xlu1 %1971  ;;  %2111 = vrot.lane.b32.xlu1 %v5513_v2, %s4268_s21 }
 0x3b3   : > { %3891 = vmatmul.msk.bf16.gmra.mxu2 %vm595_vm0, %v1972_v54 }
 0x3b5   : > { %v5538_v29 = vpop.permute.xlu2 %2099 }
 0x3b7   : > { %v4091_v39 = vpop.eup %4090 }
 0x3b8   : > { %v2304_v37 = vadd.f32 1.0, %v4091_v39 }
 0x3b9   : > { %v5522_v60 = vpop.f32.mrf.mxu2 }
 0x3ba   : > { %2113 = vrot.lane.b32.xlu2 %v5522_v60, %s4268_s21  ;;  %v2172_v12 = vpop.permute.xlu1 %2171  ;;  %4092 = vrcp.f32 %v2304_v37  ;;  %vm2339_vm11 = vweird.f32 %v2304_v37  ;;  %v2345_v14 = vand.u32 2147483648, %v2304_v37  ;;  %v2343_v34 = vand.u32 2147483647, %v2304_v37 }
 0x3bb   : > { %v2219_v50 = vadd.f32 %v2172_v12, %v2139_v55 }
 0x3bc   : > { %v2346_v55 = vor.u32 1.1754944e-38, %v2345_v14  ;;  %vm2344_vm1 = vcmp.eq.f32.partialorder %v2343_v34, 8.507059e+37 }
 0x3bd   : > { %v2239_v4 = vadd.f32 %v5504_v46, %v2219_v50 }
 0x3bf   : > { %v3892_v18 = vmul.f32 -1.442695, %v2239_v4  ;;  %v819_v4 = vpop.f32.mrf.mxu3 }
 0x3c0   : > { %v4093_v56 = vpop.eup %4092 }
 0x3c1   : > { %4094 = vpow2.f32 %v3892_v18  ;;  %v2335_v35 = vmul.f32 %v4093_v56, %v2304_v37  ;;  %vm2340_vm10 = vweird.f32 %v4093_v56  ;;  %v2576_v37 = vpop.permute.xlu0 %2575 }
 0x3c2   : > { %v2178_v9 = vpop.permute.xlu1 %2177  ;;  %vm2341_vm13 = vmor %vm2339_vm11, %vm2340_vm10 }
 0x3c3   : > { %v2222_v41 = vadd.f32 %v2178_v9, %v2142_v23  ;;  %v2336_v8 = vsub.f32 1.0, %v2335_v35 }
 0x3c5   : > { %v2242_v6 = vadd.f32 %v5504_v46, %v2222_v41  ;;  %v2337_v53 = vmul.f32 %v4093_v56, %v2336_v8 }
 0x3c7   : > { %v4095_v20 = vpop.eup %4094  ;;  %v3895_v26 = vmul.f32 -1.442695, %v2242_v6  ;;  %v2338_v28 = vadd.f32 %v4093_v56, %v2337_v53  ;;  %v5542_v6 = vpop.permute.xlu2 %2189 }
 0x3c8   : > { %v2303_v36 = vadd.f32 1.0, %v4095_v20 }
 0x3c9   : > { %4096 = vpow2.f32 %v3895_v26  ;;  %v2342_v54 = vsel %vm2341_vm13, %v4093_v56, %v2338_v28  ;;  %v822_v26 = vpop.f32.mrf.mxu3  ;;  %v5551_v28 = vld [vmem:[%s5326_s28 + $0x60] sm:$0xff] }
 0x3ca   : > { %4098 = vrcp.f32 %v2303_v36  ;;  %v5528_v0 = vpop.permute.xlu1 %2179  ;;  %v2330_v32 = vand.u32 2147483648, %v2303_v36  ;;  %v2328_v7 = vand.u32 2147483647, %v2303_v36  ;;  %vm2324_vm14 = vweird.f32 %v2303_v36 }
 0x3cb   : > { %v2347_v33 = vsel %vm2344_vm1, %v2346_v55, %v2342_v54  ;;  %v5559_v54 = vpop.permute.xlu0 %2579 }
 0x3cc   : > { %v2331_v50 = vor.u32 1.1754944e-38, %v2330_v32  ;;  %vm2329_vm2 = vcmp.eq.f32.partialorder %v2328_v7, 8.507059e+37 }
 0x3cf   : > { %v4097_v57 = vpop.eup %4096 }
 0x3d0   : > { %v4099_v45 = vpop.eup %4098  ;;  %v2306_v19 = vadd.f32 1.0, %v4097_v57 }
 0x3d1   : > { %v2320_v27 = vmul.f32 %v4099_v45, %v2303_v36  ;;  %vm2325_vm12 = vweird.f32 %v4099_v45  ;;  %v6612_v36 = vld [vmem:[#allocation7_spill] sm:$0xff]  ;;  %v824_v14 = vpop.f32.mrf.mxu3 }
 0x3d2   : > { %v5536_v5 = vpop.permute.xlu1 %2095  ;;  %4100 = vrcp.f32 %v2306_v19  ;;  %vm2326_vm15 = vmor %vm2324_vm14, %vm2325_vm12  ;;  %v5546_v8 = vadd.f32 %v6612_v36, %v5366_v47  ;;  %v2375_v34 = vand.u32 2147483648, %v2306_v19  ;;  %vm2369_vm4 = vweird.f32 %v2306_v19 }
 0x3d3   : > { %v2321_v44 = vsub.f32 1.0, %v2320_v27  ;;  %v2373_v32 = vand.u32 2147483647, %v2306_v19 }
 0x3d4   : > { %v2376_v55 = vor.u32 1.1754944e-38, %v2375_v34 }
 0x3d5   : > { %v2322_v15 = vmul.f32 %v4099_v45, %v2321_v44  ;;  %v5554_v44 = vld [vmem:[%s5326_s28 + $0x68] sm:$0xff]  ;;  %vm2374_vm6 = vcmp.eq.f32.partialorder %v2373_v32, 8.507059e+37 }
 0x3d7   : > { %v2323_v39 = vadd.f32 %v4099_v45, %v2322_v15  ;;  %v772_v15 = vpack.c.bf16 %v5554_v44, %v5551_v28 }
 0x3d8   : > { %v4101_v9 = vpop.eup %4100 }
 0x3d9   : > { %v2327_v12 = vsel %vm2326_vm15, %v4099_v45, %v2323_v39  ;;  %v2365_v56 = vmul.f32 %v4101_v9, %v2306_v19  ;;  %vm2370_vm3 = vweird.f32 %v4101_v9  ;;  %3818 = vmatmul.msk.bf16.gmra.mxu3 %vm595_vm0, %v772_v15  ;;  %v2141_v19 = vadd.f32 %v5536_v5, %v5518_v48 }
 0x3da   : > { %v2578_v16 = vpop.permute.xlu1 %2577  ;;  %v2332_v23 = vsel %vm2329_vm2, %v2331_v50, %v2327_v12  ;;  %vm2371_vm5 = vmor %vm2369_vm4, %vm2370_vm3 }
 0x3db   : > { %v2624_v18 = vmul.f32 %v2578_v16, %v2347_v33  ;;  %v2623_v41 = vmul.f32 %v2576_v37, %v2332_v23  ;;  %v2366_v35 = vsub.f32 1.0, %v2365_v56  ;;  %v827_v16 = vpop.f32.mrf.mxu3  ;;  %v2102_v37 = vpop.permute.xlu0 %2101  ;;  %v2068_v56 = vadd.f32 %v5395_v58, %v5506_v25 }
 0x3dc   : > { %v2144_v34 = vadd.f32 %v2102_v37, %v819_v4  ;;  %v2143_v25 = vadd.f32 %v5538_v29, %v5534_v42 }
 0x3dd   : > { %2657 = vrot.lane.b32.xlu0 %v2624_v18, %s4269_s11  ;;  %2655 = vrot.lane.b32.xlu2 %v2623_v41, %s4269_s11  ;;  %v2367_v57 = vmul.f32 %v4101_v9, %v2366_v35  ;;  %v5567_v41 = vld [vmem:[%s5326_s28 + $0x70] sm:$0xff]  ;;  %v2221_v35 = vadd.f32 %v5532_v22, %v2141_v19 }
 0x3de   : > { %v2223_v15 = vadd.f32 %v5528_v0, %v2143_v25  ;;  %v2224_v32 = vadd.f32 %v5520_v61, %v2144_v34 }
 0x3df   : > { %v2368_v27 = vadd.f32 %v4101_v9, %v2367_v57  ;;  %v2241_v48 = vadd.f32 %v5504_v46, %v2221_v35 }
 0x3e1   : > { %v2372_v7 = vsel %vm2371_vm5, %v4101_v9, %v2368_v27  ;;  %v5570_v9 = vld [vmem:[%s5326_s28 + $0x78] sm:$0xff]  ;;  %v3894_v27 = vmul.f32 -1.442695, %v2241_v48 }
 0x3e2   : > { %v2184_v20 = vpop.permute.xlu1 %2183  ;;  %v2377_v12 = vsel %vm2374_vm6, %v2376_v55, %v2372_v7  ;;  %v773_v57 = vpack.c.bf16 %v5570_v9, %v5567_v41 }
 0x3e3   : > { %v5582_v5 = vpop.permute.xlu0 %2583  ;;  %4102 = vpow2.f32 %v3894_v27 }
 0x3e5   : > { %2195 = vrot.lane.b32.xlu2 %v5546_v8, %s4267_s17 }
 0x3e8   : > { %v2104_v53 = vpop.permute.xlu2 %2103 }
 0x3e9   : > { %3819 = vmatmul.msk.bf16.gmra.mxu3 %vm595_vm0, %v773_v57  ;;  %v2145_v22 = vadd.f32 %v2104_v53, %v822_v26  ;;  %v4103_v7 = vpop.eup %4102  ;;  %v829_v57 = vpop.f32.mrf.mxu3 }
 0x3ea   : > { %v2188_v45 = vpop.permute.xlu1 %2187 }
 0x3eb   : > { %v2225_v55 = vadd.f32 %v2184_v20, %v2145_v22 }
 0x3f0   : > { %v5561_v39 = vpop.permute.xlu2 %2587 }
 0x3f2   : > { %v2582_v50 = vpop.permute.xlu1 %2581 }
 0x3f3   : > { %v2626_v33 = vmul.f32 %v2582_v50, %v2377_v12  ;;  %v2243_v12 = vadd.f32 %v5504_v46, %v2223_v15  ;;  %v2244_v50 = vadd.f32 %v5504_v46, %v2224_v32 }
 0x3f5   : > { %2661 = vrot.lane.b32.xlu2 %v2626_v33, %s4269_s11  ;;  %v2305_v33 = vadd.f32 1.0, %v4103_v7  ;;  %v3896_v19 = vmul.f32 -1.442695, %v2243_v12  ;;  %v3897_v4 = vmul.f32 -1.442695, %v2244_v50 }
 0x3f7   : > { %4104 = vrcp.f32 %v2305_v33  ;;  %vm2354_vm8 = vweird.f32 %v2305_v33 }
 0x3f8   : > { %v2108_v18 = vpop.permute.xlu2 %2107  ;;  %4106 = vpow2.f32 %v3896_v19 }
 0x3f9   : > { %v2147_v23 = vadd.f32 %v2108_v18, %v827_v16  ;;  %v2245_v16 = vadd.f32 %v5504_v46, %v2225_v55  ;;  %4108 = vpow2.f32 %v3897_v4  ;;  %v3950_v55 = vld [vmem:[%s6530_s8 + $0x8] sm:$0xff]  ;;  %v2067_v4 = vadd.f32 %v5395_v58, %v5498_v1 }
 0x3fa   : > { %2773 = vmatpush.bf16.msrb.mxu3 %v3950_v55 }
 0x3fb   : > { %v5575_v36 = vadd.f32 %v2188_v45, %v2147_v23  ;;  %v3898_v42 = vmul.f32 -1.442695, %v2245_v16  ;;  %v2360_v16 = vand.u32 2147483648, %v2305_v33 }
 0x3fd   : > { %2593 = vrot.lane.b32.xlu2 %v2068_v56, %s4267_s17  ;;  %4110 = vpow2.f32 %v3898_v42  ;;  %v4105_v61 = vpop.eup %4104  ;;  %v2358_v42 = vand.u32 2147483647, %v2305_v33 }
 0x3fe   : > { %v4107_v20 = vpop.eup %4106  ;;  %v2350_v53 = vmul.f32 %v4105_v61, %v2305_v33  ;;  %vm2355_vm7 = vweird.f32 %v4105_v61 }
 0x3ff   : > { %v4109_v18 = vpop.eup %4108  ;;  %v5598_v35 = vadd.f32 1.0, %v4107_v20  ;;  %vm2356_vm9 = vmor %vm2354_vm8, %vm2355_vm7  ;;  %vm2359_vm10 = vcmp.eq.f32.partialorder %v2358_v42, 8.507059e+37 }
 0x400   : > { %v5600_v48 = vadd.f32 1.0, %v4109_v18  ;;  %v2351_v34 = vsub.f32 1.0, %v2350_v53  ;;  %v2361_v18 = vor.u32 1.1754944e-38, %v2360_v16 }
 0x401   : > { %4112 = vrcp.f32 %v5598_v35  ;;  %vm2384_vm13 = vweird.f32 %v5598_v35 }
 0x402   : > { %4114 = vrcp.f32 %v5600_v48  ;;  %v2352_v7 = vmul.f32 %v4105_v61, %v2351_v34  ;;  %vm2399_vm1 = vweird.f32 %v5600_v48 }
 0x403   : > { %v4111_v56 = vpop.eup %4110 }
 0x404   : > { %v5603_v25 = vadd.f32 1.0, %v4111_v56  ;;  %v2353_v50 = vadd.f32 %v4105_v61, %v2352_v7 }
 0x406   : > { %4116 = vrcp.f32 %v5603_v25  ;;  %vm2414_vm2 = vweird.f32 %v5603_v25 }
 0x408   : > { %v2106_v45 = vpop.permute.xlu0 %2105 }
 0x409   : > { %v2146_v0 = vadd.f32 %v2106_v45, %v824_v14 }
 0x40b   : > { %v2226_v26 = vadd.f32 %v5530_v31, %v2146_v0  ;;  %v6613_v31 = vld [vmem:[#allocation8_spill] sm:$0xff] }
 0x40c   : > { %v5607_v22 = vadd.f32 %v6613_v31, %v5366_v47 }
 0x40d   : > { %v2246_v14 = vadd.f32 %v5504_v46, %v2226_v26  ;;  %v2357_v26 = vsel %vm2356_vm9, %v4105_v61, %v2353_v50  ;;  %v3949_v61 = vld [vmem:[%s6530_s8] sm:$0xff] }
 0x40e   : > { %v2362_v33 = vsel %vm2359_vm10, %v2361_v18, %v2357_v26  ;;  %2774 = vmatpush.bf16.msrb.mxu3 %v3949_v61  ;;  %v2418_v61 = vand.u32 2147483647, %v5603_v25 }
 0x40f   : > { %v3899_v15 = vmul.f32 -1.442695, %v2246_v14  ;;  %v2625_v31 = vmul.f32 %v5559_v54, %v2362_v33  ;;  %v6614_v54 = vld [vmem:[#allocation9_spill] sm:$0xff]  ;;  %v2405_v33 = vand.u32 2147483648, %v5600_v48 }
 0x410   : > { %v5591_v37 = vpop.permute.xlu0 %2191  ;;  %v5657_v16 = vadd.f32 %v6614_v54, %v5366_v47  ;;  %vm2419_vm6 = vcmp.eq.f32.partialorder %v2418_v61, 8.507059e+37 }
 0x411   : > { %4118 = vpow2.f32 %v3899_v15  ;;  %v2406_v54 = vor.u32 1.1754944e-38, %v2405_v33 }
 0x414   : > { %v5644_v15 = vpop.permute.xlu2 %2113 }
 0x418   : > { %v2110_v23 = vpop.permute.xlu0 %2109 }
 0x419   : > { %v2148_v27 = vadd.f32 %v2110_v23, %v829_v57 }
 0x41b   : > { %v2228_v32 = vadd.f32 %v5542_v6, %v2148_v27  ;;  %v5623_v6 = vpop.eup %4112 }
 0x41c   : > { %v5593_v29 = vpop.f32.mrf.mxu2  ;;  %v5625_v19 = vpop.eup %4114  ;;  %v2380_v53 = vmul.f32 %v5623_v6, %v5598_v35  ;;  %vm2385_vm11 = vweird.f32 %v5623_v6 }
 0x41d   : > { %2115 = vrot.lane.b32.xlu0 %v5593_v29, %s4268_s21  ;;  %v2248_v12 = vadd.f32 %v5504_v46, %v2228_v32  ;;  %v5629_v0 = vpop.eup %4116  ;;  %v2395_v1 = vmul.f32 %v5625_v19, %v5600_v48  ;;  %vm2400_vm12 = vweird.f32 %v5625_v19  ;;  %vm5674_vm15 = vmor %vm2384_vm13, %vm2385_vm11 }
 0x41e   : > { %v4119_v23 = vpop.eup %4118  ;;  %v2410_v56 = vmul.f32 %v5629_v0, %v5603_v25  ;;  %v2381_v57 = vsub.f32 1.0, %v2380_v53  ;;  %vm2415_vm14 = vweird.f32 %v5629_v0  ;;  %vm5687_vm3 = vmor %vm2399_vm1, %vm2400_vm12 }
 0x41f   : > { %v3901_v20 = vmul.f32 -1.442695, %v2248_v12  ;;  %v5638_v14 = vadd.f32 1.0, %v4119_v23  ;;  %v2396_v34 = vsub.f32 1.0, %v2395_v1  ;;  %v2420_v1 = vand.u32 2147483648, %v5603_v25  ;;  %vm5699_vm4 = vmor %vm2414_vm2, %vm2415_vm14 }
 0x420   : > { %v2411_v27 = vsub.f32 1.0, %v2410_v56  ;;  %v2382_v32 = vmul.f32 %v5623_v6, %v2381_v57  ;;  %v2388_v57 = vand.u32 2147483647, %v5598_v35 }
 0x421   : > { %4120 = vpow2.f32 %v3901_v20  ;;  %v2397_v50 = vmul.f32 %v5625_v19, %v2396_v34  ;;  %v2403_v34 = vand.u32 2147483647, %v5600_v48  ;;  %v2435_v61 = vand.u32 2147483648, %v5638_v14 }
 0x422   : > { %4122 = vrcp.f32 %v5638_v14  ;;  %v2412_v12 = vmul.f32 %v5629_v0, %v2411_v27  ;;  %v2383_v20 = vadd.f32 %v5623_v6, %v2382_v32  ;;  %vm2389_vm5 = vcmp.eq.f32.partialorder %v2388_v57, 8.507059e+37 }
 0x423   : > { %v2398_v18 = vadd.f32 %v5625_v19, %v2397_v50  ;;  %v2421_v50 = vor.u32 1.1754944e-38, %v2420_v1  ;;  %vm2404_vm7 = vcmp.eq.f32.partialorder %v2403_v34, 8.507059e+37  ;;  %v2070_v57 = vadd.f32 %v5395_v58, %v5522_v60 }
 0x424   : > { %v5610_v45 = vpop.f32.mrf.mxu2  ;;  %v2413_v53 = vadd.f32 %v5629_v0, %v2412_v12  ;;  %v2069_v34 = vadd.f32 %v5395_v58, %v5513_v2  ;;  %vm2429_vm9 = vweird.f32 %v5638_v14 }
 0x425   : > { %2117 = vrot.lane.b32.xlu1 %v5610_v45, %s4268_s21  ;;  %2197 = vrot.lane.b32.xlu0 %v5607_v22, %s4267_s17 }
 0x426   : > { %v2417_v48 = vsel %vm5699_vm4, %v5629_v0, %v2413_v53 }
 0x427   : > { %v4121_v55 = vpop.eup %4120 }
 0x428   : > { %v5666_v26 = vadd.f32 1.0, %v4121_v55  ;;  %v5672_v23 = vpop.eup %4122  ;;  %v2402_v55 = vsel %vm5687_vm3, %v5625_v19, %v2398_v18 }
 0x429   : > { %v2407_v53 = vsel %vm2404_vm7, %v2406_v54, %v2402_v55  ;;  %vm2430_vm8 = vweird.f32 %v5672_v23  ;;  %v2071_v54 = vadd.f32 %v5395_v58, %v5593_v29 }
 0x42a   : > { %4124 = vrcp.f32 %v5666_v26  ;;  %vm2431_vm10 = vmor %vm2429_vm9, %vm2430_vm8  ;;  %vm2459_vm13 = vweird.f32 %v5666_v26 }
 0x42d   : > { %2591 = vrot.lane.b32.xlu1 %v2067_v4, %s4267_s17  ;;  %v6615_v4 = vld [vmem:[#allocation10_spill] sm:$0xff] }
 0x42e   : > { %v5662_v42 = vadd.f32 %v6615_v4, %v5366_v47  ;;  %v2390_v47 = vand.u32 2147483648, %v5598_v35  ;;  %v2387_v35 = vsel %vm5674_vm15, %v5623_v6, %v2383_v20  ;;  %v2425_v6 = vmul.f32 %v5672_v23, %v5638_v14  ;;  %v2586_v4 = vpop.permute.xlu1 %2585 }
 0x42f   : > { %v2422_v20 = vsel %vm2419_vm6, %v2421_v50, %v2417_v48  ;;  %v2628_v19 = vmul.f32 %v2586_v4, %v2407_v53  ;;  %v2072_v48 = vadd.f32 %v5395_v58, %v5610_v45 }
 0x430   : > { %6616 = vst [vmem:[#allocation4_spill] sm:$0xff] %v5662_v42  ;;  %v2391_v12 = vor.u32 1.1754944e-38, %v2390_v47  ;;  %v2426_v18 = vsub.f32 1.0, %v2425_v6  ;;  %v4125_v56 = vpop.eup %4124  ;;  %v2629_v25 = vmul.f32 %v5561_v39, %v2422_v20 }
 0x431   : > { %v2455_v33 = vmul.f32 %v4125_v56, %v5666_v26  ;;  %vm2460_vm12 = vweird.f32 %v4125_v56 }
 0x432   : > { %v2392_v0 = vsel %vm2389_vm5, %v2391_v12, %v2387_v35  ;;  %v2427_v47 = vmul.f32 %v5672_v23, %v2426_v18  ;;  %v2433_v35 = vand.u32 2147483647, %v5638_v14  ;;  %v2436_v12 = vor.u32 1.1754944e-38, %v2435_v61  ;;  %vm2461_vm14 = vmor %vm2459_vm13, %vm2460_vm12 }
 0x433   : > { %v2627_v27 = vmul.f32 %v5582_v5, %v2392_v0  ;;  %v2456_v39 = vsub.f32 1.0, %v2455_v33  ;;  %v2465_v0 = vand.u32 2147483648, %v5666_v26 }
 0x434   : > { %v2428_v5 = vadd.f32 %v5672_v23, %v2427_v47  ;;  %vm2434_vm11 = vcmp.eq.f32.partialorder %v2433_v35, 8.507059e+37 }
 0x435   : > { %2659 = vrot.lane.b32.xlu1 %v2625_v31, %s4269_s11  ;;  %v2457_v2 = vmul.f32 %v4125_v56, %v2456_v39 }
 0x436   : > { %v5649_v7 = vpop.f32.mrf.mxu2  ;;  %v2432_v60 = vsel %vm2431_vm10, %v5672_v23, %v2428_v5 }
 0x437   : > { %2119 = vrot.lane.b32.xlu2 %v5649_v7, %s4268_s21  ;;  %v2656_v31 = vpop.permute.xlu2 %2655  ;;  %v2437_v45 = vsel %vm2434_vm11, %v2436_v12, %v2432_v60  ;;  %v2458_v4 = vadd.f32 %v4125_v56, %v2457_v2 }
 0x438   : > { %v5745_v50 = vadd.f32 %v2656_v31, %v5334_v49  ;;  %v2073_v49 = vadd.f32 %v5395_v58, %v5649_v7  ;;  %v2466_v31 = vor.u32 1.1754944e-38, %v2465_v0  ;;  %v2247_v7 = vadd.f32 %v5504_v46, %v5575_v36 }
 0x439   : > { %v2462_v29 = vsel %vm2461_vm14, %v4125_v56, %v2458_v4 }
 0x43a   : > { %v3900_v18 = vmul.f32 -1.442695, %v2247_v7 }
 0x43c   : > { %4126 = vpow2.f32 %v3900_v18 }
 0x43d   : > { %2199 = vrot.lane.b32.xlu1 %v5657_v16, %s4267_s17 }
 0x43e   : > { %v5704_v32 = vpop.f32.mrf.mxu2 }
 0x43f   : > { %2121 = vrot.lane.b32.xlu0 %v5704_v32, %s4268_s21  ;;  %2201 = vrot.lane.b32.xlu2 %v5662_v42, %s4267_s17  ;;  %v2590_v42 = vpop.permute.xlu0 %2589  ;;  %v5722_v1 = vpop.permute.xlu2 %2195 }
 0x440   : > { %v2630_v20 = vmul.f32 %v2590_v42, %v2437_v45 }
 0x445   : > { %2665 = vrot.lane.b32.xlu1 %v2628_v19, %s4269_s11 }
 0x447   : > { %2663 = vrot.lane.b32.xlu0 %v2627_v27, %s4269_s11  ;;  %2667 = vrot.lane.b32.xlu2 %v2629_v25, %s4269_s11  ;;  %v4127_v27 = vpop.eup %4126  ;;  %v2194_v25 = vpop.permute.xlu1 %2193 }
 0x448   : > { %v2311_v47 = vadd.f32 1.0, %v4127_v27 }
 0x44a   : > { %4128 = vrcp.f32 %v2311_v47  ;;  %vm2444_vm2 = vweird.f32 %v2311_v47 }
 0x44d   : > { %2597 = vrot.lane.b32.xlu1 %v2070_v57, %s4267_s17 }
 0x44f   : > { %2595 = vrot.lane.b32.xlu0 %v2069_v34, %s4267_s17  ;;  %v2658_v55 = vpop.permute.xlu0 %2657  ;;  %2601 = vrot.lane.b32.xlu2 %v2072_v48, %s4267_s17  ;;  %v5742_v6 = vpop.permute.xlu2 %2661 }
 0x450   : > { %v5748_v14 = vadd.f32 %v2658_v55, %v5337_v24  ;;  %v2463_v24 = vand.u32 2147483647, %v5666_v26  ;;  %v832_v26 = vpop.f32.mrf.mxu3  ;;  %v2112_v57 = vpop.permute.xlu1 %2111 }
 0x451   : > { %v2149_v5 = vadd.f32 %v2112_v57, %v832_v26  ;;  %v4129_v39 = vpop.eup %4128 }
 0x452   : > { %v2723_v23 = vpack.c.bf16 %v5748_v14, %v5745_v50  ;;  %vm2464_vm15 = vcmp.eq.f32.partialorder %v2463_v24, 8.507059e+37  ;;  %v2440_v35 = vmul.f32 %v4129_v39, %v2311_v47  ;;  %vm2445_vm1 = vweird.f32 %v4129_v39 }
 0x453   : > { %v2467_v19 = vsel %vm2464_vm15, %v2466_v31, %v2462_v29  ;;  %v2229_v34 = vadd.f32 %v5591_v37, %v2149_v5  ;;  %v2450_v29 = vand.u32 2147483648, %v2311_v47  ;;  %vm2446_vm3 = vmor %vm2444_vm2, %vm2445_vm1 }
 0x454   : > { %3916 = vmatmul.msk.bf16.vlgmr.msrb.gmra.mxu3 %vm595_vm0, %v2723_v23  ;;  %v2441_v12 = vsub.f32 1.0, %v2440_v35 }
 0x455   : > { %2599 = vrot.lane.b32.xlu1 %v2071_v54, %s4267_s17  ;;  %v2249_v55 = vadd.f32 %v5504_v46, %v2229_v34  ;;  %v2451_v18 = vor.u32 1.1754944e-38, %v2450_v29 }
 0x457   : > { %2669 = vrot.lane.b32.xlu0 %v2630_v20, %s4269_s11  ;;  %2603 = vrot.lane.b32.xlu2 %v2073_v49, %s4267_s17  ;;  %v2594_v53 = vpop.permute.xlu2 %2593  ;;  %v3902_v54 = vmul.f32 -1.442695, %v2249_v55  ;;  %v2074_v55 = vadd.f32 %v5395_v58, %v5704_v32 }
 0x458   : > { %v2632_v42 = vmul.f32 %v2594_v53, %v2467_v19  ;;  %v834_v33 = vpop.f32.mrf.mxu3  ;;  %v2448_v19 = vand.u32 2147483647, %v2311_v47 }
 0x459   : > { %v2150_v56 = vadd.f32 %v5644_v15, %v834_v33  ;;  %v2442_v15 = vmul.f32 %v4129_v39, %v2441_v12 }
 0x45a   : > { %vm2449_vm4 = vcmp.eq.f32.partialorder %v2448_v19, 8.507059e+37 }
 0x45b   : > { %v2230_v61 = vadd.f32 %v2194_v25, %v2150_v56  ;;  %v2443_v49 = vadd.f32 %v4129_v39, %v2442_v15 }
 0x45d   : > { %2673 = vrot.lane.b32.xlu1 %v2632_v42, %s4269_s11  ;;  %v2250_v48 = vadd.f32 %v5504_v46, %v2230_v61  ;;  %v2447_v7 = vsel %vm2446_vm3, %v4129_v39, %v2443_v49 }
 0x45e   : > { %v2452_v33 = vsel %vm2449_vm4, %v2451_v18, %v2447_v7 }
 0x45f   : > { %v3903_v45 = vmul.f32 -1.442695, %v2250_v48 }
 0x460   : > { %v837_v36 = vpop.f32.mrf.mxu3 }
 0x461   : > { %4130 = vpow2.f32 %v3903_v45 }
 0x462   : > { %4132 = vpow2.f32 %v3902_v54 }
 0x467   : > { %v4131_v42 = vpop.eup %4130 }
 0x468   : > { %v839_v0 = vpop.f32.mrf.mxu3  ;;  %v4133_v26 = vpop.eup %4132  ;;  %v5773_v27 = vadd.f32 1.0, %v4131_v42 }
 0x469   : > { %v5775_v5 = vadd.f32 1.0, %v4133_v26 }
 0x46a   : > { %vm2489_vm6 = vweird.f32 %v5773_v27 }
 0x46b   : > { %vm2474_vm9 = vweird.f32 %v5775_v5 }
 0x470   : > { %v842_v61 = vpop.f32.mrf.mxu3 }
 0x478   : > { %v844_v32 = vpop.f32.mrf.mxu3 }
 0x48f   : > { %v2116_v60 = vpop.permute.xlu0 %2115 }
 0x490   : > { %v2151_v2 = vadd.f32 %v2116_v60, %v837_v36 }
 0x491   : > { %v2120_v35 = vpop.permute.xlu2 %2119 }
 0x492   : > { %v2231_v23 = vadd.f32 %v5722_v1, %v2151_v2  ;;  %v5790_v2 = vadd.f32 %v5742_v6, %v5378_v10  ;;  %v2153_v10 = vadd.f32 %v2120_v35, %v842_v61  ;;  %v4251_v61 = vld [vmem:[%s5326_s28 + $0x20] sm:$0xff] }
 0x494   : > { %v2251_v4 = vadd.f32 %v5504_v46, %v2231_v23 }
 0x496   : > { %v3904_v31 = vmul.f32 -1.442695, %v2251_v4 }
 0x497   : > { %v2118_v20 = vpop.permute.xlu1 %2117  ;;  %v2198_v24 = vpop.permute.xlu0 %2197 }
 0x498   : > { %v2152_v37 = vadd.f32 %v2118_v20, %v839_v0  ;;  %4134 = vpow2.f32 %v3904_v31 }
 0x499   : > { %v2202_v20 = vpop.permute.xlu2 %2201 }
 0x49a   : > { %v2232_v53 = vadd.f32 %v2198_v24, %v2152_v37 }
 0x49c   : > { %v2252_v1 = vadd.f32 %v5504_v46, %v2232_v53 }
 0x49e   : > { %v3905_v25 = vmul.f32 -1.442695, %v2252_v1  ;;  %v4135_v47 = vpop.eup %4134 }
 0x49f   : > { %v2592_v56 = vpop.permute.xlu1 %2591  ;;  %v5780_v34 = vadd.f32 1.0, %v4135_v47 }
 0x4a0   : > { %4136 = vpow2.f32 %v3905_v25  ;;  %v2631_v57 = vmul.f32 %v2592_v56, %v2452_v33  ;;  %v2495_v56 = vand.u32 2147483648, %v5773_v27 }
 0x4a1   : > { %4138 = vrcp.f32 %v5773_v27  ;;  %vm2504_vm2 = vweird.f32 %v5780_v34 }
 0x4a2   : > { %2671 = vrot.lane.b32.xlu0 %v2631_v57, %s4269_s11  ;;  %4140 = vrcp.f32 %v5775_v5 }
 0x4a6   : > { %v4137_v39 = vpop.eup %4136 }
 0x4a7   : > { %v5782_v48 = vadd.f32 1.0, %v4137_v39  ;;  %v2660_v36 = vpop.permute.xlu1 %2659  ;;  %v5784_v60 = vpop.eup %4138  ;;  %v2493_v39 = vand.u32 2147483647, %v5773_v27 }
 0x4a8   : > { %v5793_v12 = vadd.f32 %v2660_v36, %v5375_v21  ;;  %v5799_v23 = vpop.eup %4140  ;;  %v2485_v58 = vmul.f32 %v5784_v60, %v5773_v27  ;;  %vm2490_vm5 = vweird.f32 %v5784_v60 }
 0x4a9   : > { %4142 = vrcp.f32 %v5782_v48  ;;  %v2470_v21 = vmul.f32 %v5799_v23, %v5775_v5  ;;  %vm2475_vm7 = vweird.f32 %v5799_v23  ;;  %vm5834_vm8 = vmor %vm2489_vm6, %vm2490_vm5  ;;  %vm2494_vm11 = vcmp.eq.f32.partialorder %v2493_v39, 8.507059e+37 }
 0x4aa   : > { %v2724_v45 = vpack.c.bf16 %v5790_v2, %v5793_v12  ;;  %2605 = vrot.lane.b32.xlu0 %v2074_v55, %s4267_s17  ;;  %4144 = vrcp.f32 %v5780_v34  ;;  %v2486_v54 = vsub.f32 1.0, %v2485_v58  ;;  %v2478_v55 = vand.u32 2147483647, %v5775_v5  ;;  %vm5847_vm10 = vmor %vm2474_vm9, %vm2475_vm7 }
 0x4ab   : > { %v2471_v29 = vsub.f32 1.0, %v2470_v21  ;;  %vm2519_vm15 = vweird.f32 %v5782_v48 }
 0x4ac   : > { %3917 = vmatmul.msk.bf16.gmra.mxu3 %vm595_vm0, %v2724_v45  ;;  %v2487_v53 = vmul.f32 %v5784_v60, %v2486_v54  ;;  %v2668_v45 = vpop.permute.xlu2 %2667  ;;  %vm2479_vm12 = vcmp.eq.f32.partialorder %v2478_v55, 8.507059e+37 }
 0x4ad   : > { %v2472_v7 = vmul.f32 %v5799_v23, %v2471_v29  ;;  %v2525_v29 = vand.u32 2147483648, %v5782_v48 }
 0x4ae   : > { %v2488_v25 = vadd.f32 %v5784_v60, %v2487_v53 }
 0x4af   : > { %v2200_v6 = vpop.permute.xlu1 %2199  ;;  %v5807_v15 = vpop.eup %4142  ;;  %v2473_v36 = vadd.f32 %v5799_v23, %v2472_v7  ;;  %v2510_v7 = vand.u32 2147483648, %v5780_v34 }
 0x4b0   : > { %v2233_v4 = vadd.f32 %v2200_v6, %v2153_v10  ;;  %v5809_v0 = vpop.eup %4144  ;;  %v2515_v31 = vmul.f32 %v5807_v15, %v5782_v48  ;;  %v2480_v10 = vand.u32 2147483648, %v5775_v5  ;;  %v2492_v27 = vsel %vm5834_vm8, %v5784_v60, %v2488_v25 }
 0x4b1   : > { %v2122_v37 = vpop.permute.xlu0 %2121  ;;  %v2500_v1 = vmul.f32 %v5809_v0, %v5780_v34  ;;  %v2496_v6 = vor.u32 1.1754944e-38, %v2495_v56  ;;  %v2477_v60 = vsel %vm5847_vm10, %v5799_v23, %v2473_v36  ;;  %vm2520_vm13 = vweird.f32 %v5807_v15 }
 0x4b2   : > { %v2154_v49 = vadd.f32 %v2122_v37, %v844_v32  ;;  %v2253_v24 = vadd.f32 %v5504_v46, %v2233_v4  ;;  %v2516_v18 = vsub.f32 1.0, %v2515_v31  ;;  %v2481_v5 = vor.u32 1.1754944e-38, %v2480_v10  ;;  %vm2521_vm1 = vmor %vm2519_vm15, %vm2520_vm13 }
 0x4b3   : > { %v2501_v57 = vsub.f32 1.0, %v2500_v1  ;;  %v2497_v37 = vsel %vm2494_vm11, %v2496_v6, %v2492_v27  ;;  %vm2505_vm14 = vweird.f32 %v5809_v0  ;;  %v2523_v23 = vand.u32 2147483647, %v5782_v48  ;;  %v4253_v6 = vld [vmem:[%s5326_s28 + $0x38] sm:$0xff] }
 0x4b4   : > { %v5815_v19 = vadd.f32 %v2202_v20, %v2154_v49  ;;  %v3906_v42 = vmul.f32 -1.442695, %v2253_v24  ;;  %v2517_v58 = vmul.f32 %v5807_v15, %v2516_v18  ;;  %v2482_v1 = vsel %vm2479_vm12, %v2481_v5, %v2477_v60  ;;  %vm2506_vm3 = vmor %vm2504_vm2, %vm2505_vm14 }
 0x4b5   : > { %v2502_v54 = vmul.f32 %v5809_v0, %v2501_v57  ;;  %v2526_v56 = vor.u32 1.1754944e-38, %v2525_v29  ;;  %vm2524_vm4 = vcmp.eq.f32.partialorder %v2523_v23, 8.507059e+37  ;;  %v2511_v39 = vor.u32 1.1754944e-38, %v2510_v7 }
 0x4b6   : > { %4146 = vpow2.f32 %v3906_v42  ;;  %v2518_v49 = vadd.f32 %v5807_v15, %v2517_v58 }
 0x4b7   : > { %v2666_v26 = vpop.permute.xlu1 %2665  ;;  %v2503_v53 = vadd.f32 %v5809_v0, %v2502_v54 }
 0x4b8   : > { %v5823_v33 = vadd.f32 %v2666_v26, %v5386_v51  ;;  %v2508_v26 = vand.u32 2147483647, %v5780_v34  ;;  %v2522_v25 = vsel %vm2521_vm1, %v5807_v15, %v2518_v49  ;;  %v4252_v15 = vld [vmem:[%s5326_s28 + $0x30] sm:$0xff] }
 0x4b9   : > { %v2664_v47 = vpop.permute.xlu0 %2663  ;;  %v2507_v48 = vsel %vm2506_vm3, %v5809_v0, %v2503_v53  ;;  %v5870_v10 = vadd.f32 %v4252_v15, %v2668_v45 }
 0x4ba   : > { %v5829_v35 = vadd.f32 %v4251_v61, %v2664_v47  ;;  %v2602_v47 = vpop.permute.xlu2 %2601  ;;  %v2527_v61 = vsel %vm2524_vm4, %v2526_v56, %v2522_v25  ;;  %vm2509_vm5 = vcmp.eq.f32.partialorder %v2508_v26, 8.507059e+37 }
 0x4bb   : > { %v2512_v55 = vsel %vm2509_vm5, %v2511_v39, %v2507_v48  ;;  %v2636_v27 = vmul.f32 %v2602_v47, %v2527_v61  ;;  %v4255_v47 = vld [vmem:[%s5326_s28 + $0x48] sm:$0xff]  ;;  %v4256_v39 = vld [vmem:[%s5326_s28 + $0x40] sm:$0xff] }
 0x4bc   : > { %v4147_v21 = vpop.eup %4146  ;;  %v2725_v32 = vpack.c.bf16 %v5823_v33, %v5829_v35 }
 0x4bd   : > { %v2317_v4 = vadd.f32 1.0, %v4147_v21 }
 0x4be   : > { %3918 = vmatmul.msk.bf16.gmra.mxu3 %vm595_vm0, %v2725_v32 }
 0x4bf   : > { %4148 = vrcp.f32 %v2317_v4  ;;  %v2598_v24 = vpop.permute.xlu1 %2597  ;;  %v2540_v32 = vand.u32 2147483648, %v2317_v4  ;;  %v2538_v20 = vand.u32 2147483647, %v2317_v4  ;;  %vm2534_vm7 = vweird.f32 %v2317_v4 }
 0x4c0   : > { %v2634_v31 = vmul.f32 %v2598_v24, %v2497_v37 }
 0x4c1   : > { %v2596_v42 = vpop.permute.xlu0 %2595  ;;  %v2541_v45 = vor.u32 1.1754944e-38, %v2540_v32  ;;  %vm2539_vm9 = vcmp.eq.f32.partialorder %v2538_v20, 8.507059e+37 }
 0x4c2   : > { %v2633_v18 = vmul.f32 %v2596_v42, %v2482_v1  ;;  %2677 = vrot.lane.b32.xlu2 %v2634_v31, %s4269_s11  ;;  %v2604_v5 = vpop.permute.xlu2 %2603  ;;  %v4254_v31 = vld [vmem:[%s6531_s9] sm:$0xf] }
 0x4c3   : > { %v3200_v53 = vperm.slane %v4254_v31, 3 }
 0x4c4   : > { %2675 = vrot.lane.b32.xlu1 %v2633_v18, %s4269_s11 }
 0x4c5   : > { %v4149_v57 = vpop.eup %4148 }
 0x4c6   : > { %v2530_v36 = vmul.f32 %v4149_v57, %v2317_v4  ;;  %vm2535_vm6 = vweird.f32 %v4149_v57 }
 0x4c7   : > { %v2600_v51 = vpop.permute.xlu1 %2599  ;;  %vm2536_vm8 = vmor %vm2534_vm7, %vm2535_vm6 }
 0x4c8   : > { %v2635_v34 = vmul.f32 %v2600_v51, %v2512_v55  ;;  %v2531_v58 = vsub.f32 1.0, %v2530_v36 }
 0x4c9   : > { %v2670_v21 = vpop.permute.xlu0 %2669 }
 0x4ca   : > { %v5873_v0 = vadd.f32 %v4253_v6, %v2670_v21  ;;  %2679 = vrot.lane.b32.xlu0 %v2635_v34, %s4269_s11  ;;  %v2532_v54 = vmul.f32 %v4149_v57, %v2531_v58 }
 0x4cc   : > { %v2726_v60 = vpack.c.bf16 %v5873_v0, %v5870_v10  ;;  %2681 = vrot.lane.b32.xlu1 %v2636_v27, %s4269_s11  ;;  %v2533_v37 = vadd.f32 %v4149_v57, %v2532_v54 }
 0x4ce   : > { %3919 = vmatmul.msk.bf16.gmra.mxu3 %vm595_vm0, %v2726_v60  ;;  %v2537_v49 = vsel %vm2536_vm8, %v4149_v57, %v2533_v37 }
 0x4cf   : > { %v2542_v24 = vsel %vm2539_vm9, %v2541_v45, %v2537_v49  ;;  %v2674_v48 = vpop.permute.xlu1 %2673  ;;  %v4257_v49 = vld [vmem:[%s5326_s28 + $0x58] sm:$0xff] }
 0x4d0   : > { %v2637_v29 = vmul.f32 %v2604_v5, %v2542_v24  ;;  %v4258_v24 = vld [vmem:[%s5326_s28 + $0x50] sm:$0xff] }
 0x4d2   : > { %2683 = vrot.lane.b32.xlu2 %v2637_v29, %s4269_s11 }
 0x4d4   : > { %3511 = vrot.lane.b32.xlu1 %v5748_v14, %s4268_s21  ;;  %v2254_v14 = vadd.f32 %v5504_v46, %v5815_v19 }
 0x4d6   : > { %v3907_v42 = vmul.f32 -1.442695, %v2254_v14 }
 0x4d7   : > { %v2776_v4 = vpop.f32.mrf.mxu3 }
 0x4d8   : > { %4150 = vpow2.f32 %v3907_v42 }
 0x4da   : > { %3202 = vrot.lane.b32.xlu2 %v3200_v53, %s4268_s21 }
 0x4dc   : > { %2832 = vrot.lane.b32.xlu1 %v2776_v4, %s4269_s11 }
 0x4de   : > { %v4151_v1 = vpop.eup %4150 }
 0x4df   : > { %v2778_v23 = vpop.f32.mrf.mxu3  ;;  %v2318_v7 = vadd.f32 1.0, %v4151_v1 }
 0x4e1   : > { %4152 = vrcp.f32 %v2318_v7  ;;  %v2555_v46 = vand.u32 2147483648, %v2318_v7  ;;  %vm2549_vm11 = vweird.f32 %v2318_v7  ;;  %v2553_v55 = vand.u32 2147483647, %v2318_v7 }
 0x4e2   : > { %3513 = vrot.lane.b32.xlu2 %v5793_v12, %s4268_s21  ;;  %v5894_v12 = vadd.f32 %v4255_v47, %v2674_v48 }
 0x4e3   : > { %v2556_v34 = vor.u32 1.1754944e-38, %v2555_v46  ;;  %vm2554_vm13 = vcmp.eq.f32.partialorder %v2553_v55, 8.507059e+37 }
 0x4e7   : > { %v4153_v18 = vpop.eup %4152 }
 0x4e8   : > { %v2545_v26 = vmul.f32 %v4153_v18, %v2318_v7  ;;  %vm2550_vm10 = vweird.f32 %v4153_v18 }
 0x4e9   : > { %vm2551_vm12 = vmor %vm2549_vm11, %vm2550_vm10 }
 0x4ea   : > { %2834 = vrot.lane.b32.xlu2 %v2778_v23, %s4269_s11  ;;  %v2546_v25 = vsub.f32 1.0, %v2545_v26 }
 0x4ec   : > { %v2547_v56 = vmul.f32 %v4153_v18, %v2546_v25 }
 0x4ee   : > { %v2548_v36 = vadd.f32 %v4153_v18, %v2547_v56 }
 0x4f0   : > { %v2552_v51 = vsel %vm2551_vm12, %v4153_v18, %v2548_v36 }
 0x4f1   : > { %v2557_v58 = vsel %vm2554_vm13, %v2556_v34, %v2552_v51 }
 0x514   : > { %v2672_v57 = vpop.permute.xlu0 %2671 }
 0x515   : > { %v5897_v61 = vadd.f32 %v4256_v39, %v2672_v57 }
 0x517   : > { %v2727_v19 = vpack.c.bf16 %v5894_v12, %v5897_v61 }
 0x519   : > { %3920 = vmatmul.msk.bf16.gmra.mxu3 %vm595_vm0, %v2727_v19 }
 0x51c   : > { %v2606_v15 = vpop.permute.xlu0 %2605  ;;  %v2678_v21 = vpop.permute.xlu2 %2677 }
 0x51d   : > { %v2638_v27 = vmul.f32 %v2606_v15, %v2557_v58  ;;  %v5913_v5 = vadd.f32 %v4257_v49, %v2678_v21 }
 0x51f   : > { %2685 = vrot.lane.b32.xlu0 %v2638_v27, %s4269_s11 }
 0x527   : > { %3509 = vrot.lane.b32.xlu0 %v5745_v50, %s4268_s21 }
 0x52c   : > { %v2684_v32 = vpop.permute.xlu2 %2683 }
 0x52d   : > { %v5953_v15 = vadd.f32 %v2684_v32, %v5567_v41 }
 0x52f   : > { %v2781_v6 = vpop.f32.mrf.mxu3  ;;  %3515 = vrot.lane.b32.xlu0 %v5790_v2, %s4268_s21  ;;  %6628 = vst [vmem:[#allocation3_spill] sm:$0xff] %v5953_v15 }
 0x534   : > { %v5907_v54 = vpop.permute.xlu2 %3202 }
 0x535   : > { %v3207_v20 = vadd.f32 %v5907_v54, %v2781_v6  ;;  %v3206_v60 = vadd.f32 %v5907_v54, %v2778_v23  ;;  %v3205_v37 = vadd.f32 %v5907_v54, %v2776_v4 }
 0x536   : > { %v2676_v45 = vpop.permute.xlu1 %2675 }
 0x537   : > { %v5916_v29 = vadd.f32 %v4258_v24, %v2676_v45  ;;  %v2783_v50 = vpop.f32.mrf.mxu3  ;;  %3241 = vrot.lane.b32.xlu2 %v3207_v20, %s4267_s17  ;;  %3239 = vrot.lane.b32.xlu1 %v3206_v60, %s4267_s17 }
 0x538   : > { %3237 = vrot.lane.b32.xlu0 %v3205_v37, %s4267_s17  ;;  %v3208_v1 = vadd.f32 %v5907_v54, %v2783_v50 }
 0x539   : > { %v2728_v2 = vpack.c.bf16 %v5913_v5, %v5916_v29 }
 0x53b   : > { %3921 = vmatmul.msk.bf16.gmra.mxu3 %vm595_vm0, %v2728_v2 }
 0x53c   : > { %v2680_v53 = vpop.permute.xlu0 %2679 }
 0x53d   : > { %v5928_v23 = vadd.f32 %v2680_v53, %v5551_v28 }
 0x53e   : > { %v2682_v4 = vpop.permute.xlu1 %2681 }
 0x53f   : > { %2838 = vrot.lane.b32.xlu1 %v2783_v50, %s4269_s11  ;;  %v5931_v14 = vadd.f32 %v2682_v4, %v5554_v44 }
 0x540   : > { %2836 = vrot.lane.b32.xlu0 %v2781_v6, %s4269_s11 }
 0x541   : > { %v2786_v31 = vpop.f32.mrf.mxu3  ;;  %v2729_v7 = vpack.c.bf16 %v5931_v14, %v5928_v23 }
 0x542   : > { %2840 = vrot.lane.b32.xlu2 %v2786_v31, %s4269_s11  ;;  %v3209_v42 = vadd.f32 %v5907_v54, %v2786_v31 }
 0x546   : > { %v5948_v48 = vpop.permute.xlu1 %3511 }
 0x547   : > { %3245 = vrot.lane.b32.xlu1 %v3209_v42, %s4267_s17  ;;  %6627 = vst [vmem:[#allocation2_spill] sm:$0xff] %v5948_v48 }
 0x548   : > { %3243 = vrot.lane.b32.xlu0 %v3208_v1, %s4267_s17 }
 0x549   : > { %v2788_v18 = vpop.f32.mrf.mxu3 }
 0x54a   : > { %v3210_v26 = vadd.f32 %v5907_v54, %v2788_v18 }
 0x54b   : > { %3922 = vmatmul.msk.bf16.gmra.mxu3 %vm595_vm0, %v2729_v7 }
 0x54c   : > { %3247 = vrot.lane.b32.xlu2 %v3210_v26, %s4267_s17 }
 0x54e   : > { %v2833_v57 = vpop.permute.xlu1 %2832 }
 0x54f   : > { %v2880_v47 = vadd.f32 %v2833_v57, %v5421_v59 }
 0x550   : > { %2842 = vrot.lane.b32.xlu0 %v2788_v18, %s4269_s11 }
 0x551   : > { %v2791_v28 = vpop.f32.mrf.mxu3  ;;  %v3924_v39 = vmul.f32 -1.442695, %v2880_v47 }
 0x552   : > { %2844 = vrot.lane.b32.xlu1 %v2791_v28, %s4269_s11  ;;  %v3211_v44 = vadd.f32 %v5907_v54, %v2791_v28 }
 0x553   : > { %4154 = vpow2.f32 %v3924_v39 }
 0x558   : > { %3249 = vrot.lane.b32.xlu0 %v3211_v44, %s4267_s17 }
 0x559   : > { %v2793_v25 = vpop.f32.mrf.mxu3  ;;  %v4155_v36 = vpop.eup %4154 }
 0x55a   : > { %v3212_v56 = vadd.f32 %v5907_v54, %v2793_v25  ;;  %2846 = vrot.lane.b32.xlu2 %v2793_v25, %s4269_s11  ;;  %v2944_v46 = vadd.f32 1.0, %v4155_v36 }
 0x55c   : > { %3251 = vrot.lane.b32.xlu1 %v3212_v56, %s4267_s17  ;;  %4156 = vrcp.f32 %v2944_v46  ;;  %v2971_v6 = vand.u32 2147483648, %v2944_v46  ;;  %vm2965_vm15 = vweird.f32 %v2944_v46  ;;  %v2969_v60 = vand.u32 2147483647, %v2944_v46 }
 0x55e   : > { %v2972_v45 = vor.u32 1.1754944e-38, %v2971_v6  ;;  %vm2970_vm2 = vcmp.eq.f32.partialorder %v2969_v60, 8.507059e+37 }
 0x562   : > { %v4157_v19 = vpop.eup %4156 }
 0x563   : > { %v2961_v55 = vmul.f32 %v4157_v19, %v2944_v46  ;;  %vm2966_vm14 = vweird.f32 %v4157_v19 }
 0x564   : > { %vm2967_vm1 = vmor %vm2965_vm15, %vm2966_vm14 }
 0x565   : > { %v2962_v51 = vsub.f32 1.0, %v2961_v55 }
 0x567   : > { %v2963_v34 = vmul.f32 %v4157_v19, %v2962_v51 }
 0x569   : > { %v2964_v21 = vadd.f32 %v4157_v19, %v2963_v34 }
 0x56b   : > { %v2968_v37 = vsel %vm2967_vm1, %v4157_v19, %v2964_v21 }
 0x56c   : > { %v5961_v41 = vsel %vm2970_vm2, %v2972_v45, %v2968_v37  ;;  %v5992_v37 = vpop.permute.xlu2 %3513 }
 0x56d   : > { %6631 = vst [vmem:[#allocation7_spill] sm:$0xff] %v5992_v37 }
 0x591   : > { %v2686_v58 = vpop.permute.xlu0 %2685 }
 0x592   : > { %v5956_v27 = vadd.f32 %v2686_v58, %v5570_v9 }
 0x594   : > { %v2730_v20 = vpack.c.bf16 %v5956_v27, %v5953_v15 }
 0x596   : > { %3923 = vmatmul.msk.bf16.gmra.mxu3 %vm595_vm0, %v2730_v20 }
 0x599   : > { %v3510_v49 = vpop.permute.xlu0 %3509 }
 0x59a   : > { %v5964_v9 = vmul.f32 %v3510_v49, %v5961_v41  ;;  %v2835_v49 = vpop.permute.xlu2 %2834 }
 0x59c   : > { %6629 = vst [vmem:[#allocation6_spill] sm:$0xff] %v5964_v9  ;;  %v2796_v32 = vpop.f32.mrf.mxu3 }
 0x59d   : > { %v3213_v24 = vadd.f32 %v5907_v54, %v2796_v32  ;;  %2848 = vrot.lane.b32.xlu0 %v2796_v32, %s4269_s11 }
 0x59f   : > { %3253 = vrot.lane.b32.xlu2 %v3213_v24, %s4267_s17 }
 0x5a1   : > { %v3516_v21 = vpop.permute.xlu0 %3515 }
 0x5a2   : > { %v5996_v24 = vpop.permute.xlu2 %3241 }
 0x5a4   : > { %v2798_v50 = vpop.f32.mrf.mxu3 }
 0x5a5   : > { %v3214_v2 = vadd.f32 %v5907_v54, %v2798_v50  ;;  %2850 = vrot.lane.b32.xlu1 %v2798_v50, %s4269_s11 }
 0x5a7   : > { %3255 = vrot.lane.b32.xlu0 %v3214_v2, %s4267_s17 }
 0x5a9   : > { %v5972_v31 = vpop.permute.xlu1 %3239 }
 0x5aa   : > { %v5994_v45 = vpop.permute.xlu0 %3237  ;;  %v2841_v2 = vpop.permute.xlu2 %2840 }
 0x5b1   : > { %v2839_v53 = vpop.permute.xlu1 %2838 }
 0x5b2   : > { %v2883_v4 = vadd.f32 %v2839_v53, %v5431_v3  ;;  %v2837_v32 = vpop.permute.xlu0 %2836  ;;  %v2881_v53 = vadd.f32 %v2835_v49, %v5370_v11 }
 0x5b4   : > { %v3927_v42 = vmul.f32 -1.442695, %v2883_v4  ;;  %v6001_v4 = vpop.permute.xlu2 %3247 }
 0x5b6   : > { %4158 = vpow2.f32 %v3927_v42  ;;  %v2884_v42 = vadd.f32 %v2841_v2, %v5446_v30 }
 0x5ba   : > { %v5998_v50 = vpop.permute.xlu0 %3243 }
 0x5bc   : > { %v4159_v1 = vpop.eup %4158 }
 0x5bd   : > { %v2947_v7 = vadd.f32 1.0, %v4159_v1 }
 0x5be   : > { %v2801_v18 = vpop.f32.mrf.mxu3 }
 0x5bf   : > { %4160 = vrcp.f32 %v2947_v7  ;;  %2852 = vrot.lane.b32.xlu2 %v2801_v18, %s4269_s11  ;;  %v3215_v26 = vadd.f32 %v5907_v54, %v2801_v18  ;;  %v3016_v39 = vand.u32 2147483648, %v2947_v7  ;;  %vm3010_vm4 = vweird.f32 %v2947_v7 }
 0x5c0   : > { %v3014_v46 = vand.u32 2147483647, %v2947_v7  ;;  %v3925_v18 = vmul.f32 -1.442695, %v2881_v53 }
 0x5c1   : > { %3257 = vrot.lane.b32.xlu1 %v3215_v26, %s4267_s17  ;;  %v3017_v51 = vor.u32 1.1754944e-38, %v3016_v39  ;;  %v3928_v26 = vmul.f32 -1.442695, %v2884_v42 }
 0x5c2   : > { %vm3015_vm6 = vcmp.eq.f32.partialorder %v3014_v46, 8.507059e+37  ;;  %v2843_v1 = vpop.permute.xlu0 %2842  ;;  %4162 = vpow2.f32 %v3925_v18 }
 0x5c3   : > { %4164 = vpow2.f32 %v3928_v26  ;;  %v2885_v46 = vadd.f32 %v2843_v1, %v5402_v38 }
 0x5c5   : > { %v4161_v28 = vpop.eup %4160 }
 0x5c6   : > { %v3006_v44 = vmul.f32 %v4161_v28, %v2947_v7  ;;  %v2803_v25 = vpop.f32.mrf.mxu3  ;;  %vm3011_vm3 = vweird.f32 %v4161_v28  ;;  %v6004_v7 = vpop.permute.xlu1 %3245 }
 0x5c7   : > { %v3216_v56 = vadd.f32 %v5907_v54, %v2803_v25  ;;  %2854 = vrot.lane.b32.xlu0 %v2803_v25, %s4269_s11  ;;  %vm3012_vm5 = vmor %vm3010_vm4, %vm3011_vm3 }
 0x5c8   : > { %v3007_v57 = vsub.f32 1.0, %v3006_v44  ;;  %v2847_v44 = vpop.permute.xlu2 %2846 }
 0x5c9   : > { %3259 = vrot.lane.b32.xlu2 %v3216_v56, %s4267_s17 }
 0x5ca   : > { %v3008_v47 = vmul.f32 %v4161_v28, %v3007_v57  ;;  %v6007_v56 = vpop.permute.xlu0 %3249 }
 0x5cc   : > { %v3009_v36 = vadd.f32 %v4161_v28, %v3008_v47  ;;  %v4163_v47 = vpop.eup %4162 }
 0x5cd   : > { %v4165_v39 = vpop.eup %4164 }
 0x5ce   : > { %v3013_v19 = vsel %vm3012_vm5, %v4161_v28, %v3009_v36  ;;  %v2806_v55 = vpop.f32.mrf.mxu3  ;;  %v2882_v28 = vadd.f32 %v2837_v32, %v5409_v63  ;;  %v2845_v57 = vpop.permute.xlu1 %2844  ;;  %v2887_v36 = vadd.f32 %v2847_v44, %v5440_v43 }
 0x5cf   : > { %v3217_v34 = vadd.f32 %v5907_v54, %v2806_v55  ;;  %2856 = vrot.lane.b32.xlu1 %v2806_v55, %s4269_s11  ;;  %v5983_v58 = vsel %vm3015_vm6, %v3017_v51, %v3013_v19  ;;  %v6013_v55 = vadd.f32 1.0, %v4163_v47  ;;  %v6015_v51 = vadd.f32 1.0, %v4165_v39 }
 0x5d0   : > { %v5987_v6 = vmul.f32 %v3516_v21, %v5983_v58  ;;  %v3926_v25 = vmul.f32 -1.442695, %v2882_v28  ;;  %v2886_v32 = vadd.f32 %v2845_v57, %v5469_v52 }
 0x5d1   : > { %3261 = vrot.lane.b32.xlu0 %v3217_v34, %s4267_s17  ;;  %v3931_v34 = vmul.f32 -1.442695, %v2887_v36  ;;  %vm2980_vm8 = vweird.f32 %v6013_v55  ;;  %vm3025_vm11 = vweird.f32 %v6015_v51 }
 0x5d2   : > { %6630 = vst [vmem:[#allocation5_spill] sm:$0xff] %v5987_v6  ;;  %4166 = vpow2.f32 %v3926_v25  ;;  %v3930_v26 = vmul.f32 -1.442695, %v2886_v32 }
 0x5d3   : > { %4168 = vrcp.f32 %v6013_v55 }
 0x5d4   : > { %4170 = vrcp.f32 %v6015_v51 }
 0x5d5   : > { %4172 = vpow2.f32 %v3931_v34 }
 0x5d6   : > { %v2808_v20 = vpop.f32.mrf.mxu3 }
 0x5d7   : > { %v3218_v60 = vadd.f32 %v5907_v54, %v2808_v20  ;;  %2858 = vrot.lane.b32.xlu2 %v2808_v20, %s4269_s11  ;;  %v3929_v20 = vmul.f32 -1.442695, %v2885_v46 }
 0x5d8   : > { %v4167_v49 = vpop.eup %4166 }
 0x5d9   : > { %3263 = vrot.lane.b32.xlu1 %v3218_v60, %s4267_s17  ;;  %v6017_v60 = vpop.permute.xlu1 %3251  ;;  %v6025_v1 = vadd.f32 1.0, %v4167_v49  ;;  %4174 = vpow2.f32 %v3929_v20  ;;  %v6028_v44 = vpop.eup %4168 }
 0x5da   : > { %v6031_v57 = vpop.eup %4170  ;;  %v2976_v34 = vmul.f32 %v6028_v44, %v6013_v55  ;;  %vm2981_vm7 = vweird.f32 %v6028_v44 }
 0x5db   : > { %4176 = vrcp.f32 %v6025_v1  ;;  %v4173_v39 = vpop.eup %4172  ;;  %v3021_v32 = vmul.f32 %v6031_v57, %v6015_v51  ;;  %vm3026_vm9 = vweird.f32 %v6031_v57  ;;  %vm6089_vm10 = vmor %vm2980_vm8, %vm2981_vm7  ;;  %vm2995_vm1 = vweird.f32 %v6025_v1 }
 0x5dc   : > { %4178 = vpow2.f32 %v3930_v26  ;;  %v6040_v49 = vadd.f32 1.0, %v4173_v39  ;;  %vm6104_vm12 = vmor %vm3025_vm11, %vm3026_vm9 }
 0x5de   : > { %vm3070_vm2 = vweird.f32 %v6040_v49 }
 0x5df   : > { %v4175_v36 = vpop.eup %4174 }
 0x5f9   : > { %v6011_v19 = vpop.permute.xlu2 %3253 }
 0x60f   : > { %v2849_v21 = vpop.permute.xlu0 %2848 }
 0x610   : > { %v2888_v2 = vadd.f32 %v2849_v21, %v5475_v17 }
 0x612   : > { %v3932_v28 = vmul.f32 -1.442695, %v2888_v2  ;;  %v6044_v2 = vadd.f32 1.0, %v4175_v36 }
 0x614   : > { %4180 = vpow2.f32 %v3932_v28  ;;  %vm3040_vm9 = vweird.f32 %v6044_v2 }
 0x617   : > { %v2851_v47 = vpop.permute.xlu1 %2850 }
 0x618   : > { %v2889_v20 = vadd.f32 %v2851_v47, %v5456_v62 }
 0x619   : > { %v2811_v53 = vpop.f32.mrf.mxu3  ;;  %v2853_v18 = vpop.permute.xlu2 %2852 }
 0x61a   : > { %v3219_v42 = vadd.f32 %v5907_v54, %v2811_v53  ;;  %2860 = vrot.lane.b32.xlu0 %v2811_v53, %s4269_s11  ;;  %v2890_v25 = vadd.f32 %v2853_v18, %v5496_v13  ;;  %v6048_v53 = vpop.eup %4176  ;;  %v2977_v18 = vsub.f32 1.0, %v2976_v34  ;;  %v3933_v26 = vmul.f32 -1.442695, %v2889_v20  ;;  %v6086_v48 = vpop.permute.xlu0 %3255 }
 0x61b   : > { %vm2996_vm15 = vweird.f32 %v6048_v53 }
 0x61c   : > { %3265 = vrot.lane.b32.xlu2 %v3219_v42, %s4267_s17  ;;  %v3934_v21 = vmul.f32 -1.442695, %v2890_v25  ;;  %v4179_v42 = vpop.eup %4178  ;;  %v2978_v39 = vmul.f32 %v6028_v44, %v2977_v18  ;;  %vm6153_vm3 = vmor %vm2995_vm1, %vm2996_vm15 }
 0x61d   : > { %v4181_v28 = vpop.eup %4180  ;;  %v6054_v47 = vadd.f32 1.0, %v4179_v42 }
 0x61e   : > { %4182 = vpow2.f32 %v3934_v21  ;;  %v6059_v36 = vadd.f32 1.0, %v4181_v28  ;;  %v2979_v18 = vadd.f32 %v6028_v44, %v2978_v39  ;;  %v2984_v28 = vand.u32 2147483647, %v6013_v55 }
 0x61f   : > { %4184 = vrcp.f32 %v6040_v49  ;;  %vm3055_vm11 = vweird.f32 %v6054_v47 }
 0x620   : > { %4186 = vrcp.f32 %v6044_v2  ;;  %v2983_v6 = vsel %vm6089_vm10, %v6028_v44, %v2979_v18  ;;  %vm2985_vm13 = vcmp.eq.f32.partialorder %v2984_v28, 8.507059e+37  ;;  %vm3085_vm1 = vweird.f32 %v6059_v36 }
 0x621   : > { %v2813_v46 = vpop.f32.mrf.mxu3  ;;  %4188 = vpow2.f32 %v3933_v26 }
 0x622   : > { %3521 = vrot.lane.b32.xlu0 %v5870_v10, %s4268_s21  ;;  %2862 = vrot.lane.b32.xlu1 %v2813_v46, %s4269_s11  ;;  %v3022_v10 = vsub.f32 1.0, %v3021_v32  ;;  %v2986_v32 = vand.u32 2147483648, %v6013_v55  ;;  %4190 = vrcp.f32 %v6054_v47 }
 0x623   : > { %v6052_v25 = vpop.permute.xlu2 %3259  ;;  %4192 = vrcp.f32 %v6059_v36 }
 0x624   : > { %3519 = vrot.lane.b32.xlu2 %v5823_v33, %s4268_s21  ;;  %v2991_v33 = vmul.f32 %v6048_v53, %v6025_v1  ;;  %v3023_v34 = vmul.f32 %v6031_v57, %v3022_v10  ;;  %v4183_v21 = vpop.eup %4182  ;;  %v3031_v10 = vand.u32 2147483648, %v6015_v51  ;;  %v2987_v9 = vor.u32 1.1754944e-38, %v2986_v32 }
 0x625   : > { %v6068_v20 = vpop.eup %4184 }
 0x626   : > { %v6072_v42 = vpop.eup %4186  ;;  %v3066_v39 = vmul.f32 %v6068_v20, %v6040_v49  ;;  %v3032_v18 = vor.u32 1.1754944e-38, %v3031_v10  ;;  %vm3071_vm5 = vweird.f32 %v6068_v20 }
 0x627   : > { %v4189_v26 = vpop.eup %4188  ;;  %v3036_v55 = vmul.f32 %v6072_v42, %v6044_v2  ;;  %vm3041_vm6 = vweird.f32 %v6072_v42  ;;  %vm6189_vm8 = vmor %vm3070_vm2, %vm3071_vm5 }
 0x628   : > { %v6117_v37 = vadd.f32 1.0, %v4189_v26  ;;  %vm6204_vm10 = vmor %vm3040_vm9, %vm3041_vm6 }
 0x62a   : > { %3527 = vrot.lane.b32.xlu0 %v5894_v12, %s4268_s21  ;;  %3517 = vrot.lane.b32.xlu1 %v5829_v35, %s4268_s21  ;;  %v2992_v12 = vsub.f32 1.0, %v2991_v33  ;;  %v3024_v35 = vadd.f32 %v6031_v57, %v3023_v34  ;;  %v3220_v33 = vadd.f32 %v5907_v54, %v2813_v46  ;;  %v3029_v34 = vand.u32 2147483647, %v6015_v51  ;;  %v6111_v51 = vpop.eup %4190 }
 0x62b   : > { %v6119_v32 = vpop.eup %4192  ;;  %v3051_v26 = vmul.f32 %v6111_v51, %v6054_v47  ;;  %vm3100_vm9 = vweird.f32 %v6117_v37 }
 0x62c   : > { %3525 = vrot.lane.b32.xlu2 %v5897_v61, %s4268_s21  ;;  %v6080_v61 = vadd.f32 1.0, %v4183_v21  ;;  %v2993_v54 = vmul.f32 %v6048_v53, %v2992_v12  ;;  %v3067_v12 = vsub.f32 1.0, %v3066_v39  ;;  %vm3030_vm14 = vcmp.eq.f32.partialorder %v3029_v34, 8.507059e+37 }
 0x62d   : > { %v3081_v28 = vmul.f32 %v6119_v32, %v6059_v36 }
 0x62e   : > { %4194 = vrcp.f32 %v6080_v61  ;;  %v3068_v10 = vmul.f32 %v6068_v20, %v3067_v12  ;;  %vm3115_vm5 = vweird.f32 %v6080_v61 }
 0x62f   : > { %v3082_v12 = vsub.f32 1.0, %v3081_v28  ;;  %v3046_v28 = vand.u32 2147483648, %v6044_v2 }
 0x631   : > { %v2859_v15 = vpop.permute.xlu2 %2858 }
 0x632   : > { %v2893_v21 = vadd.f32 %v2859_v15, %v5607_v22  ;;  %3523 = vrot.lane.b32.xlu1 %v5873_v0, %s4268_s21  ;;  %3267 = vrot.lane.b32.xlu0 %v3220_v33, %s4267_s17  ;;  %v3028_v15 = vsel %vm6104_vm12, %v6031_v57, %v3024_v35  ;;  %v6123_v0 = vsel %vm2985_vm13, %v2987_v9, %v2983_v6  ;;  %v3037_v33 = vsub.f32 1.0, %v3036_v55 }
 0x633   : > { %6636 = vst [vmem:[#allocation8_spill] sm:$0xff] %v6123_v0  ;;  %v6125_v46 = vsel %vm3030_vm14, %v3032_v18, %v3028_v15  ;;  %v2994_v57 = vadd.f32 %v6048_v53, %v2993_v54  ;;  %v2999_v35 = vand.u32 2147483647, %v6025_v1  ;;  %v3285_v9 = vmul.f32 %v5994_v45, %v5961_v41  ;;  %v6141_v39 = vpop.permute.xlu1 %3257 }
 0x634   : > { %v3937_v44 = vmul.f32 -1.442695, %v2893_v21  ;;  %3531 = vrot.lane.b32.xlu2 %v5913_v5, %s4268_s21  ;;  %6637 = vst [vmem:[#allocation9_spill] sm:$0xff] %v6125_v46  ;;  %v3001_v5 = vand.u32 2147483648, %v6025_v1  ;;  %v3286_v6 = vmul.f32 %v5972_v31, %v6123_v0  ;;  %v6144_v55 = vpop.eup %4194  ;;  %v3289_v21 = vmul.f32 %v6004_v7, %v6125_v46 }
 0x635   : > { %v3038_v54 = vmul.f32 %v6072_v42, %v3037_v33  ;;  %v3074_v15 = vand.u32 2147483647, %v6040_v49  ;;  %v3076_v1 = vand.u32 2147483648, %v6040_v49  ;;  %v2998_v7 = vsel %vm6153_vm3, %v6048_v53, %v2994_v57 }
 0x636   : > { %4196 = vpow2.f32 %v3937_v44  ;;  %vm3000_vm4 = vcmp.eq.f32.partialorder %v2999_v35, 8.507059e+37  ;;  %v3052_v18 = vsub.f32 1.0, %v3051_v26  ;;  %v3069_v46 = vadd.f32 %v6068_v20, %v3068_v10 }
 0x637   : > { %4198 = vrcp.f32 %v6117_v37  ;;  %v3039_v57 = vadd.f32 %v6072_v42, %v3038_v54  ;;  %vm6179_vm7 = vcmp.eq.f32.partialorder %v3074_v15, 8.507059e+37  ;;  %v3044_v26 = vand.u32 2147483647, %v6044_v2 }
 0x638   : > { %v3077_v10 = vor.u32 1.1754944e-38, %v3076_v1  ;;  %v3083_v54 = vmul.f32 %v6119_v32, %v3082_v12  ;;  %v3059_v2 = vand.u32 2147483647, %v6054_v47  ;;  %vm3056_vm12 = vweird.f32 %v6111_v51 }
 0x639   : > { %v2855_v34 = vpop.permute.xlu0 %2854  ;;  %vm3045_vm13 = vcmp.eq.f32.partialorder %v3044_v26, 8.507059e+37  ;;  %vm3086_vm14 = vweird.f32 %v6119_v32  ;;  %vm6233_vm15 = vmor %vm3055_vm11, %vm3056_vm12  ;;  %vm3116_vm3 = vweird.f32 %v6144_v55 }
 0x63a   : > { %v2891_v45 = vadd.f32 %v2855_v34, %v5485_v40  ;;  %3529 = vrot.lane.b32.xlu1 %v5916_v29, %s4268_s21  ;;  %3533 = vrot.lane.b32.xlu0 %v5928_v23, %s4268_s21  ;;  %v3002_v34 = vor.u32 1.1754944e-38, %v3001_v5  ;;  %v3111_v29 = vmul.f32 %v6144_v55, %v6080_v61  ;;  %v3053_v5 = vmul.f32 %v6111_v51, %v3052_v18  ;;  %vm6250_vm2 = vmor %vm3085_vm1, %vm3086_vm14 }
 0x63c   : > { %v4197_v44 = vpop.eup %4196  ;;  %v3935_v33 = vmul.f32 -1.442695, %v2891_v45  ;;  %3319 = vrot.lane.b32.xlu2 %v3286_v6, %s4268_s21  ;;  %v6175_v53 = vsel %vm3000_vm4, %v3002_v34, %v2998_v7  ;;  %v3073_v45 = vsel %vm6189_vm8, %v6068_v20, %v3069_v46  ;;  %v3112_v15 = vsub.f32 1.0, %v3111_v29  ;;  %vm6276_vm8 = vmor %vm3115_vm5, %vm3116_vm3 }
 0x63d   : > { %v6168_v0 = vadd.f32 1.0, %v4197_v44  ;;  %v6173_v23 = vpop.eup %4198  ;;  %v3287_v49 = vmul.f32 %v5996_v24, %v6175_v53  ;;  %v3043_v46 = vsel %vm6204_vm10, %v6072_v42, %v3039_v57  ;;  %v3061_v24 = vand.u32 2147483648, %v6054_v47 }
 0x63e   : > { %4200 = vpow2.f32 %v3935_v33  ;;  %v3096_v31 = vmul.f32 %v6173_v23, %v6117_v37  ;;  %v3047_v44 = vor.u32 1.1754944e-38, %v3046_v28  ;;  %v3054_v12 = vadd.f32 %v6111_v51, %v3053_v5 }
 0x63f   : > { %4202 = vrcp.f32 %v6168_v0  ;;  %v3084_v34 = vadd.f32 %v6119_v32, %v3083_v54  ;;  %v3113_v57 = vmul.f32 %v6144_v55, %v3112_v15  ;;  %v3091_v5 = vand.u32 2147483648, %v6059_v36 }
 0x640   : > { %v3097_v42 = vsub.f32 1.0, %v3096_v31  ;;  %v6245_v54 = vsel %vm6179_vm7, %v3077_v10, %v3073_v45  ;;  %v3089_v31 = vand.u32 2147483647, %v6059_v36  ;;  %v3058_v15 = vsel %vm6233_vm15, %v6111_v51, %v3054_v12 }
 0x641   : > { %v2857_v7 = vpop.permute.xlu1 %2856  ;;  %v3088_v35 = vsel %vm6250_vm2, %v6119_v32, %v3084_v34  ;;  %v3114_v45 = vadd.f32 %v6144_v55, %v3113_v57  ;;  %vm3060_vm4 = vcmp.eq.f32.partialorder %v3059_v2, 8.507059e+37  ;;  %v3292_v36 = vmul.f32 %v6017_v60, %v6245_v54 }
 0x642   : > { %v2892_v20 = vadd.f32 %v2857_v7, %v5546_v8  ;;  %3321 = vrot.lane.b32.xlu0 %v3287_v49, %s4268_s21  ;;  %3317 = vrot.lane.b32.xlu1 %v3285_v9, %s4268_s21  ;;  %v6227_v9 = vsel %vm3045_vm13, %v3047_v44, %v3043_v46  ;;  %v3062_v7 = vor.u32 1.1754944e-38, %v3061_v24  ;;  %v3098_v10 = vmul.f32 %v6173_v23, %v3097_v42 }
 0x643   : > { %v3121_v51 = vand.u32 2147483648, %v6080_v61  ;;  %v3092_v1 = vor.u32 1.1754944e-38, %v3091_v5  ;;  %vm3090_vm6 = vcmp.eq.f32.partialorder %v3089_v31, 8.507059e+37  ;;  %vm3101_vm7 = vweird.f32 %v6173_v23 }
 0x644   : > { %v4201_v18 = vpop.eup %4200  ;;  %v3936_v33 = vmul.f32 -1.442695, %v2892_v20  ;;  %3325 = vrot.lane.b32.xlu2 %v3289_v21, %s4268_s21  ;;  %v3288_v21 = vmul.f32 %v5998_v50, %v5983_v58  ;;  %v3290_v50 = vmul.f32 %v6001_v4, %v6227_v9  ;;  %v6269_v20 = vsel %vm3060_vm4, %v3062_v7, %v3058_v15  ;;  %vm6298_vm11 = vmor %vm3100_vm9, %vm3101_vm7 }
 0x645   : > { %v6221_v29 = vpop.eup %4202  ;;  %v6224_v6 = vadd.f32 1.0, %v4201_v18  ;;  %v3119_v4 = vand.u32 2147483647, %v6080_v61  ;;  %v6280_v60 = vsel %vm3090_vm6, %v3092_v1, %v3088_v35  ;;  %v3099_v24 = vadd.f32 %v6173_v23, %v3098_v10 }
 0x646   : > { %4204 = vpow2.f32 %v3936_v33  ;;  %v3156_v28 = vmul.f32 %v6221_v29, %v6168_v0  ;;  %v3118_v61 = vsel %vm6276_vm8, %v6144_v55, %v3114_v45  ;;  %v3291_v12 = vmul.f32 %v6007_v56, %v6269_v20 }
 0x647   : > { %4206 = vrcp.f32 %v6224_v6  ;;  %v3122_v33 = vor.u32 1.1754944e-38, %v3121_v51  ;;  %v3106_v42 = vand.u32 2147483648, %v6117_v37  ;;  %vm3120_vm10 = vcmp.eq.f32.partialorder %v3119_v4, 8.507059e+37 }
 0x648   : > { %v3157_v49 = vsub.f32 1.0, %v3156_v28  ;;  %v3104_v57 = vand.u32 2147483647, %v6117_v37  ;;  %v3293_v28 = vmul.f32 %v6011_v19, %v6280_v60  ;;  %v3103_v5 = vsel %vm6298_vm11, %v6173_v23, %v3099_v24 }
 0x649   : > { %v6303_v26 = vsel %vm3120_vm10, %v3122_v33, %v3118_v61  ;;  %vm3161_vm12 = vweird.f32 %v6221_v29  ;;  %v3136_v47 = vand.u32 2147483648, %v6224_v6  ;;  %v3166_v15 = vand.u32 2147483648, %v6168_v0 }
 0x64a   : > { %3327 = vrot.lane.b32.xlu0 %v3290_v50, %s4268_s21  ;;  %3323 = vrot.lane.b32.xlu1 %v3288_v21, %s4268_s21  ;;  %v3158_v18 = vmul.f32 %v6221_v29, %v3157_v49  ;;  %v3134_v37 = vand.u32 2147483647, %v6224_v6  ;;  %v3107_v7 = vor.u32 1.1754944e-38, %v3106_v42  ;;  %v3295_v19 = vmul.f32 %v6141_v39, %v6303_v26 }
 0x64b   : > { %vm3160_vm14 = vweird.f32 %v6168_v0  ;;  %v3164_v23 = vand.u32 2147483647, %v6168_v0  ;;  %vm3105_vm15 = vcmp.eq.f32.partialorder %v3104_v57, 8.507059e+37  ;;  %vm3130_vm2 = vweird.f32 %v6224_v6 }
 0x64c   : > { %v4205_v32 = vpop.eup %4204  ;;  %3331 = vrot.lane.b32.xlu2 %v3292_v36, %s4268_s21  ;;  %v3159_v21 = vadd.f32 %v6221_v29, %v3158_v18  ;;  %vm6321_vm1 = vmor %vm3160_vm14, %vm3161_vm12  ;;  %v6326_v45 = vsel %vm3105_vm15, %v3107_v7, %v3103_v5  ;;  %v3137_v0 = vor.u32 1.1754944e-38, %v3136_v47  ;;  %v3167_v36 = vor.u32 1.1754944e-38, %v3166_v15 }
 0x64d   : > { %v4207_v46 = vpop.eup %4206  ;;  %v6286_v44 = vadd.f32 1.0, %v4205_v32  ;;  %vm3135_vm4 = vcmp.eq.f32.partialorder %v3134_v37, 8.507059e+37  ;;  %vm3165_vm5 = vcmp.eq.f32.partialorder %v3164_v23, 8.507059e+37  ;;  %v3294_v32 = vmul.f32 %v6086_v48, %v6326_v45  ;;  %v6656_v37 = vld [vmem:[#allocation4_spill] sm:$0xff] }
 0x64e   : > { %v3126_v34 = vmul.f32 %v4207_v46, %v6224_v6  ;;  %vm3131_vm13 = vweird.f32 %v4207_v46  ;;  %v3163_v39 = vsel %vm6321_vm1, %v6221_v29, %v3159_v21 }
 0x64f   : > { %4208 = vrcp.f32 %v6286_v44  ;;  %vm3132_vm3 = vmor %vm3130_vm2, %vm3131_vm13  ;;  %v6336_v4 = vsel %vm3165_vm5, %v3167_v36, %v3163_v39  ;;  %v3151_v29 = vand.u32 2147483648, %v6286_v44  ;;  %v3149_v61 = vand.u32 2147483647, %v6286_v44 }
 0x650   : > { %v3127_v56 = vsub.f32 1.0, %v3126_v34  ;;  %vm3145_vm7 = vweird.f32 %v6286_v44  ;;  %v3262_v34 = vpop.permute.xlu0 %3261 }
 0x651   : > { %v3152_v48 = vor.u32 1.1754944e-38, %v3151_v29  ;;  %vm3150_vm9 = vcmp.eq.f32.partialorder %v3149_v61, 8.507059e+37 }
 0x652   : > { %v3128_v31 = vmul.f32 %v4207_v46, %v3127_v56  ;;  %3333 = vrot.lane.b32.xlu0 %v3293_v28, %s4268_s21  ;;  %3329 = vrot.lane.b32.xlu1 %v3291_v12, %s4268_s21 }
 0x654   : > { %v3129_v35 = vadd.f32 %v4207_v46, %v3128_v31  ;;  %3337 = vrot.lane.b32.xlu2 %v3295_v19, %s4268_s21 }
 0x655   : > { %v4209_v10 = vpop.eup %4208 }
 0x656   : > { %v3141_v49 = vmul.f32 %v4209_v10, %v6286_v44  ;;  %v3133_v51 = vsel %vm3132_vm3, %v4207_v46, %v3129_v35  ;;  %vm3146_vm6 = vweird.f32 %v4209_v10  ;;  %v3264_v46 = vpop.permute.xlu1 %3263 }
 0x657   : > { %v6334_v1 = vsel %vm3135_vm4, %v3137_v0, %v3133_v51  ;;  %v3298_v18 = vmul.f32 %v3264_v46, %v6336_v4  ;;  %vm3147_vm8 = vmor %vm3145_vm7, %vm3146_vm6 }
 0x658   : > { %v3142_v6 = vsub.f32 1.0, %v3141_v49  ;;  %v3296_v2 = vmul.f32 %v6052_v25, %v6334_v1 }
 0x65a   : > { %v3143_v24 = vmul.f32 %v4209_v10, %v3142_v6  ;;  %3339 = vrot.lane.b32.xlu0 %v3296_v2, %s4268_s21  ;;  %3335 = vrot.lane.b32.xlu1 %v3294_v32, %s4268_s21 }
 0x65c   : > { %v3144_v12 = vadd.f32 %v4209_v10, %v3143_v24  ;;  %3343 = vrot.lane.b32.xlu2 %v3298_v18, %s4268_s21 }
 0x65e   : > { %v3148_v33 = vsel %vm3147_vm8, %v4209_v10, %v3144_v12 }
 0x65f   : > { %v6349_v25 = vsel %vm3150_vm9, %v3152_v48, %v3148_v33 }
 0x660   : > { %v3297_v42 = vmul.f32 %v3262_v34, %v6349_v25 }
 0x662   : > { %3341 = vrot.lane.b32.xlu1 %v3297_v42, %s4268_s21 }
 0x676   : > { %v3266_v55 = vpop.permute.xlu2 %3265 }
 0x67e   : > { %v6353_v57 = vpop.permute.xlu2 %3519 }
 0x686   : > { %v6355_v56 = vpop.permute.xlu2 %3525 }
 0x68c   : > { %v2861_v28 = vpop.permute.xlu0 %2860 }
 0x68d   : > { %v2894_v44 = vadd.f32 %v2861_v28, %v5657_v16 }
 0x68e   : > { %v3532_v5 = vpop.permute.xlu2 %3531 }
 0x68f   : > { %v3938_v21 = vmul.f32 -1.442695, %v2894_v44  ;;  %v6359_v47 = vmul.f32 %v3532_v5, %v6334_v1 }
 0x691   : > { %4210 = vpow2.f32 %v3938_v21 }
 0x694   : > { %v6361_v31 = vpop.permute.xlu0 %3521  ;;  %v2863_v15 = vpop.permute.xlu1 %2862 }
 0x695   : > { %v2895_v7 = vadd.f32 %v2863_v15, %v6656_v37 }
 0x696   : > { %v3320_v39 = vpop.permute.xlu2 %3319 }
 0x697   : > { %v4211_v19 = vpop.eup %4210  ;;  %v3939_v23 = vmul.f32 -1.442695, %v2895_v7  ;;  %v3366_v42 = vadd.f32 %v3320_v39, %v5370_v11 }
 0x698   : > { %v2958_v50 = vadd.f32 1.0, %v4211_v19 }
 0x699   : > { %4212 = vpow2.f32 %v3939_v23 }
 0x69a   : > { %4214 = vrcp.f32 %v2958_v50  ;;  %v3181_v2 = vand.u32 2147483648, %v2958_v50  ;;  %v3179_v61 = vand.u32 2147483647, %v2958_v50  ;;  %vm3175_vm11 = vweird.f32 %v2958_v50 }
 0x69c   : > { %v6364_v35 = vpop.permute.xlu0 %3527  ;;  %v6366_v10 = vpop.permute.xlu1 %3517  ;;  %v3182_v48 = vor.u32 1.1754944e-38, %v3181_v2  ;;  %vm3180_vm13 = vcmp.eq.f32.partialorder %v3179_v61, 8.507059e+37 }
 0x69e   : > { %v3326_v46 = vpop.permute.xlu2 %3325 }
 0x69f   : > { %v4213_v0 = vpop.eup %4212 }
 0x6a0   : > { %v4215_v49 = vpop.eup %4214  ;;  %v2959_v36 = vadd.f32 1.0, %v4213_v0 }
 0x6a1   : > { %v3171_v51 = vmul.f32 %v4215_v49, %v2958_v50  ;;  %vm3176_vm10 = vweird.f32 %v4215_v49 }
 0x6a2   : > { %4216 = vrcp.f32 %v2959_v36  ;;  %vm3177_vm12 = vmor %vm3175_vm11, %vm3176_vm10  ;;  %v3196_v21 = vand.u32 2147483648, %v2959_v36  ;;  %v3194_v23 = vand.u32 2147483647, %v2959_v36  ;;  %vm3190_vm15 = vweird.f32 %v2959_v36 }
 0x6a3   : > { %v3172_v6 = vsub.f32 1.0, %v3171_v51  ;;  %4218 = vtanh.f32 %v3366_v42 }
 0x6a4   : > { %v3268_v32 = vpop.permute.xlu0 %3267  ;;  %v6368_v29 = vpop.permute.xlu1 %3523  ;;  %v3197_v11 = vor.u32 1.1754944e-38, %v3196_v21  ;;  %vm3195_vm2 = vcmp.eq.f32.partialorder %v3194_v23, 8.507059e+37 }
 0x6a5   : > { %v3173_v24 = vmul.f32 %v4215_v49, %v3172_v6 }
 0x6a6   : > { %v3332_v0 = vpop.permute.xlu2 %3331 }
 0x6a7   : > { %v3174_v18 = vadd.f32 %v4215_v49, %v3173_v24 }
 0x6a8   : > { %v4217_v12 = vpop.eup %4216 }
 0x6a9   : > { %v3186_v33 = vmul.f32 %v4217_v12, %v2959_v36  ;;  %v3178_v34 = vsel %vm3177_vm12, %v4215_v49, %v3174_v18  ;;  %vm3191_vm14 = vweird.f32 %v4217_v12  ;;  %v4219_v6 = vpop.eup %4218  ;;  %v3372_v36 = vadd.f32 %v3332_v0, %v5440_v43 }
 0x6aa   : > { %v6371_v28 = vsel %vm3180_vm13, %v3182_v48, %v3178_v34  ;;  %vm3192_vm1 = vmor %vm3190_vm15, %vm3191_vm14 }
 0x6ab   : > { %v3187_v44 = vsub.f32 1.0, %v3186_v33  ;;  %v3299_v5 = vmul.f32 %v3266_v55, %v6371_v28  ;;  %v3369_v55 = vadd.f32 %v3326_v46, %v5446_v30 }
 0x6ac   : > { %v6374_v15 = vpop.permute.xlu0 %3533  ;;  %v6376_v7 = vpop.permute.xlu1 %3529 }
 0x6ad   : > { %v3188_v19 = vmul.f32 %v4217_v12, %v3187_v44  ;;  %3345 = vrot.lane.b32.xlu0 %v3299_v5, %s4268_s21  ;;  %4220 = vtanh.f32 %v3369_v55 }
 0x6ae   : > { %v3338_v30 = vpop.permute.xlu2 %3337 }
 0x6af   : > { %v3189_v50 = vadd.f32 %v4217_v12, %v3188_v19  ;;  %v3375_v43 = vadd.f32 %v3338_v30, %v5496_v13  ;;  %v3400_v30 = vsub.f32 1.0, %v5983_v58  ;;  %v3399_v58 = vsub.f32 1.0, %v6175_v53 }
 0x6b1   : > { %v3193_v39 = vsel %vm3192_vm1, %v4217_v12, %v3189_v50 }
 0x6b2   : > { %v6380_v49 = vsel %vm3195_vm2, %v3197_v11, %v3193_v39 }
 0x6b3   : > { %v3300_v51 = vmul.f32 %v3268_v32, %v6380_v49  ;;  %v4221_v46 = vpop.eup %4220 }
 0x6b4   : > { %v3322_v2 = vpop.permute.xlu0 %3321  ;;  %v3318_v24 = vpop.permute.xlu1 %3317 }
 0x6b5   : > { %v3365_v61 = vadd.f32 %v3318_v24, %v5421_v59  ;;  %3431 = vrot.lane.b32.xlu0 %v4219_v6, %s4267_s17  ;;  %3347 = vrot.lane.b32.xlu1 %v3300_v51, %s4268_s21  ;;  %v3367_v18 = vadd.f32 %v3322_v2, %v5409_v63  ;;  %v6657_v24 = vld [vmem:[#allocation6_spill] sm:$0xff] }
 0x6b6   : > { %v3344_v5 = vpop.permute.xlu2 %3343 }
 0x6b7   : > { %4222 = vtanh.f32 %v3365_v61  ;;  %v3378_v13 = vadd.f32 %v3344_v5, %v5607_v22  ;;  %v3403_v5 = vsub.f32 1.0, %v6269_v20 }
 0x6b8   : > { %4224 = vtanh.f32 %v3372_v36 }
 0x6b9   : > { %4226 = vtanh.f32 %v3367_v18 }
 0x6bc   : > { %v3328_v12 = vpop.permute.xlu0 %3327  ;;  %v3324_v48 = vpop.permute.xlu1 %3323 }
 0x6bd   : > { %v3368_v32 = vadd.f32 %v3324_v48, %v5431_v3  ;;  %3437 = vrot.lane.b32.xlu0 %v4221_v46, %s4267_s17  ;;  %3535 = vrot.lane.b32.xlu1 %v5931_v14, %s4268_s21  ;;  %v4223_v59 = vpop.eup %4222  ;;  %v3370_v63 = vadd.f32 %v3328_v12, %v5402_v38  ;;  %v6658_v48 = vld [vmem:[#allocation5_spill] sm:$0xff] }
 0x6be   : > { %3429 = vrot.lane.b32.xlu2 %v4223_v59, %s4267_s17  ;;  %v4225_v33 = vpop.eup %4224 }
 0x6bf   : > { %4228 = vtanh.f32 %v3368_v32  ;;  %v4227_v34 = vpop.eup %4226 }
 0x6c0   : > { %4230 = vtanh.f32 %v3375_v43 }
 0x6c1   : > { %4232 = vtanh.f32 %v3370_v63 }
 0x6c4   : > { %v3330_v42 = vpop.permute.xlu1 %3329  ;;  %v3334_v44 = vpop.permute.xlu0 %3333 }
 0x6c5   : > { %v3371_v3 = vadd.f32 %v3330_v42, %v5469_v52  ;;  %3443 = vrot.lane.b32.xlu0 %v4225_v33, %s4267_s17  ;;  %3433 = vrot.lane.b32.xlu1 %v4227_v34, %s4267_s17  ;;  %v4229_v14 = vpop.eup %4228  ;;  %v3373_v38 = vadd.f32 %v3334_v44, %v5475_v17  ;;  %v6659_v42 = vld [vmem:[#allocation7_spill] sm:$0xff] }
 0x6c6   : > { %3435 = vrot.lane.b32.xlu2 %v4229_v14, %s4267_s17  ;;  %v4231_v21 = vpop.eup %4230  ;;  %v3559_v44 = vmul.f32 %v6659_v42, %v6175_v53  ;;  %v3563_v53 = vmul.f32 %v6361_v31, %v6269_v20 }
 0x6c7   : > { %4234 = vtanh.f32 %v3371_v3  ;;  %v4233_v19 = vpop.eup %4232 }
 0x6c8   : > { %4236 = vtanh.f32 %v3378_v13  ;;  %v6661_v13 = vld [vmem:[#allocation3_spill] sm:$0xff] }
 0x6c9   : > { %4238 = vtanh.f32 %v3373_v38 }
 0x6cc   : > { %v3336_v23 = vpop.permute.xlu1 %3335  ;;  %v3340_v11 = vpop.permute.xlu0 %3339 }
 0x6cd   : > { %v3374_v52 = vadd.f32 %v3336_v23, %v5456_v62  ;;  %3449 = vrot.lane.b32.xlu0 %v4231_v21, %s4267_s17  ;;  %3439 = vrot.lane.b32.xlu1 %v4233_v19, %s4267_s17  ;;  %v4235_v50 = vpop.eup %4234  ;;  %v3376_v22 = vadd.f32 %v3340_v11, %v5485_v40  ;;  %v3397_v40 = vsub.f32 1.0, %v5961_v41 }
 0x6ce   : > { %3441 = vrot.lane.b32.xlu2 %v4235_v50, %s4267_s17  ;;  %v4237_v39 = vpop.eup %4236 }
 0x6cf   : > { %4240 = vtanh.f32 %v3374_v52  ;;  %v4239_v17 = vpop.eup %4238  ;;  %v6662_v52 = vld [vmem:[#allocation2_spill] sm:$0xff] }
 0x6d0   : > { %4242 = vtanh.f32 %v3376_v22  ;;  %v3402_v22 = vsub.f32 1.0, %v6227_v9 }
 0x6d4   : > { %v3342_v0 = vpop.permute.xlu1 %3341 }
 0x6d5   : > { %v3377_v55 = vadd.f32 %v3342_v0, %v5546_v8  ;;  %3455 = vrot.lane.b32.xlu0 %v4237_v39, %s4267_s17  ;;  %3445 = vrot.lane.b32.xlu1 %v4239_v17, %s4267_s17  ;;  %v4241_v62 = vpop.eup %4240 }
 0x6d6   : > { %3447 = vrot.lane.b32.xlu2 %v4241_v62, %s4267_s17  ;;  %v4243_v51 = vpop.eup %4242 }
 0x6d7   : > { %4244 = vtanh.f32 %v3377_v55  ;;  %v3562_v55 = vmul.f32 %v6353_v57, %v6227_v9  ;;  %v3405_v57 = vsub.f32 1.0, %v6280_v60 }
 0x6dd   : > { %v4245_v6 = vpop.eup %4244  ;;  %3539 = vrot.lane.b32.xlu0 %v5956_v27, %s4268_s21  ;;  %3451 = vrot.lane.b32.xlu1 %v4243_v51, %s4267_s17  ;;  %v6663_v51 = vld [vmem:[#allocation9_spill] sm:$0xff] }
 0x6de   : > { %3453 = vrot.lane.b32.xlu2 %v4245_v6, %s4267_s17  ;;  %v3401_v6 = vsub.f32 1.0, %v6663_v51  ;;  %v3561_v9 = vmul.f32 %v6366_v10, %v6663_v51 }
 0x718   : > { %v3430_v8 = vpop.permute.xlu2 %3429 }
 0x719   : > { %v3477_v2 = vmul.f32 %v3430_v8, %v3397_v40  ;;  %v3406_v40 = vsub.f32 1.0, %v6326_v45 }
 0x71b   : > { %v3573_v61 = vadd.f32 %v6657_v24, %v3477_v2  ;;  %v3566_v24 = vmul.f32 %v6364_v35, %v6326_v45 }
 0x71f   : > { %v3346_v36 = vpop.permute.xlu0 %3345 }
 0x720   : > { %v3379_v18 = vadd.f32 %v3346_v36, %v5657_v16  ;;  %v3436_v46 = vpop.permute.xlu2 %3435 }
 0x721   : > { %v3480_v12 = vmul.f32 %v3436_v46, %v3400_v30  ;;  %v3565_v30 = vmul.f32 %v6355_v56, %v6280_v60  ;;  %v3569_v60 = vmul.f32 %v6374_v15, %v6349_v25 }
 0x722   : > { %4246 = vtanh.f32 %v3379_v18 }
 0x723   : > { %v3576_v27 = vadd.f32 %v6658_v48, %v3480_v12  ;;  %v3404_v48 = vsub.f32 1.0, %v6245_v54 }
 0x727   : > { %v3348_v32 = vpop.permute.xlu1 %3347  ;;  %v3432_v33 = vpop.permute.xlu0 %3431 }
 0x728   : > { %v4247_v59 = vpop.eup %4246  ;;  %v3380_v43 = vadd.f32 %v3348_v32, %v6656_v37  ;;  %v3442_v16 = vpop.permute.xlu2 %3441  ;;  %v6660_v37 = vld [vmem:[#allocation8_spill] sm:$0xff]  ;;  %v3564_v32 = vmul.f32 %v6368_v29, %v6245_v54  ;;  %v3567_v54 = vmul.f32 %v6376_v7, %v6303_v26  ;;  %v3410_v29 = vsub.f32 1.0, %v6336_v4 }
 0x729   : > { %3457 = vrot.lane.b32.xlu1 %v4247_v59, %s4267_s17  ;;  %v3398_v14 = vsub.f32 1.0, %v6660_v37  ;;  %v3483_v23 = vmul.f32 %v3442_v16, %v3403_v5  ;;  %v3558_v50 = vmul.f32 %v6662_v52, %v6660_v37  ;;  %v3408_v59 = vsub.f32 1.0, %v6334_v1 }
 0x72a   : > { %4248 = vtanh.f32 %v3380_v43  ;;  %v3412_v37 = vsub.f32 1.0, %v6380_v49 }
 0x72b   : > { %v3478_v19 = vmul.f32 %v3432_v33, %v3398_v14  ;;  %v3579_v17 = vadd.f32 %v3563_v53, %v3483_v23 }
 0x72d   : > { %v3574_v39 = vadd.f32 %v3558_v50, %v3478_v19 }
 0x72f   : > { %v6421_v41 = vpop.permute.xlu1 %3535  ;;  %v3438_v38 = vpop.permute.xlu0 %3437 }
 0x730   : > { %v4249_v63 = vpop.eup %4248  ;;  %v3448_v11 = vpop.permute.xlu2 %3447  ;;  %v3481_v20 = vmul.f32 %v3438_v38, %v3401_v6 }
 0x731   : > { %3605 = vrot.lane.b32.xlu1 %v3573_v61, %s4268_s21  ;;  %3459 = vrot.lane.b32.xlu2 %v4249_v63, %s4267_s17  ;;  %v3486_v31 = vmul.f32 %v3448_v11, %v3406_v40 }
 0x732   : > { %v3577_v61 = vadd.f32 %v3561_v9, %v3481_v20 }
 0x733   : > { %v3582_v36 = vadd.f32 %v3566_v24, %v3486_v31 }
 0x737   : > { %v3434_v34 = vpop.permute.xlu1 %3433  ;;  %v3444_v2 = vpop.permute.xlu0 %3443 }
 0x738   : > { %v3479_v3 = vmul.f32 %v3434_v34, %v3399_v58  ;;  %v3454_v46 = vpop.permute.xlu2 %3453  ;;  %v3484_v35 = vmul.f32 %v3444_v2, %v3404_v48  ;;  %v3407_v58 = vsub.f32 1.0, %v6303_v26 }
 0x739   : > { %3611 = vrot.lane.b32.xlu1 %v3576_v27, %s4268_s21  ;;  %3537 = vrot.lane.b32.xlu2 %v6661_v13, %s4268_s21  ;;  %v3409_v27 = vsub.f32 1.0, %v6349_v25 }
 0x73a   : > { %v3575_v21 = vadd.f32 %v3559_v44, %v3479_v3  ;;  %v3580_v43 = vadd.f32 %v3564_v32, %v3484_v35  ;;  %v3570_v44 = vmul.f32 %v6421_v41, %v6336_v4  ;;  %v3411_v4 = vsub.f32 1.0, %v6371_v28 }
 0x73b   : > { %v3489_v10 = vmul.f32 %v3454_v46, %v3409_v27 }
 0x73c   : > { %3609 = vrot.lane.b32.xlu0 %v3575_v21, %s4268_s21 }
 0x73d   : > { %v3585_v63 = vadd.f32 %v3569_v60, %v3489_v10 }
 0x73f   : > { %v3440_v0 = vpop.permute.xlu1 %3439  ;;  %v3450_v56 = vpop.permute.xlu0 %3449 }
 0x740   : > { %v3482_v62 = vmul.f32 %v3440_v0, %v3402_v22  ;;  %v3487_v42 = vmul.f32 %v3450_v56, %v3407_v58 }
 0x741   : > { %3617 = vrot.lane.b32.xlu1 %v3579_v17, %s4268_s21  ;;  %3607 = vrot.lane.b32.xlu2 %v3574_v39, %s4268_s21 }
 0x742   : > { %v3578_v8 = vadd.f32 %v3562_v55, %v3482_v62  ;;  %v3583_v25 = vadd.f32 %v3567_v54, %v3487_v42 }
 0x744   : > { %3615 = vrot.lane.b32.xlu0 %v3578_v8, %s4268_s21 }
 0x747   : > { %v3446_v18 = vpop.permute.xlu1 %3445  ;;  %v3456_v1 = vpop.permute.xlu0 %3455 }
 0x748   : > { %v3485_v12 = vmul.f32 %v3446_v18, %v3405_v57  ;;  %v3490_v15 = vmul.f32 %v3456_v1, %v3410_v29 }
 0x749   : > { %3623 = vrot.lane.b32.xlu1 %v3582_v36, %s4268_s21  ;;  %3613 = vrot.lane.b32.xlu2 %v3577_v61, %s4268_s21 }
 0x74a   : > { %v3581_v45 = vadd.f32 %v3565_v30, %v3485_v12  ;;  %v3586_v3 = vadd.f32 %v3570_v44, %v3490_v15 }
 0x74c   : > { %3621 = vrot.lane.b32.xlu0 %v3581_v45, %s4268_s21 }
 0x74f   : > { %v3452_v33 = vpop.permute.xlu1 %3451 }
 0x750   : > { %v3488_v16 = vmul.f32 %v3452_v33, %v3408_v59 }
 0x751   : > { %3629 = vrot.lane.b32.xlu1 %v3585_v63, %s4268_s21  ;;  %3619 = vrot.lane.b32.xlu2 %v3580_v43, %s4268_s21 }
 0x752   : > { %v3584_v34 = vadd.f32 %v6359_v47, %v3488_v16  ;;  %v3540_v47 = vpop.permute.xlu0 %3539 }
 0x753   : > { %v3572_v26 = vmul.f32 %v3540_v47, %v6380_v49 }
 0x754   : > { %3627 = vrot.lane.b32.xlu0 %v3584_v34, %s4268_s21 }
 0x759   : > { %3625 = vrot.lane.b32.xlu2 %v3583_v25, %s4268_s21 }
 0x761   : > { %3631 = vrot.lane.b32.xlu2 %v3586_v3, %s4268_s21 }
 0x78b   : > { %v3460_v14 = vpop.permute.xlu2 %3459 }
 0x78c   : > { %v3492_v7 = vmul.f32 %v3460_v14, %v3412_v37 }
 0x78e   : > { %v3588_v5 = vadd.f32 %v3572_v26, %v3492_v7 }
 0x790   : > { %3635 = vrot.lane.b32.xlu1 %v3588_v5, %s4268_s21 }
 0x793   : > { %v3538_v13 = vpop.permute.xlu2 %3537 }
 0x794   : > { %v3571_v38 = vmul.f32 %v3538_v13, %v6371_v28 }
 0x79b   : > { %v3608_v41 = vpop.permute.xlu2 %3607  ;;  %v3458_v49 = vpop.permute.xlu1 %3457 }
 0x79c   : > { %3654 = vst.msk [vmem:[%s6482_s23 + $0x8] sm:$0xff] %vm595_vm0, %v3608_v41  ;;  %v3491_v21 = vmul.f32 %v3458_v49, %v3411_v4 }
 0x79e   : > { %v3587_v19 = vadd.f32 %v3571_v38, %v3491_v21 }
 0x7a0   : > { %3633 = vrot.lane.b32.xlu0 %v3587_v19, %s4268_s21 }
 0x7a3   : > { %v3614_v23 = vpop.permute.xlu2 %3613  ;;  %v3606_v52 = vpop.permute.xlu1 %3605 }
 0x7a4   : > { %3657 = vst.msk [vmem:[%s6482_s23 + $0x20] sm:$0xff] %vm595_vm0, %v3614_v23 }
 0x7a5   : > { %3653 = vst.msk [vmem:[%s6482_s23] sm:$0xff] %vm595_vm0, %v3606_v52 }
 0x7ab   : > { %v3620_v50 = vpop.permute.xlu2 %3619  ;;  %v3612_v53 = vpop.permute.xlu1 %3611 }
 0x7ac   : > { %3660 = vst.msk [vmem:[%s6482_s23 + $0x38] sm:$0xff] %vm595_vm0, %v3620_v50 }
 0x7ad   : > { %3656 = vst.msk [vmem:[%s6482_s23 + $0x18] sm:$0xff] %vm595_vm0, %v3612_v53 }
 0x7ae   : > { %v3610_v28 = vpop.permute.xlu0 %3609 }
 0x7af   : > { %3655 = vst.msk [vmem:[%s6482_s23 + $0x10] sm:$0xff] %vm595_vm0, %v3610_v28 }
 0x7b3   : > { %v3626_v11 = vpop.permute.xlu2 %3625  ;;  %v3618_v22 = vpop.permute.xlu1 %3617 }
 0x7b4   : > { %3663 = vst.msk [vmem:[%s6482_s23 + $0x50] sm:$0xff] %vm595_vm0, %v3626_v11 }
 0x7b5   : > { %3659 = vst.msk [vmem:[%s6482_s23 + $0x30] sm:$0xff] %vm595_vm0, %v3618_v22 }
 0x7b6   : > { %v3616_v39 = vpop.permute.xlu0 %3615 }
 0x7b7   : > { %3658 = vst.msk [vmem:[%s6482_s23 + $0x28] sm:$0xff] %vm595_vm0, %v3616_v39 }
 0x7bb   : > { %v3632_v17 = vpop.permute.xlu2 %3631  ;;  %v3624_v0 = vpop.permute.xlu1 %3623 }
 0x7bc   : > { %3666 = vst.msk [vmem:[%s6482_s23 + $0x68] sm:$0xff] %vm595_vm0, %v3632_v17 }
 0x7bd   : > { %3662 = vst.msk [vmem:[%s6482_s23 + $0x48] sm:$0xff] %vm595_vm0, %v3624_v0 }
 0x7be   : > { %v3622_v55 = vpop.permute.xlu0 %3621 }
 0x7bf   : > { %3661 = vst.msk [vmem:[%s6482_s23 + $0x40] sm:$0xff] %vm595_vm0, %v3622_v55 }
 0x7c3   : > { %v3630_v62 = vpop.permute.xlu1 %3629 }
 0x7c4   : > { %3665 = vst.msk [vmem:[%s6482_s23 + $0x60] sm:$0xff] %vm595_vm0, %v3630_v62 }
 0x7c6   : > { %v3628_v51 = vpop.permute.xlu0 %3627 }
 0x7c7   : > { %3664 = vst.msk [vmem:[%s6482_s23 + $0x58] sm:$0xff] %vm595_vm0, %v3628_v51 }
 0x802   : > { %v3636_v6 = vpop.permute.xlu1 %3635 }
 0x803   : > { %3668 = vst.msk [vmem:[%s6482_s23 + $0x78] sm:$0xff] %vm595_vm0, %v3636_v6 }
 0x812   : > { %v3634_v40 = vpop.permute.xlu0 %3633 }
 0x813   : > { %3667 = vst.msk [vmem:[%s6482_s23 + $0x70] sm:$0xff] %vm595_vm0, %v3634_v40 }
 0x814 PF: > { %s20_s13 = sadd.s32 1, %s4265_s13  }
 0x815   : > { %p17_p4 = scmp.ge.s32.totalorder %s20_s13, 4  }
 0x817   :  { %19 = sbr.rel (!%p17_p4) target bundleno = 1 (0x1), region = 99 }

</bundles_post_ra>
